<compile_context>
chip_gen: v7x
topology: tpu7x:2x2x1
jax: 0.10.0
libtpu: 0.0.40
codegen_flags: <defaults>
</compile_context>

<pallas_src>
import functools

import jax
import jax.numpy as jnp
from jax import lax
from jax.experimental import pallas as pl
from jax.experimental.pallas import tpu as pltpu


# ---------------------------------------------------------------------------
# math helpers (pure jnp; shared by the Pallas kernel and the JAX reference
# so the correctness check compares identical math)
# ---------------------------------------------------------------------------
def _layernorm(x, gamma, beta, eps=1e-5):
    # one-pass form: mean and E[x^2] -> halves the cross-lane reductions
    mu = jnp.mean(x, axis=-1, keepdims=True)
    ex2 = jnp.mean(x * x, axis=-1, keepdims=True)
    var = ex2 - mu * mu
    return (x - mu) * lax.rsqrt(var + eps) * gamma + beta


def _dot_bf16(x, w_bf16):
    # MXU matmul: bf16 operands, f32 accumulation (full-rate on v6e / v7x;
    # on v5e only the dot inputs are bf16, elementwise math stays f32)
    return jnp.dot(x.astype(jnp.bfloat16), w_bf16,
                   preferred_element_type=jnp.float32)


def _mlp(x, w1, b1, w2, b2, w3, b3):
    h = jnp.maximum(_dot_bf16(x, w1) + b1, 0.0)
    h = jnp.maximum(_dot_bf16(h, w2) + b2, 0.0)
    return _dot_bf16(h, w3) + b3


def _lstm_from_gates(gates, c, d):
    # PyTorch LSTM gate order: i, f, g, o (bias = b_ih + b_hh, pre-summed)
    i = jax.nn.sigmoid(gates[:, 0 * d:1 * d])
    f = jax.nn.sigmoid(gates[:, 1 * d:2 * d])
    g = jnp.tanh(gates[:, 2 * d:3 * d])
    o = jax.nn.sigmoid(gates[:, 3 * d:4 * d])
    c_new = f * c + i * g
    return o * jnp.tanh(c_new), c_new


# ---------------------------------------------------------------------------
# Pallas kernel: the whole n_rounds message-passing loop + scatter-mean
# ---------------------------------------------------------------------------
def neurosat_kernel(n_vars, n_rounds, dim,
                    A_ref, M_ref, l_init_ref, c_init_ref,
                    lm_w1_ref, lm_b1_ref, lm_w2_ref, lm_b2_ref, lm_w3_ref, lm_b3_ref,
                    cm_w1_ref, cm_b1_ref, cm_w2_ref, cm_b2_ref, cm_w3_ref, cm_b3_ref,
                    lu_wih_a_ref, lu_wih_b_ref, lu_whh_ref, lu_b_ref,
                    cu_wih_ref, cu_whh_ref, cu_b_ref,
                    c_ln1_g_ref, c_ln1_b_ref, c_ln2_g_ref, c_ln2_b_ref,
                    l_ln1_g_ref, l_ln1_b_ref, l_ln2_g_ref, l_ln2_b_ref,
                    out_ref):
    d = dim
    n_lits, n_clauses = A_ref.shape

    # ---- loop invariants hoisted out of the round loop ---------------------
    A = A_ref[...]                                        # (n_lits, n_clauses) f32
    lm_w1, lm_w2, lm_w3 = lm_w1_ref[...], lm_w2_ref[...], lm_w3_ref[...]
    cm_w1, cm_w2, cm_w3 = cm_w1_ref[...], cm_w2_ref[...], cm_w3_ref[...]
    lu_wih_a, lu_wih_b = lu_wih_a_ref[...], lu_wih_b_ref[...]
    lu_whh = lu_whh_ref[...]
    cu_wih, cu_whh = cu_wih_ref[...], cu_whh_ref[...]

    lm_b1 = jnp.broadcast_to(lm_b1_ref[...], (n_lits, d))
    lm_b2 = jnp.broadcast_to(lm_b2_ref[...], (n_lits, d))
    lm_b3 = jnp.broadcast_to(lm_b3_ref[...], (n_lits, d))
    cm_b1 = jnp.broadcast_to(cm_b1_ref[...], (n_clauses, d))
    cm_b2 = jnp.broadcast_to(cm_b2_ref[...], (n_clauses, d))
    cm_b3 = jnp.broadcast_to(cm_b3_ref[...], (n_clauses, d))
    lu_b = jnp.broadcast_to(lu_b_ref[...], (n_lits, 4 * d))
    cu_b = jnp.broadcast_to(cu_b_ref[...], (n_clauses, 4 * d))
    c_ln1_g = jnp.broadcast_to(c_ln1_g_ref[...], (n_clauses, d))
    c_ln1_b = jnp.broadcast_to(c_ln1_b_ref[...], (n_clauses, d))
    c_ln2_g = jnp.broadcast_to(c_ln2_g_ref[...], (n_clauses, d))
    c_ln2_b = jnp.broadcast_to(c_ln2_b_ref[...], (n_clauses, d))
    l_ln1_g = jnp.broadcast_to(l_ln1_g_ref[...], (n_lits, d))
    l_ln1_b = jnp.broadcast_to(l_ln1_b_ref[...], (n_lits, d))
    l_ln2_g = jnp.broadcast_to(l_ln2_g_ref[...], (n_lits, d))
    l_ln2_b = jnp.broadcast_to(l_ln2_b_ref[...], (n_lits, d))

    def one_round(_, carry):
        L_h, L_c, C_h, C_c = carry

        # literal -> clause messages:  LC = A^T @ L_msg(L_h)
        # (contract A's leading axis directly; no transposed copy of A held)
        L_pre = _mlp(L_h, lm_w1, lm_b1, lm_w2, lm_b2, lm_w3, lm_b3)
        LC_msg = lax.dot_general(A, L_pre, (((0,), (0,)), ((), ())),
                                 preferred_element_type=jnp.float32)
        c_gates = _dot_bf16(LC_msg, cu_wih) + _dot_bf16(C_h, cu_whh) + cu_b
        C_h, C_c = _lstm_from_gates(c_gates, C_c, d)
        C_h = _layernorm(C_h, c_ln1_g, c_ln1_b)
        C_c = _layernorm(C_c, c_ln2_g, c_ln2_b)

        # clause -> literal messages:  CL = A @ C_msg(C_h)
        C_pre = _mlp(C_h, cm_w1, cm_b1, cm_w2, cm_b2, cm_w3, cm_b3)
        CL_msg = jnp.dot(A, C_pre, preferred_element_type=jnp.float32)

        # flip(L_h): swap positive / negated literal halves.  n_lits == 2*n_vars,
        # so a sublane-axis roll by n_vars is exactly the half-swap (XLU slot).
        flipped = pltpu.roll(L_h, shift=n_vars, axis=0)

        # split-input LSTM matmul (no cat([CL_msg, flipped], dim=1) temp)
        l_gates = (_dot_bf16(CL_msg, lu_wih_a)
                   + _dot_bf16(flipped, lu_wih_b)
                   + _dot_bf16(L_h, lu_whh) + lu_b)
        L_h, L_c = _lstm_from_gates(l_gates, L_c, d)
        L_h = _layernorm(L_h, l_ln1_g, l_ln1_b)
        L_c = _layernorm(L_c, l_ln2_g, l_ln2_b)
        return L_h, L_c, C_h, C_c

    L_h0 = jnp.broadcast_to(l_init_ref[...], (n_lits, d))
    C_h0 = jnp.broadcast_to(c_init_ref[...], (n_clauses, d))
    L_c0 = jnp.zeros((n_lits, d), jnp.float32)
    C_c0 = jnp.zeros((n_clauses, d), jnp.float32)

    L_h, _, _, _ = lax.fori_loop(0, n_rounds, one_round,
                                 (L_h0, L_c0, C_h0, C_c0))

    # scatter(logits, literal_index, reduce='mean')  ==  M @ logits
    out_ref[...] = jnp.dot(M_ref[...], L_h, preferred_element_type=jnp.float32)


# ---------------------------------------------------------------------------
# wrappers
# ---------------------------------------------------------------------------
def prepare_params(params):
    """bf16-cast the MXU weight matrices and pre-split the literal LSTM W_ih
    into its CL-message / flipped-L_h halves (removes the lane-axis concat)."""
    d = params["l_init"].shape[-1]
    p = {k: v for k, v in params.items() if k != "lu_wih"}
    for k in ("lm_w1", "lm_w2", "lm_w3", "cm_w1", "cm_w2", "cm_w3",
              "cu_wih", "cu_whh", "lu_whh"):
        p[k] = params[k].astype(jnp.bfloat16)
    wih = params["lu_wih"].astype(jnp.bfloat16)      # (2d, 4d), x @ W_ih.T layout
    p["lu_wih_a"], p["lu_wih_b"] = wih[:d], wih[d:]
    return p


def neurosat_forward(params, A, M, n_vars, n_rounds):
    dim = params["l_init"].shape[-1]
    n_probs = M.shape[0]
    n_lits, n_clauses = A.shape
    p = prepare_params(params)

    inputs = [
        A, M, p["l_init"], p["c_init"],
        p["lm_w1"], p["lm_b1"], p["lm_w2"], p["lm_b2"], p["lm_w3"], p["lm_b3"],
        p["cm_w1"], p["cm_b1"], p["cm_w2"], p["cm_b2"], p["cm_w3"], p["cm_b3"],
        p["lu_wih_a"], p["lu_wih_b"], p["lu_whh"], p["lu_b"],
        p["cu_wih"], p["cu_whh"], p["cu_b"],
        p["c_ln1_g"], p["c_ln1_b"], p["c_ln2_g"], p["c_ln2_b"],
        p["l_ln1_g"], p["l_ln1_b"], p["l_ln2_g"], p["l_ln2_b"],
    ]

    # advisory cost hint so XLA schedules neighbouring ops around the call
    mm = lambda m, k, n: 2 * m * k * n
    flops_round = (3 * mm(n_lits, dim, dim) + 3 * mm(n_clauses, dim, dim)
                   + 2 * mm(n_lits, n_clauses, dim)
                   + 2 * mm(n_clauses, dim, 4 * dim)
                   + 3 * mm(n_lits, dim, 4 * dim))
    cost = pl.CostEstimate(
        flops=n_rounds * flops_round + mm(n_probs, n_lits, dim),
        transcendentals=n_rounds * (n_lits + n_clauses) * 6 * dim,
        bytes_accessed=sum(int(x.size) * x.dtype.itemsize for x in inputs)
        + n_probs * dim * 4,
    )

    kernel = functools.partial(neurosat_kernel, n_vars, n_rounds, dim)
    # TODO(synk): at production sizes, tile the dense adjacency matmuls with a
    # grid + BlockSpec pipelining (reduction axis last, "arbitrary") or a
    # scalar-prefetch sparse gather, and add a 'parallel' per-problem grid axis
    # so v7x's two TensorCores split the batch; at toy sizes one VMEM-resident
    # call is optimal.
    return pl.pallas_call(
        kernel,
        out_shape=jax.ShapeDtypeStruct((n_probs, dim), jnp.float32),
        in_specs=[pl.BlockSpec(memory_space=pltpu.MemorySpace.VMEM)] * len(inputs),
        out_specs=pl.BlockSpec(memory_space=pltpu.MemorySpace.VMEM),
        compiler_params=pltpu.CompilerParams(vmem_limit_bytes=64 * 1024 * 1024),
        cost_estimate=cost,
    )(*inputs)


# ---------------------------------------------------------------------------
# pure-JAX reference (same math, no Pallas) for the correctness check
# ---------------------------------------------------------------------------
def neurosat_reference(params, A, M, n_vars, n_rounds):
    d = params["l_init"].shape[-1]
    p = prepare_params(params)
    n_lits, n_clauses = A.shape
    L_h = jnp.broadcast_to(p["l_init"], (n_lits, d))
    L_c = jnp.zeros((n_lits, d), jnp.float32)
    C_h = jnp.broadcast_to(p["c_init"], (n_clauses, d))
    C_c = jnp.zeros((n_clauses, d), jnp.float32)
    for _ in range(n_rounds):
        L_pre = _mlp(L_h, p["lm_w1"], p["lm_b1"], p["lm_w2"], p["lm_b2"],
                     p["lm_w3"], p["lm_b3"])
        LC = A.T @ L_pre
        c_gates = _dot_bf16(LC, p["cu_wih"]) + _dot_bf16(C_h, p["cu_whh"]) + p["cu_b"]
        C_h, C_c = _lstm_from_gates(c_gates, C_c, d)
        C_h = _layernorm(C_h, p["c_ln1_g"], p["c_ln1_b"])
        C_c = _layernorm(C_c, p["c_ln2_g"], p["c_ln2_b"])
        C_pre = _mlp(C_h, p["cm_w1"], p["cm_b1"], p["cm_w2"], p["cm_b2"],
                     p["cm_w3"], p["cm_b3"])
        CL = A @ C_pre
        flipped = jnp.concatenate([L_h[n_vars:2 * n_vars], L_h[:n_vars]], axis=0)
        l_gates = (_dot_bf16(CL, p["lu_wih_a"]) + _dot_bf16(flipped, p["lu_wih_b"])
                   + _dot_bf16(L_h, p["lu_whh"]) + p["lu_b"])
        L_h, L_c = _lstm_from_gates(l_gates, L_c, d)
        L_h = _layernorm(L_h, p["l_ln1_g"], p["l_ln1_b"])
        L_c = _layernorm(L_c, p["l_ln2_g"], p["l_ln2_b"])
    return M @ L_h


# ---------------------------------------------------------------------------
# deterministic parameter / problem construction (mirrors PyTorch init)
# ---------------------------------------------------------------------------
def make_params(key, dim):
    d = dim
    ks = iter(jax.random.split(key, 32))

    def lin(fan_in, shape):
        s = 1.0 / jnp.sqrt(jnp.float32(fan_in))
        return jax.random.uniform(next(ks), shape, jnp.float32, -s, s)

    p = {}
    # L_init / C_init : Linear(1, d) applied to ts = 1  ->  w[:,0] + b
    p["l_init"] = (lin(1, (d, 1))[:, 0] + lin(1, (d,))).reshape(1, d)
    p["c_init"] = (lin(1, (d, 1))[:, 0] + lin(1, (d,))).reshape(1, d)
    # MLP(d, d, d): three Linear layers, weights stored transposed (x @ W.T)
    for pref in ("lm", "cm"):
        for i in (1, 2, 3):
            p[f"{pref}_w{i}"] = lin(d, (d, d)).T
            p[f"{pref}_b{i}"] = lin(d, (1, d))
    # L_update: LSTM(2d -> d);  C_update: LSTM(d -> d).  bias = b_ih + b_hh.
    p["lu_wih"] = lin(d, (4 * d, 2 * d)).T
    p["lu_whh"] = lin(d, (4 * d, d)).T
    p["lu_b"] = (lin(d, (4 * d,)) + lin(d, (4 * d,))).reshape(1, 4 * d)
    p["cu_wih"] = lin(d, (4 * d, d)).T
    p["cu_whh"] = lin(d, (4 * d, d)).T
    p["cu_b"] = (lin(d, (4 * d,)) + lin(d, (4 * d,))).reshape(1, 4 * d)
    # LayerNorms (elementwise_affine=True, PyTorch default init)
    for name in ("c_ln1", "c_ln2", "l_ln1", "l_ln2"):
        p[f"{name}_g"] = jnp.ones((1, d), jnp.float32)
        p[f"{name}_b"] = jnp.zeros((1, d), jnp.float32)
    return p


if __name__ == "__main__":
    dim = 128        # args.dim
    n_rounds = 4     # args.n_rounds
    n_probs = 2
    offsets = jnp.array([5, 3], dtype=jnp.int32)   # vars per problem
    n_vars = int(offsets.sum())                    # 8
    n_lits = 2 * n_vars                            # 16
    n_clauses = 24

    key = jax.random.PRNGKey(0)
    k_par, k_adj = jax.random.split(key)
    params = make_params(k_par, dim)

    # dense L_unpack adjacency (n_lits x n_clauses): 3 random literals / clause
    cell_lits = jax.random.randint(k_adj, (n_clauses, 3), 0, n_lits)
    rows = cell_lits.reshape(-1)
    cols = jnp.repeat(jnp.arange(n_clauses), 3)
    A = jnp.zeros((n_lits, n_clauses), jnp.float32).at[rows, cols].add(1.0)

    # scatter-mean matrix from literal_index (problem membership of literals)
    var_prob = jnp.repeat(jnp.arange(n_probs), offsets, total_repeat_length=n_vars)
    lit_prob = jnp.concatenate([var_prob, var_prob])
    M = (jnp.arange(n_probs)[:, None] == lit_prob[None, :]).astype(jnp.float32)
    M = M / jnp.sum(M, axis=1, keepdims=True)

    out = neurosat_forward(params, A, M, n_vars, n_rounds)
    out = jax.block_until_ready(out)

    ref = jax.block_until_ready(neurosat_reference(params, A, M, n_vars, n_rounds))
    assert out.shape == (n_probs, dim)
    assert jnp.allclose(out, ref, atol=2e-3, rtol=2e-3), "kernel/reference mismatch"

    print("KERNEL_OK")
</pallas_src>

<mosaic_0001>
module attributes {stable_mosaic.version = 11 : i64} {
  func.func @neurosat_kernel(%arg0: memref<16x24xf32, #tpu.memory_space<vmem>>, %arg1: memref<2x16xf32, #tpu.memory_space<vmem>>, %arg2: memref<1x128xf32, #tpu.memory_space<vmem>>, %arg3: memref<1x128xf32, #tpu.memory_space<vmem>>, %arg4: memref<128x128xbf16, #tpu.memory_space<vmem>>, %arg5: memref<1x128xf32, #tpu.memory_space<vmem>>, %arg6: memref<128x128xbf16, #tpu.memory_space<vmem>>, %arg7: memref<1x128xf32, #tpu.memory_space<vmem>>, %arg8: memref<128x128xbf16, #tpu.memory_space<vmem>>, %arg9: memref<1x128xf32, #tpu.memory_space<vmem>>, %arg10: memref<128x128xbf16, #tpu.memory_space<vmem>>, %arg11: memref<1x128xf32, #tpu.memory_space<vmem>>, %arg12: memref<128x128xbf16, #tpu.memory_space<vmem>>, %arg13: memref<1x128xf32, #tpu.memory_space<vmem>>, %arg14: memref<128x128xbf16, #tpu.memory_space<vmem>>, %arg15: memref<1x128xf32, #tpu.memory_space<vmem>>, %arg16: memref<128x512xbf16, #tpu.memory_space<vmem>>, %arg17: memref<128x512xbf16, #tpu.memory_space<vmem>>, %arg18: memref<128x512xbf16, #tpu.memory_space<vmem>>, %arg19: memref<1x512xf32, #tpu.memory_space<vmem>>, %arg20: memref<128x512xbf16, #tpu.memory_space<vmem>>, %arg21: memref<128x512xbf16, #tpu.memory_space<vmem>>, %arg22: memref<1x512xf32, #tpu.memory_space<vmem>>, %arg23: memref<1x128xf32, #tpu.memory_space<vmem>>, %arg24: memref<1x128xf32, #tpu.memory_space<vmem>>, %arg25: memref<1x128xf32, #tpu.memory_space<vmem>>, %arg26: memref<1x128xf32, #tpu.memory_space<vmem>>, %arg27: memref<1x128xf32, #tpu.memory_space<vmem>>, %arg28: memref<1x128xf32, #tpu.memory_space<vmem>>, %arg29: memref<1x128xf32, #tpu.memory_space<vmem>>, %arg30: memref<1x128xf32, #tpu.memory_space<vmem>>, %arg31: memref<2x128xf32, #tpu.memory_space<vmem>>) attributes {dimension_semantics = [], scalar_prefetch = 0 : i64, scratch_operands = 0 : i64, tpu.core_type = #tpu.core_type<tc>} {
    %c0 = arith.constant 0 : index
    %c0_0 = arith.constant 0 : index
    %0 = vector.load %arg0[%c0, %c0_0] : memref<16x24xf32, #tpu.memory_space<vmem>>, vector<16x24xf32>
    %c0_1 = arith.constant 0 : index
    %c0_2 = arith.constant 0 : index
    %1 = vector.load %arg4[%c0_1, %c0_2] : memref<128x128xbf16, #tpu.memory_space<vmem>>, vector<128x128xbf16>
    %c0_3 = arith.constant 0 : index
    %c0_4 = arith.constant 0 : index
    %2 = vector.load %arg6[%c0_3, %c0_4] : memref<128x128xbf16, #tpu.memory_space<vmem>>, vector<128x128xbf16>
    %c0_5 = arith.constant 0 : index
    %c0_6 = arith.constant 0 : index
    %3 = vector.load %arg8[%c0_5, %c0_6] : memref<128x128xbf16, #tpu.memory_space<vmem>>, vector<128x128xbf16>
    %c0_7 = arith.constant 0 : index
    %c0_8 = arith.constant 0 : index
    %4 = vector.load %arg10[%c0_7, %c0_8] : memref<128x128xbf16, #tpu.memory_space<vmem>>, vector<128x128xbf16>
    %c0_9 = arith.constant 0 : index
    %c0_10 = arith.constant 0 : index
    %5 = vector.load %arg12[%c0_9, %c0_10] : memref<128x128xbf16, #tpu.memory_space<vmem>>, vector<128x128xbf16>
    %c0_11 = arith.constant 0 : index
    %c0_12 = arith.constant 0 : index
    %6 = vector.load %arg14[%c0_11, %c0_12] : memref<128x128xbf16, #tpu.memory_space<vmem>>, vector<128x128xbf16>
    %c0_13 = arith.constant 0 : index
    %c0_14 = arith.constant 0 : index
    %7 = vector.load %arg16[%c0_13, %c0_14] : memref<128x512xbf16, #tpu.memory_space<vmem>>, vector<128x512xbf16>
    %c0_15 = arith.constant 0 : index
    %c0_16 = arith.constant 0 : index
    %8 = vector.load %arg17[%c0_15, %c0_16] : memref<128x512xbf16, #tpu.memory_space<vmem>>, vector<128x512xbf16>
    %c0_17 = arith.constant 0 : index
    %c0_18 = arith.constant 0 : index
    %9 = vector.load %arg18[%c0_17, %c0_18] : memref<128x512xbf16, #tpu.memory_space<vmem>>, vector<128x512xbf16>
    %c0_19 = arith.constant 0 : index
    %c0_20 = arith.constant 0 : index
    %10 = vector.load %arg20[%c0_19, %c0_20] : memref<128x512xbf16, #tpu.memory_space<vmem>>, vector<128x512xbf16>
    %c0_21 = arith.constant 0 : index
    %c0_22 = arith.constant 0 : index
    %11 = vector.load %arg21[%c0_21, %c0_22] : memref<128x512xbf16, #tpu.memory_space<vmem>>, vector<128x512xbf16>
    %c0_23 = arith.constant 0 : index
    %c0_24 = arith.constant 0 : index
    %12 = vector.load %arg5[%c0_23, %c0_24] : memref<1x128xf32, #tpu.memory_space<vmem>>, vector<1x128xf32>
    %13 = vector.shape_cast %12 : vector<1x128xf32> to vector<1x128xf32>
    %14 = vector.broadcast %13 : vector<1x128xf32> to vector<16x128xf32>
    %c0_25 = arith.constant 0 : index
    %c0_26 = arith.constant 0 : index
    %15 = vector.load %arg7[%c0_25, %c0_26] : memref<1x128xf32, #tpu.memory_space<vmem>>, vector<1x128xf32>
    %16 = vector.shape_cast %15 : vector<1x128xf32> to vector<1x128xf32>
    %17 = vector.broadcast %16 : vector<1x128xf32> to vector<16x128xf32>
    %c0_27 = arith.constant 0 : index
    %c0_28 = arith.constant 0 : index
    %18 = vector.load %arg9[%c0_27, %c0_28] : memref<1x128xf32, #tpu.memory_space<vmem>>, vector<1x128xf32>
    %19 = vector.shape_cast %18 : vector<1x128xf32> to vector<1x128xf32>
    %20 = vector.broadcast %19 : vector<1x128xf32> to vector<16x128xf32>
    %c0_29 = arith.constant 0 : index
    %c0_30 = arith.constant 0 : index
    %21 = vector.load %arg11[%c0_29, %c0_30] : memref<1x128xf32, #tpu.memory_space<vmem>>, vector<1x128xf32>
    %22 = vector.shape_cast %21 : vector<1x128xf32> to vector<1x128xf32>
    %23 = vector.broadcast %22 : vector<1x128xf32> to vector<24x128xf32>
    %c0_31 = arith.constant 0 : index
    %c0_32 = arith.constant 0 : index
    %24 = vector.load %arg13[%c0_31, %c0_32] : memref<1x128xf32, #tpu.memory_space<vmem>>, vector<1x128xf32>
    %25 = vector.shape_cast %24 : vector<1x128xf32> to vector<1x128xf32>
    %26 = vector.broadcast %25 : vector<1x128xf32> to vector<24x128xf32>
    %c0_33 = arith.constant 0 : index
    %c0_34 = arith.constant 0 : index
    %27 = vector.load %arg15[%c0_33, %c0_34] : memref<1x128xf32, #tpu.memory_space<vmem>>, vector<1x128xf32>
    %28 = vector.shape_cast %27 : vector<1x128xf32> to vector<1x128xf32>
    %29 = vector.broadcast %28 : vector<1x128xf32> to vector<24x128xf32>
    %c0_35 = arith.constant 0 : index
    %c0_36 = arith.constant 0 : index
    %30 = vector.load %arg19[%c0_35, %c0_36] : memref<1x512xf32, #tpu.memory_space<vmem>>, vector<1x512xf32>
    %31 = vector.shape_cast %30 : vector<1x512xf32> to vector<1x512xf32>
    %32 = vector.broadcast %31 : vector<1x512xf32> to vector<16x512xf32>
    %c0_37 = arith.constant 0 : index
    %c0_38 = arith.constant 0 : index
    %33 = vector.load %arg22[%c0_37, %c0_38] : memref<1x512xf32, #tpu.memory_space<vmem>>, vector<1x512xf32>
    %34 = vector.shape_cast %33 : vector<1x512xf32> to vector<1x512xf32>
    %35 = vector.broadcast %34 : vector<1x512xf32> to vector<24x512xf32>
    %c0_39 = arith.constant 0 : index
    %c0_40 = arith.constant 0 : index
    %36 = vector.load %arg23[%c0_39, %c0_40] : memref<1x128xf32, #tpu.memory_space<vmem>>, vector<1x128xf32>
    %37 = vector.shape_cast %36 : vector<1x128xf32> to vector<1x128xf32>
    %38 = vector.broadcast %37 : vector<1x128xf32> to vector<24x128xf32>
    %c0_41 = arith.constant 0 : index
    %c0_42 = arith.constant 0 : index
    %39 = vector.load %arg24[%c0_41, %c0_42] : memref<1x128xf32, #tpu.memory_space<vmem>>, vector<1x128xf32>
    %40 = vector.shape_cast %39 : vector<1x128xf32> to vector<1x128xf32>
    %41 = vector.broadcast %40 : vector<1x128xf32> to vector<24x128xf32>
    %c0_43 = arith.constant 0 : index
    %c0_44 = arith.constant 0 : index
    %42 = vector.load %arg25[%c0_43, %c0_44] : memref<1x128xf32, #tpu.memory_space<vmem>>, vector<1x128xf32>
    %43 = vector.shape_cast %42 : vector<1x128xf32> to vector<1x128xf32>
    %44 = vector.broadcast %43 : vector<1x128xf32> to vector<24x128xf32>
    %c0_45 = arith.constant 0 : index
    %c0_46 = arith.constant 0 : index
    %45 = vector.load %arg26[%c0_45, %c0_46] : memref<1x128xf32, #tpu.memory_space<vmem>>, vector<1x128xf32>
    %46 = vector.shape_cast %45 : vector<1x128xf32> to vector<1x128xf32>
    %47 = vector.broadcast %46 : vector<1x128xf32> to vector<24x128xf32>
    %c0_47 = arith.constant 0 : index
    %c0_48 = arith.constant 0 : index
    %48 = vector.load %arg27[%c0_47, %c0_48] : memref<1x128xf32, #tpu.memory_space<vmem>>, vector<1x128xf32>
    %49 = vector.shape_cast %48 : vector<1x128xf32> to vector<1x128xf32>
    %50 = vector.broadcast %49 : vector<1x128xf32> to vector<16x128xf32>
    %c0_49 = arith.constant 0 : index
    %c0_50 = arith.constant 0 : index
    %51 = vector.load %arg28[%c0_49, %c0_50] : memref<1x128xf32, #tpu.memory_space<vmem>>, vector<1x128xf32>
    %52 = vector.shape_cast %51 : vector<1x128xf32> to vector<1x128xf32>
    %53 = vector.broadcast %52 : vector<1x128xf32> to vector<16x128xf32>
    %c0_51 = arith.constant 0 : index
    %c0_52 = arith.constant 0 : index
    %54 = vector.load %arg29[%c0_51, %c0_52] : memref<1x128xf32, #tpu.memory_space<vmem>>, vector<1x128xf32>
    %55 = vector.shape_cast %54 : vector<1x128xf32> to vector<1x128xf32>
    %56 = vector.broadcast %55 : vector<1x128xf32> to vector<16x128xf32>
    %c0_53 = arith.constant 0 : index
    %c0_54 = arith.constant 0 : index
    %57 = vector.load %arg30[%c0_53, %c0_54] : memref<1x128xf32, #tpu.memory_space<vmem>>, vector<1x128xf32>
    %58 = vector.shape_cast %57 : vector<1x128xf32> to vector<1x128xf32>
    %59 = vector.broadcast %58 : vector<1x128xf32> to vector<16x128xf32>
    %c0_55 = arith.constant 0 : index
    %c0_56 = arith.constant 0 : index
    %60 = vector.load %arg2[%c0_55, %c0_56] : memref<1x128xf32, #tpu.memory_space<vmem>>, vector<1x128xf32>
    %61 = vector.shape_cast %60 : vector<1x128xf32> to vector<1x128xf32>
    %62 = vector.broadcast %61 : vector<1x128xf32> to vector<16x128xf32>
    %c0_57 = arith.constant 0 : index
    %c0_58 = arith.constant 0 : index
    %63 = vector.load %arg3[%c0_57, %c0_58] : memref<1x128xf32, #tpu.memory_space<vmem>>, vector<1x128xf32>
    %64 = vector.shape_cast %63 : vector<1x128xf32> to vector<1x128xf32>
    %65 = vector.broadcast %64 : vector<1x128xf32> to vector<24x128xf32>
    %cst = arith.constant 0.000000e+00 : f32
    %66 = vector.broadcast %cst : f32 to vector<16x128xf32>
    %cst_59 = arith.constant 0.000000e+00 : f32
    %67 = vector.broadcast %cst_59 : f32 to vector<24x128xf32>
    %c0_i32 = arith.constant 0 : i32
    %c4_i32 = arith.constant 4 : i32
    %68 = arith.addi %c0_i32, %c4_i32 : i32
    %c1_i32 = arith.constant 1 : i32
    %69:4 = scf.for %arg32 = %c0_i32 to %68 step %c1_i32 iter_args(%arg33 = %62, %arg34 = %66, %arg35 = %65, %arg36 = %67) -> (vector<16x128xf32>, vector<16x128xf32>, vector<24x128xf32>, vector<24x128xf32>)  : i32 {
      %73 = arith.truncf %arg33 : vector<16x128xf32> to vector<16x128xbf16>
      %cst_65 = arith.constant dense<0.000000e+00> : vector<16x128xf32>
      %74 = tpu.matmul %73, %1, %cst_65 {dimension_numbers = #tpu.dot_dimension_numbers<[1], [0], [0], [1], [0, 0, 1, 1], [], []>} : vector<16x128xbf16>, vector<128x128xbf16>, vector<16x128xf32> -> vector<16x128xf32>
      %75 = arith.addf %74, %14 : vector<16x128xf32>
      %cst_66 = arith.constant 0.000000e+00 : f32
      %76 = vector.broadcast %cst_66 : f32 to vector<16x128xf32>
      %77 = arith.maximumf %75, %76 : vector<16x128xf32>
      %78 = arith.truncf %77 : vector<16x128xf32> to vector<16x128xbf16>
      %cst_67 = arith.constant dense<0.000000e+00> : vector<16x128xf32>
      %79 = tpu.matmul %78, %2, %cst_67 {dimension_numbers = #tpu.dot_dimension_numbers<[1], [0], [0], [1], [0, 0, 1, 1], [], []>} : vector<16x128xbf16>, vector<128x128xbf16>, vector<16x128xf32> -> vector<16x128xf32>
      %80 = arith.addf %79, %17 : vector<16x128xf32>
      %cst_68 = arith.constant 0.000000e+00 : f32
      %81 = vector.broadcast %cst_68 : f32 to vector<16x128xf32>
      %82 = arith.maximumf %80, %81 : vector<16x128xf32>
      %83 = arith.truncf %82 : vector<16x128xf32> to vector<16x128xbf16>
      %cst_69 = arith.constant dense<0.000000e+00> : vector<16x128xf32>
      %84 = tpu.matmul %83, %3, %cst_69 {dimension_numbers = #tpu.dot_dimension_numbers<[1], [0], [0], [1], [0, 0, 1, 1], [], []>} : vector<16x128xbf16>, vector<128x128xbf16>, vector<16x128xf32> -> vector<16x128xf32>
      %85 = arith.addf %84, %20 : vector<16x128xf32>
      %cst_70 = arith.constant dense<0.000000e+00> : vector<24x128xf32>
      %86 = tpu.matmul %0, %85, %cst_70 {dimension_numbers = #tpu.dot_dimension_numbers<[0], [0], [1], [1], [0, 1, 1, 1], [], []>} : vector<16x24xf32>, vector<16x128xf32>, vector<24x128xf32> -> vector<24x128xf32>
      %87 = arith.truncf %86 : vector<24x128xf32> to vector<24x128xbf16>
      %cst_71 = arith.constant dense<0.000000e+00> : vector<24x512xf32>
      %88 = tpu.matmul %87, %10, %cst_71 {dimension_numbers = #tpu.dot_dimension_numbers<[1], [0], [0], [1], [0, 0, 1, 1], [], []>} : vector<24x128xbf16>, vector<128x512xbf16>, vector<24x512xf32> -> vector<24x512xf32>
      %89 = arith.truncf %arg35 : vector<24x128xf32> to vector<24x128xbf16>
      %cst_72 = arith.constant dense<0.000000e+00> : vector<24x512xf32>
      %90 = tpu.matmul %89, %11, %cst_72 {dimension_numbers = #tpu.dot_dimension_numbers<[1], [0], [0], [1], [0, 0, 1, 1], [], []>} : vector<24x128xbf16>, vector<128x512xbf16>, vector<24x512xf32> -> vector<24x512xf32>
      %91 = arith.addf %88, %90 : vector<24x512xf32>
      %92 = arith.addf %91, %35 : vector<24x512xf32>
      %93 = vector.extract_strided_slice %92 {offsets = [0, 0], sizes = [24, 128], strides = [1, 1]} : vector<24x512xf32> to vector<24x128xf32>
      %94 = arith.negf %93 : vector<24x128xf32>
      %95 = math.exp %94 : vector<24x128xf32>
      %cst_73 = arith.constant 1.000000e+00 : f32
      %96 = vector.broadcast %cst_73 : f32 to vector<24x128xf32>
      %97 = arith.addf %96, %95 : vector<24x128xf32>
      %98 = arith.divf %96, %97 : vector<24x128xf32>
      %99 = vector.extract_strided_slice %92 {offsets = [0, 128], sizes = [24, 128], strides = [1, 1]} : vector<24x512xf32> to vector<24x128xf32>
      %100 = arith.negf %99 : vector<24x128xf32>
      %101 = math.exp %100 : vector<24x128xf32>
      %cst_74 = arith.constant 1.000000e+00 : f32
      %102 = vector.broadcast %cst_74 : f32 to vector<24x128xf32>
      %103 = arith.addf %102, %101 : vector<24x128xf32>
      %104 = arith.divf %102, %103 : vector<24x128xf32>
      %105 = vector.extract_strided_slice %92 {offsets = [0, 256], sizes = [24, 128], strides = [1, 1]} : vector<24x512xf32> to vector<24x128xf32>
      %106 = math.tanh %105 : vector<24x128xf32>
      %107 = vector.extract_strided_slice %92 {offsets = [0, 384], sizes = [24, 128], strides = [1, 1]} : vector<24x512xf32> to vector<24x128xf32>
      %108 = arith.negf %107 : vector<24x128xf32>
      %109 = math.exp %108 : vector<24x128xf32>
      %cst_75 = arith.constant 1.000000e+00 : f32
      %110 = vector.broadcast %cst_75 : f32 to vector<24x128xf32>
      %111 = arith.addf %110, %109 : vector<24x128xf32>
      %112 = arith.divf %110, %111 : vector<24x128xf32>
      %113 = arith.mulf %104, %arg36 : vector<24x128xf32>
      %114 = arith.mulf %98, %106 : vector<24x128xf32>
      %115 = arith.addf %113, %114 : vector<24x128xf32>
      %116 = math.tanh %115 : vector<24x128xf32>
      %117 = arith.mulf %112, %116 : vector<24x128xf32>
      %cst_76 = arith.constant dense<0.000000e+00> : vector<24xf32>
      %118 = vector.multi_reduction <add>, %117, %cst_76 [1] : vector<24x128xf32> to vector<24xf32>
      %119 = vector.shape_cast %118 : vector<24xf32> to vector<24x1xf32>
      %cst_77 = arith.constant 1.280000e+02 : f32
      %120 = vector.broadcast %cst_77 : f32 to vector<24x1xf32>
      %121 = arith.divf %119, %120 : vector<24x1xf32>
      %122 = arith.mulf %117, %117 : vector<24x128xf32>
      %cst_78 = arith.constant dense<0.000000e+00> : vector<24xf32>
      %123 = vector.multi_reduction <add>, %122, %cst_78 [1] : vector<24x128xf32> to vector<24xf32>
      %124 = vector.shape_cast %123 : vector<24xf32> to vector<24x1xf32>
      %cst_79 = arith.constant 1.280000e+02 : f32
      %125 = vector.broadcast %cst_79 : f32 to vector<24x1xf32>
      %126 = arith.divf %124, %125 : vector<24x1xf32>
      %127 = arith.mulf %121, %121 : vector<24x1xf32>
      %128 = arith.subf %126, %127 : vector<24x1xf32>
      %129 = vector.broadcast %121 : vector<24x1xf32> to vector<24x128xf32>
      %130 = arith.subf %117, %129 : vector<24x128xf32>
      %cst_80 = arith.constant 9.99999974E-6 : f32
      %131 = vector.broadcast %cst_80 : f32 to vector<24x1xf32>
      %132 = arith.addf %128, %131 : vector<24x1xf32>
      %133 = math.rsqrt %132 : vector<24x1xf32>
      %134 = vector.broadcast %133 : vector<24x1xf32> to vector<24x128xf32>
      %135 = arith.mulf %130, %134 : vector<24x128xf32>
      %136 = arith.mulf %135, %38 : vector<24x128xf32>
      %137 = arith.addf %136, %41 : vector<24x128xf32>
      %cst_81 = arith.constant dense<0.000000e+00> : vector<24xf32>
      %138 = vector.multi_reduction <add>, %115, %cst_81 [1] : vector<24x128xf32> to vector<24xf32>
      %139 = vector.shape_cast %138 : vector<24xf32> to vector<24x1xf32>
      %cst_82 = arith.constant 1.280000e+02 : f32
      %140 = vector.broadcast %cst_82 : f32 to vector<24x1xf32>
      %141 = arith.divf %139, %140 : vector<24x1xf32>
      %142 = arith.mulf %115, %115 : vector<24x128xf32>
      %cst_83 = arith.constant dense<0.000000e+00> : vector<24xf32>
      %143 = vector.multi_reduction <add>, %142, %cst_83 [1] : vector<24x128xf32> to vector<24xf32>
      %144 = vector.shape_cast %143 : vector<24xf32> to vector<24x1xf32>
      %cst_84 = arith.constant 1.280000e+02 : f32
      %145 = vector.broadcast %cst_84 : f32 to vector<24x1xf32>
      %146 = arith.divf %144, %145 : vector<24x1xf32>
      %147 = arith.mulf %141, %141 : vector<24x1xf32>
      %148 = arith.subf %146, %147 : vector<24x1xf32>
      %149 = vector.broadcast %141 : vector<24x1xf32> to vector<24x128xf32>
      %150 = arith.subf %115, %149 : vector<24x128xf32>
      %cst_85 = arith.constant 9.99999974E-6 : f32
      %151 = vector.broadcast %cst_85 : f32 to vector<24x1xf32>
      %152 = arith.addf %148, %151 : vector<24x1xf32>
      %153 = math.rsqrt %152 : vector<24x1xf32>
      %154 = vector.broadcast %153 : vector<24x1xf32> to vector<24x128xf32>
      %155 = arith.mulf %150, %154 : vector<24x128xf32>
      %156 = arith.mulf %155, %44 : vector<24x128xf32>
      %157 = arith.addf %156, %47 : vector<24x128xf32>
      %158 = arith.truncf %137 : vector<24x128xf32> to vector<24x128xbf16>
      %cst_86 = arith.constant dense<0.000000e+00> : vector<24x128xf32>
      %159 = tpu.matmul %158, %4, %cst_86 {dimension_numbers = #tpu.dot_dimension_numbers<[1], [0], [0], [1], [0, 0, 1, 1], [], []>} : vector<24x128xbf16>, vector<128x128xbf16>, vector<24x128xf32> -> vector<24x128xf32>
      %160 = arith.addf %159, %23 : vector<24x128xf32>
      %cst_87 = arith.constant 0.000000e+00 : f32
      %161 = vector.broadcast %cst_87 : f32 to vector<24x128xf32>
      %162 = arith.maximumf %160, %161 : vector<24x128xf32>
      %163 = arith.truncf %162 : vector<24x128xf32> to vector<24x128xbf16>
      %cst_88 = arith.constant dense<0.000000e+00> : vector<24x128xf32>
      %164 = tpu.matmul %163, %5, %cst_88 {dimension_numbers = #tpu.dot_dimension_numbers<[1], [0], [0], [1], [0, 0, 1, 1], [], []>} : vector<24x128xbf16>, vector<128x128xbf16>, vector<24x128xf32> -> vector<24x128xf32>
      %165 = arith.addf %164, %26 : vector<24x128xf32>
      %cst_89 = arith.constant 0.000000e+00 : f32
      %166 = vector.broadcast %cst_89 : f32 to vector<24x128xf32>
      %167 = arith.maximumf %165, %166 : vector<24x128xf32>
      %168 = arith.truncf %167 : vector<24x128xf32> to vector<24x128xbf16>
      %cst_90 = arith.constant dense<0.000000e+00> : vector<24x128xf32>
      %169 = tpu.matmul %168, %6, %cst_90 {dimension_numbers = #tpu.dot_dimension_numbers<[1], [0], [0], [1], [0, 0, 1, 1], [], []>} : vector<24x128xbf16>, vector<128x128xbf16>, vector<24x128xf32> -> vector<24x128xf32>
      %170 = arith.addf %169, %29 : vector<24x128xf32>
      %cst_91 = arith.constant dense<0.000000e+00> : vector<16x128xf32>
      %171 = tpu.matmul %0, %170, %cst_91 {dimension_numbers = #tpu.dot_dimension_numbers<[1], [0], [0], [1], [0, 0, 1, 1], [], []>} : vector<16x24xf32>, vector<24x128xf32>, vector<16x128xf32> -> vector<16x128xf32>
      %c8_i32 = arith.constant 8 : i32
      %172 = tpu.dynamic_rotate %arg33 by %c8_i32 dim 0 : vector<16x128xf32>, i32 -> vector<16x128xf32>
      %173 = arith.truncf %171 : vector<16x128xf32> to vector<16x128xbf16>
      %cst_92 = arith.constant dense<0.000000e+00> : vector<16x512xf32>
      %174 = tpu.matmul %173, %7, %cst_92 {dimension_numbers = #tpu.dot_dimension_numbers<[1], [0], [0], [1], [0, 0, 1, 1], [], []>} : vector<16x128xbf16>, vector<128x512xbf16>, vector<16x512xf32> -> vector<16x512xf32>
      %175 = arith.truncf %172 : vector<16x128xf32> to vector<16x128xbf16>
      %cst_93 = arith.constant dense<0.000000e+00> : vector<16x512xf32>
      %176 = tpu.matmul %175, %8, %cst_93 {dimension_numbers = #tpu.dot_dimension_numbers<[1], [0], [0], [1], [0, 0, 1, 1], [], []>} : vector<16x128xbf16>, vector<128x512xbf16>, vector<16x512xf32> -> vector<16x512xf32>
      %177 = arith.addf %174, %176 : vector<16x512xf32>
      %178 = arith.truncf %arg33 : vector<16x128xf32> to vector<16x128xbf16>
      %cst_94 = arith.constant dense<0.000000e+00> : vector<16x512xf32>
      %179 = tpu.matmul %178, %9, %cst_94 {dimension_numbers = #tpu.dot_dimension_numbers<[1], [0], [0], [1], [0, 0, 1, 1], [], []>} : vector<16x128xbf16>, vector<128x512xbf16>, vector<16x512xf32> -> vector<16x512xf32>
      %180 = arith.addf %177, %179 : vector<16x512xf32>
      %181 = arith.addf %180, %32 : vector<16x512xf32>
      %182 = vector.extract_strided_slice %181 {offsets = [0, 0], sizes = [16, 128], strides = [1, 1]} : vector<16x512xf32> to vector<16x128xf32>
      %183 = arith.negf %182 : vector<16x128xf32>
      %184 = math.exp %183 : vector<16x128xf32>
      %cst_95 = arith.constant 1.000000e+00 : f32
      %185 = vector.broadcast %cst_95 : f32 to vector<16x128xf32>
      %186 = arith.addf %185, %184 : vector<16x128xf32>
      %187 = arith.divf %185, %186 : vector<16x128xf32>
      %188 = vector.extract_strided_slice %181 {offsets = [0, 128], sizes = [16, 128], strides = [1, 1]} : vector<16x512xf32> to vector<16x128xf32>
      %189 = arith.negf %188 : vector<16x128xf32>
      %190 = math.exp %189 : vector<16x128xf32>
      %cst_96 = arith.constant 1.000000e+00 : f32
      %191 = vector.broadcast %cst_96 : f32 to vector<16x128xf32>
      %192 = arith.addf %191, %190 : vector<16x128xf32>
      %193 = arith.divf %191, %192 : vector<16x128xf32>
      %194 = vector.extract_strided_slice %181 {offsets = [0, 256], sizes = [16, 128], strides = [1, 1]} : vector<16x512xf32> to vector<16x128xf32>
      %195 = math.tanh %194 : vector<16x128xf32>
      %196 = vector.extract_strided_slice %181 {offsets = [0, 384], sizes = [16, 128], strides = [1, 1]} : vector<16x512xf32> to vector<16x128xf32>
      %197 = arith.negf %196 : vector<16x128xf32>
      %198 = math.exp %197 : vector<16x128xf32>
      %cst_97 = arith.constant 1.000000e+00 : f32
      %199 = vector.broadcast %cst_97 : f32 to vector<16x128xf32>
      %200 = arith.addf %199, %198 : vector<16x128xf32>
      %201 = arith.divf %199, %200 : vector<16x128xf32>
      %202 = arith.mulf %193, %arg34 : vector<16x128xf32>
      %203 = arith.mulf %187, %195 : vector<16x128xf32>
      %204 = arith.addf %202, %203 : vector<16x128xf32>
      %205 = math.tanh %204 : vector<16x128xf32>
      %206 = arith.mulf %201, %205 : vector<16x128xf32>
      %cst_98 = arith.constant dense<0.000000e+00> : vector<16xf32>
      %207 = vector.multi_reduction <add>, %206, %cst_98 [1] : vector<16x128xf32> to vector<16xf32>
      %208 = vector.shape_cast %207 : vector<16xf32> to vector<16x1xf32>
      %cst_99 = arith.constant 1.280000e+02 : f32
      %209 = vector.broadcast %cst_99 : f32 to vector<16x1xf32>
      %210 = arith.divf %208, %209 : vector<16x1xf32>
      %211 = arith.mulf %206, %206 : vector<16x128xf32>
      %cst_100 = arith.constant dense<0.000000e+00> : vector<16xf32>
      %212 = vector.multi_reduction <add>, %211, %cst_100 [1] : vector<16x128xf32> to vector<16xf32>
      %213 = vector.shape_cast %212 : vector<16xf32> to vector<16x1xf32>
      %cst_101 = arith.constant 1.280000e+02 : f32
      %214 = vector.broadcast %cst_101 : f32 to vector<16x1xf32>
      %215 = arith.divf %213, %214 : vector<16x1xf32>
      %216 = arith.mulf %210, %210 : vector<16x1xf32>
      %217 = arith.subf %215, %216 : vector<16x1xf32>
      %218 = vector.broadcast %210 : vector<16x1xf32> to vector<16x128xf32>
      %219 = arith.subf %206, %218 : vector<16x128xf32>
      %cst_102 = arith.constant 9.99999974E-6 : f32
      %220 = vector.broadcast %cst_102 : f32 to vector<16x1xf32>
      %221 = arith.addf %217, %220 : vector<16x1xf32>
      %222 = math.rsqrt %221 : vector<16x1xf32>
      %223 = vector.broadcast %222 : vector<16x1xf32> to vector<16x128xf32>
      %224 = arith.mulf %219, %223 : vector<16x128xf32>
      %225 = arith.mulf %224, %50 : vector<16x128xf32>
      %226 = arith.addf %225, %53 : vector<16x128xf32>
      %cst_103 = arith.constant dense<0.000000e+00> : vector<16xf32>
      %227 = vector.multi_reduction <add>, %204, %cst_103 [1] : vector<16x128xf32> to vector<16xf32>
      %228 = vector.shape_cast %227 : vector<16xf32> to vector<16x1xf32>
      %cst_104 = arith.constant 1.280000e+02 : f32
      %229 = vector.broadcast %cst_104 : f32 to vector<16x1xf32>
      %230 = arith.divf %228, %229 : vector<16x1xf32>
      %231 = arith.mulf %204, %204 : vector<16x128xf32>
      %cst_105 = arith.constant dense<0.000000e+00> : vector<16xf32>
      %232 = vector.multi_reduction <add>, %231, %cst_105 [1] : vector<16x128xf32> to vector<16xf32>
      %233 = vector.shape_cast %232 : vector<16xf32> to vector<16x1xf32>
      %cst_106 = arith.constant 1.280000e+02 : f32
      %234 = vector.broadcast %cst_106 : f32 to vector<16x1xf32>
      %235 = arith.divf %233, %234 : vector<16x1xf32>
      %236 = arith.mulf %230, %230 : vector<16x1xf32>
      %237 = arith.subf %235, %236 : vector<16x1xf32>
      %238 = vector.broadcast %230 : vector<16x1xf32> to vector<16x128xf32>
      %239 = arith.subf %204, %238 : vector<16x128xf32>
      %cst_107 = arith.constant 9.99999974E-6 : f32
      %240 = vector.broadcast %cst_107 : f32 to vector<16x1xf32>
      %241 = arith.addf %237, %240 : vector<16x1xf32>
      %242 = math.rsqrt %241 : vector<16x1xf32>
      %243 = vector.broadcast %242 : vector<16x1xf32> to vector<16x128xf32>
      %244 = arith.mulf %239, %243 : vector<16x128xf32>
      %245 = arith.mulf %244, %56 : vector<16x128xf32>
      %246 = arith.addf %245, %59 : vector<16x128xf32>
      scf.yield %226, %246, %137, %157 : vector<16x128xf32>, vector<16x128xf32>, vector<24x128xf32>, vector<24x128xf32>
    }
    %c0_60 = arith.constant 0 : index
    %c0_61 = arith.constant 0 : index
    %70 = vector.load %arg1[%c0_60, %c0_61] : memref<2x16xf32, #tpu.memory_space<vmem>>, vector<2x16xf32>
    %cst_62 = arith.constant dense<0.000000e+00> : vector<2x128xf32>
    %71 = tpu.matmul %70, %69#0, %cst_62 {dimension_numbers = #tpu.dot_dimension_numbers<[1], [0], [0], [1], [0, 0, 1, 1], [], []>} : vector<2x16xf32>, vector<16x128xf32>, vector<2x128xf32> -> vector<2x128xf32>
    %c0_63 = arith.constant 0 : index
    %c0_64 = arith.constant 0 : index
    %72 = vector.load %arg31[%c0_63, %c0_64] : memref<2x128xf32, #tpu.memory_space<vmem>>, vector<2x128xf32>
    tpu.vector_store %arg31[%c0_63, %c0_64], %71 {strides = array<i32>} : memref<2x128xf32, #tpu.memory_space<vmem>>, vector<2x128xf32>,
    return
  }
}

</mosaic_0001>

<bundles_post_ra>
// kernel: tpu_custom_call.1
= control target key start
LH: loop header
LB: loop body
LE: loop exit
PB: predicated region body
PF: predicated region fallthrough
CT: control target
= control target key end

     0   :  { %s5048_s6 = smov 1   ;;  %s5049_s10 = smov 2   ;;  %s6758_s0 = inlined_call_operand.smem [shape: u32[32], index: -1, kind: input, shape index: {}] }
   0x1   :  { %s5132_s5 = sld [smem:[%s6758_s0]]   ;;  %s5050_s14 = smov 3  }
   0x2   :  { %s5137_s9 = sld [smem:[%s6758_s0 + %s5048_s6]]   ;;  %s5051_s18 = smov 4  }
   0x3   :  { %s5142_s13 = sld [smem:[%s6758_s0 + %s5049_s10]]   ;;  %s5052_s22 = smov 5  }
   0x4   :  { %s5147_s17 = sld [smem:[%s6758_s0 + %s5050_s14]]   ;;  %s5053_s26 = smov 6  }
   0x5   :  { %s5152_s21 = sld [smem:[%s6758_s0 + %s5051_s18]]   ;;  %s5054_s30 = smov 7  }
   0x6   :  { %s5157_s25 = sld [smem:[%s6758_s0 + %s5052_s22]]   ;;  %s5055_s4 = smov 8  }
   0x7   :  { %7125 = sst [smem:[#allocation68_spill]] %s5132_s5  ;;  %s5056_s10 = smov 9  }
   0x8   :  { %s5162_s29 = sld [smem:[%s6758_s0 + %s5053_s26]]   ;;  %s5057_s15 = smov 10  }
   0x9   :  { %7126 = sst [smem:[#allocation69_spill]] %s5142_s13  ;;  %s5058_s20 = smov 11  }
   0xa   :  { %s5167_s3 = sld [smem:[%s6758_s0 + %s5054_s30]]   ;;  %s5059_s26 = smov 12  }
   0xb   :  { %7127 = sst [smem:[#allocation70_spill]] %s5152_s21  ;;  %s5060_s1 = smov 13  }
   0xc   :  { %s5172_s8 = sld [smem:[%s6758_s0 + %s5055_s4]]   ;;  %s5061_s7 = smov 14  }
   0xd   :  { %s5177_s14 = sld [smem:[%s6758_s0 + %s5056_s10]]   ;;  %s5063_s22 = smov 16  }
   0xe   :  { %7128 = sst [smem:[#allocation71_spill]] %s5162_s29  ;;  %s5064_s28 = smov 17  }
   0xf   :  { %s5182_s19 = sld [smem:[%s6758_s0 + %s5057_s15]]   ;;  %s5062_s15 = smov 15  }
  0x10   :  { %s5187_s24 = sld [smem:[%s6758_s0 + %s5058_s20]]  }
  0x11   :  { %s5192_s30 = sld [smem:[%s6758_s0 + %s5059_s26]]  }
  0x12   :  { %7129 = sst [smem:[#allocation72_spill]] %s5172_s8 }
  0x13   :  { %s5197_s6 = sld [smem:[%s6758_s0 + %s5060_s1]]  }
  0x14   :  { %s5202_s12 = sld [smem:[%s6758_s0 + %s5061_s7]]   ;;  %s5065_s7 = smov 18  }
  0x15   :  { %7130 = sst [smem:[#allocation73_spill]] %s5182_s19 }
  0x16   :  { %s5207_s20 = sld [smem:[%s6758_s0 + %s5062_s15]]   ;;  %s5066_s15 = smov 19  }
  0x17   :  { %7131 = sst [smem:[#allocation74_spill]] %s5192_s30 }
  0x18   :  { %s5212_s27 = sld [smem:[%s6758_s0 + %s5063_s22]]   ;;  %s5067_s22 = smov 20  }
  0x19   :  { %s5217_s4 = sld [smem:[%s6758_s0 + %s5064_s28]]   ;;  %s5068_s28 = smov 21  }
  0x1a   :  { %7132 = sst [smem:[#allocation75_spill]] %s5202_s12 }
  0x1b   :  { %s5222_s12 = sld [smem:[%s6758_s0 + %s5065_s7]]   ;;  %s5069_s7 = smov 22  }
  0x1c   :  { %s5227_s30 = sld [smem:[%s6758_s0 + %s5066_s15]]   ;;  %s5070_s15 = smov 23  }
  0x1d   :  { %s5237_s19 = sld [smem:[%s6758_s0 + %s5068_s28]]   ;;  %s5072_s28 = smov 25  }
  0x1e   :  { %7133 = sst [smem:[#allocation76_spill]] %s5212_s27 }
  0x1f   :  { %s5232_s27 = sld [smem:[%s6758_s0 + %s5067_s22]]   ;;  %s5071_s22 = smov 24  }
  0x20   :  { %s5247_s8 = sld [smem:[%s6758_s0 + %s5070_s15]]   ;;  %s5074_s15 = smov 27  }
  0x21   :  { %7134 = sst [smem:[#allocation77_spill]] %s5222_s12 }
  0x22   :  { %s5242_s12 = sld [smem:[%s6758_s0 + %s5069_s7]]   ;;  %s5073_s7 = smov 26  }
  0x23   :  { %s5257_s29 = sld [smem:[%s6758_s0 + %s5072_s28]]   ;;  %s5076_s28 = smov 29  }
  0x24   :  { %s5267_s21 = sld [smem:[%s6758_s0 + %s5074_s15]]   ;;  %s5078_s15 = smov 31  }
  0x25   :  { %7135 = sst [smem:[#allocation78_spill]] %s5232_s27 }
  0x26   :  { %s5252_s27 = sld [smem:[%s6758_s0 + %s5071_s22]]   ;;  %s5075_s22 = smov 28  }
  0x27   :  { %s5277_s13 = sld [smem:[%s6758_s0 + %s5076_s28]]  }
  0x28   :  { %7136 = sst [smem:[#allocation79_spill]] %s5242_s12 }
  0x29   :  { %s5262_s12 = sld [smem:[%s6758_s0 + %s5073_s7]]   ;;  %s5077_s7 = smov 30  }
  0x2a   :  { %s5287_s5 = sld [smem:[%s6758_s0 + %s5078_s15]]  }
  0x2c   :  { %7137 = sst [smem:[#allocation80_spill]] %s5252_s27 }
  0x2d   :  { %s5272_s27 = sld [smem:[%s6758_s0 + %s5075_s22]]  }
  0x2f   :  { %7138 = sst [smem:[#allocation81_spill]] %s5262_s12 }
  0x30   :  { %s5282_s12 = sld [smem:[%s6758_s0 + %s5077_s7]]  }
  0x31   :  { %68 = vsyncpa [#allocation3], 0 }
  0x32   :  { %69 = vsyncpa [#allocation6], 0 }
  0x33   :  { %70 = vsyncpa [#allocation9], 0 }
  0x34   :  { %71 = vsyncpa [#allocation12], 0 }
  0x35   :  { %72 = vsyncpa [#allocation15], 0 }
  0x36   :  { %73 = vsyncpa [#allocation18], 0 }
  0x37   :  { %74 = vsyncpa [#allocation21], 0 }
  0x38   :  { %75 = vsyncpa [#allocation24], 0 }
  0x39   :  { %76 = vsyncpa [#allocation27], 0 }
  0x3a   :  { %77 = vsyncpa [#allocation30], 0 }
  0x3b   :  { %78 = vsyncpa [#allocation33], 0 }
  0x3c   :  { %79 = vsyncpa [#allocation36], 0 }
  0x3d   :  { %80 = vsyncpa [#allocation39], 0 }
  0x3e   :  { %81 = vsyncpa [#allocation42], 0 }
  0x3f   :  { %82 = vsyncpa [#allocation45], 0 }
  0x40   :  { %83 = vsyncpa [#allocation48], 0 }
  0x41   :  { %84 = vsyncpa [#allocation4], 0  ;;  %s5079_s0 = smov [#allocation5]   ;;  %s5080_s23 = smov [#allocation8]  }
  0x42   :  { %s103_s22 = sshll.u32 %s5079_s0, 4  ;;  %s123_s26 = sshll.u32 %s5080_s23, 4  ;;  %s104_s22 = int_to_ptr.vmem [resolvable:$true] %s103_s22  ;;  %s124_s26 = int_to_ptr.vmem [resolvable:$true] %s123_s26 }
  0x43   :  { %s4222_s28 = scalar_lea.hbm %s5137_s9, 32 }
  0x44   :  { %p4223_p0 = scmp.ne.s32.totalorder %s5137_s9, %s4222_s28  ;;  %p4226_p1 = scmp.lt.u32.totalorder %s4222_s28, %s5137_s9 }
  0x46   :  { %p4228_p2 = pnand %p4226_p1, %p4223_p0 }
  0x48   :  { %4231 = shalt.err (!%p4228_p2)
}
  0x49   :  { %s4232_s1 = scalar_lea.vmem %s104_s22, 32  ;;  %p4237_p4 = scmp.lt.s32.totalorder %s104_s22, %s104_s22 }
  0x4a   :  { %p4233_p3 = scmp.ne.s32.totalorder %s104_s22, %s4232_s1  ;;  %p4238_p5 = scmp.lt.s32.totalorder %s4232_s1, %s4232_s1 }
  0x4c   :  { %p4239_p6 = por %p4238_p5, %p4237_p4 }
  0x4e   :  { %p4240_p7 = pnand %p4239_p6, %p4233_p3 }
  0x50   :  { %4243 = shalt.err (!%p4240_p7)
}
  0x51   :  { %106 = dma.hbm_to_vmem [thread:$0]  %s5137_s9, 32, %s104_s22, [#allocation6]  }
  0x52   :  { %s4244_s2 = scalar_lea.hbm %s5147_s17, 16 }
  0x53   :  { %p4245_p8 = scmp.ne.s32.totalorder %s5147_s17, %s4244_s2  ;;  %p4248_p9 = scmp.lt.u32.totalorder %s4244_s2, %s5147_s17 }
  0x55   :  { %p4250_p10 = pnand %p4248_p9, %p4245_p8 }
  0x57   :  { %4253 = shalt.err (!%p4250_p10)
}
  0x58   :  { %s4254_s7 = scalar_lea.vmem %s124_s26, 16  ;;  %s4258_s10 = scalar_lea.vmem %s124_s26, 32 }
  0x59   :  { %p4255_p11 = scmp.ne.s32.totalorder %s124_s26, %s4254_s7  ;;  %p4259_p12 = scmp.lt.s32.totalorder %s124_s26, %s124_s26 }
  0x5a   :  { %p4260_p13 = scmp.lt.s32.totalorder %s4258_s10, %s4254_s7 }
  0x5c   :  { %p4261_p0 = por %p4260_p13, %p4259_p12 }
  0x5e   :  { %p4262_p1 = pnand %p4261_p0, %p4255_p11 }
  0x60   :  { %4265 = shalt.err (!%p4262_p1)
}
  0x61   :  { %126 = dma.hbm_to_vmem [thread:$0]  %s5147_s17, 16, %s124_s26, [#allocation9]  }
  0x62   :  { %s5081_s11 = smov [#allocation11]   ;;  %s5082_s15 = smov [#allocation14]  }
  0x63   :  { %s145_s9 = sshll.u32 %s5081_s11, 4  ;;  %s167_s16 = sshll.u32 %s5082_s15, 4  ;;  %s146_s9 = int_to_ptr.vmem [resolvable:$true] %s145_s9  ;;  %s168_s16 = int_to_ptr.vmem [resolvable:$true] %s167_s16 }
  0x64   :  { %s4266_s18 = scalar_lea.hbm %s5157_s25, 16 }
  0x65   :  { %p4267_p2 = scmp.ne.s32.totalorder %s5157_s25, %s4266_s18  ;;  %p4270_p3 = scmp.lt.u32.totalorder %s4266_s18, %s5157_s25 }
  0x67   :  { %p4272_p4 = pnand %p4270_p3, %p4267_p2 }
  0x69   :  { %4275 = shalt.err (!%p4272_p4)
}
  0x6a   :  { %s4276_s0 = scalar_lea.vmem %s146_s9, 16  ;;  %s4280_s22 = scalar_lea.vmem %s146_s9, 32 }
  0x6b   :  { %p4277_p5 = scmp.ne.s32.totalorder %s146_s9, %s4276_s0  ;;  %p4281_p6 = scmp.lt.s32.totalorder %s146_s9, %s146_s9 }
  0x6c   :  { %p4282_p7 = scmp.lt.s32.totalorder %s4280_s22, %s4276_s0 }
  0x6e   :  { %p4283_p8 = por %p4282_p7, %p4281_p6 }
  0x70   :  { %p4284_p9 = pnand %p4283_p8, %p4277_p5 }
  0x72   :  { %4287 = shalt.err (!%p4284_p9)
}
  0x73   :  { %148 = dma.hbm_to_vmem [thread:$0]  %s5157_s25, 16, %s146_s9, [#allocation12]  }
  0x74   :  { %s4288_s17 = scalar_lea.hbm %s5167_s3, 16 }
  0x75   :  { %p4289_p10 = scmp.ne.s32.totalorder %s5167_s3, %s4288_s17  ;;  %p4292_p11 = scmp.lt.u32.totalorder %s4288_s17, %s5167_s3 }
  0x77   :  { %p4294_p12 = pnand %p4292_p11, %p4289_p10 }
  0x79   :  { %4297 = shalt.err (!%p4294_p12)
}
  0x7a   :  { %s4298_s23 = scalar_lea.vmem %s168_s16, 16  ;;  %s4302_s26 = scalar_lea.vmem %s168_s16, 32 }
  0x7b   :  { %p4299_p13 = scmp.ne.s32.totalorder %s168_s16, %s4298_s23  ;;  %p4303_p0 = scmp.lt.s32.totalorder %s168_s16, %s168_s16 }
  0x7c   :  { %p4304_p1 = scmp.lt.s32.totalorder %s4302_s26, %s4298_s23 }
  0x7e   :  { %p4305_p2 = por %p4304_p1, %p4303_p0 }
  0x80   :  { %p4306_p3 = pnand %p4305_p2, %p4299_p13 }
  0x82   :  { %4309 = shalt.err (!%p4306_p3)
}
  0x83   :  { %170 = dma.hbm_to_vmem [thread:$0]  %s5167_s3, 16, %s168_s16, [#allocation15]  }
  0x84   :  { %s5083_s28 = smov [#allocation17]   ;;  %s5084_s1 = smov [#allocation20]  }
  0x85   :  { %s189_s25 = sshll.u32 %s5083_s28, 4  ;;  %s211_s2 = sshll.u32 %s5084_s1, 4  ;;  %s190_s25 = int_to_ptr.vmem [resolvable:$true] %s189_s25  ;;  %s212_s2 = int_to_ptr.vmem [resolvable:$true] %s211_s2 }
  0x86   :  { %s4310_s7 = scalar_lea.hbm %s5177_s14, 16 }
  0x87   :  { %p4311_p4 = scmp.ne.s32.totalorder %s5177_s14, %s4310_s7  ;;  %p4314_p5 = scmp.lt.u32.totalorder %s4310_s7, %s5177_s14 }
  0x89   :  { %p4316_p6 = pnand %p4314_p5, %p4311_p4 }
  0x8b   :  { %4319 = shalt.err (!%p4316_p6)
}
  0x8c   :  { %s4320_s10 = scalar_lea.vmem %s190_s25, 16  ;;  %s4324_s11 = scalar_lea.vmem %s190_s25, 32 }
  0x8d   :  { %p4321_p7 = scmp.ne.s32.totalorder %s190_s25, %s4320_s10  ;;  %p4325_p8 = scmp.lt.s32.totalorder %s190_s25, %s190_s25 }
  0x8e   :  { %p4326_p9 = scmp.lt.s32.totalorder %s4324_s11, %s4320_s10 }
  0x90   :  { %p4327_p10 = por %p4326_p9, %p4325_p8 }
  0x92   :  { %p4328_p11 = pnand %p4327_p10, %p4321_p7 }
  0x94   :  { %4331 = shalt.err (!%p4328_p11)
}
  0x95   :  { %192 = dma.hbm_to_vmem [thread:$0]  %s5177_s14, 16, %s190_s25, [#allocation18]  }
  0x96   :  { %s4332_s3 = scalar_lea.hbm %s5187_s24, 16 }
  0x97   :  { %p4333_p12 = scmp.ne.s32.totalorder %s5187_s24, %s4332_s3  ;;  %p4336_p13 = scmp.lt.u32.totalorder %s4332_s3, %s5187_s24 }
  0x99   :  { %p4338_p0 = pnand %p4336_p13, %p4333_p12 }
  0x9b   :  { %4341 = shalt.err (!%p4338_p0)
}
  0x9c   :  { %s4342_s9 = scalar_lea.vmem %s212_s2, 16  ;;  %s4346_s15 = scalar_lea.vmem %s212_s2, 32 }
  0x9d   :  { %p4343_p1 = scmp.ne.s32.totalorder %s212_s2, %s4342_s9  ;;  %p4347_p2 = scmp.lt.s32.totalorder %s212_s2, %s212_s2 }
  0x9e   :  { %p4348_p3 = scmp.lt.s32.totalorder %s4346_s15, %s4342_s9 }
  0xa0   :  { %p4349_p4 = por %p4348_p3, %p4347_p2 }
  0xa2   :  { %p4350_p5 = pnand %p4349_p4, %p4343_p1 }
  0xa4   :  { %4353 = shalt.err (!%p4350_p5)
}
  0xa5   :  { %214 = dma.hbm_to_vmem [thread:$0]  %s5187_s24, 16, %s212_s2, [#allocation21]  }
  0xa6   :  { %s5085_s16 = smov [#allocation23]   ;;  %s5086_s18 = smov [#allocation26]  }
  0xa7   :  { %s233_s14 = sshll.u32 %s5085_s16, 4  ;;  %s255_s0 = sshll.u32 %s5086_s18, 4  ;;  %s234_s14 = int_to_ptr.vmem [resolvable:$true] %s233_s14  ;;  %s256_s0 = int_to_ptr.vmem [resolvable:$true] %s255_s0 }
  0xa8   :  { %s4354_s22 = scalar_lea.hbm %s5197_s6, 16 }
  0xa9   :  { %p4355_p6 = scmp.ne.s32.totalorder %s5197_s6, %s4354_s22  ;;  %p4358_p7 = scmp.lt.u32.totalorder %s4354_s22, %s5197_s6 }
  0xab   :  { %p4360_p8 = pnand %p4358_p7, %p4355_p6 }
  0xad   :  { %4363 = shalt.err (!%p4360_p8)
}
  0xae   :  { %s4364_s17 = scalar_lea.vmem %s234_s14, 16  ;;  %s4368_s23 = scalar_lea.vmem %s234_s14, 32 }
  0xaf   :  { %p4365_p9 = scmp.ne.s32.totalorder %s234_s14, %s4364_s17  ;;  %p4369_p10 = scmp.lt.s32.totalorder %s234_s14, %s234_s14 }
  0xb0   :  { %p4370_p11 = scmp.lt.s32.totalorder %s4368_s23, %s4364_s17 }
  0xb2   :  { %p4371_p12 = por %p4370_p11, %p4369_p10 }
  0xb4   :  { %p4372_p13 = pnand %p4371_p12, %p4365_p9 }
  0xb6   :  { %4375 = shalt.err (!%p4372_p13)
}
  0xb7   :  { %236 = dma.hbm_to_vmem [thread:$0]  %s5197_s6, 16, %s234_s14, [#allocation24]  }
  0xb8   :  { %s4376_s24 = scalar_lea.hbm %s5207_s20, 16 }
  0xb9   :  { %p4377_p0 = scmp.ne.s32.totalorder %s5207_s20, %s4376_s24  ;;  %p4380_p1 = scmp.lt.u32.totalorder %s4376_s24, %s5207_s20 }
  0xbb   :  { %p4382_p2 = pnand %p4380_p1, %p4377_p0 }
  0xbd   :  { %4385 = shalt.err (!%p4382_p2)
}
  0xbe   :  { %s4386_s26 = scalar_lea.vmem %s256_s0, 16  ;;  %s4390_s28 = scalar_lea.vmem %s256_s0, 32 }
  0xbf   :  { %p4387_p3 = scmp.ne.s32.totalorder %s256_s0, %s4386_s26  ;;  %p4391_p4 = scmp.lt.s32.totalorder %s256_s0, %s256_s0 }
  0xc0   :  { %p4392_p5 = scmp.lt.s32.totalorder %s4390_s28, %s4386_s26 }
  0xc2   :  { %p4393_p6 = por %p4392_p5, %p4391_p4 }
  0xc4   :  { %p4394_p7 = pnand %p4393_p6, %p4387_p3 }
  0xc6   :  { %4397 = shalt.err (!%p4394_p7)
}
  0xc7   :  { %258 = dma.hbm_to_vmem [thread:$0]  %s5207_s20, 16, %s256_s0, [#allocation27]  }
  0xc8   :  { %s5087_s25 = smov [#allocation29]   ;;  %s5088_s1 = smov [#allocation32]  }
  0xc9   :  { %s276_s6 = sshll.u32 %s5087_s25, 4  ;;  %s301_s2 = sshll.u32 %s5088_s1, 4  ;;  %s277_s6 = int_to_ptr.vmem [resolvable:$true] %s276_s6  ;;  %s302_s2 = int_to_ptr.vmem [resolvable:$true] %s301_s2 }
  0xca   :  { %s4398_s7 = scalar_lea.hbm %s5217_s4, 4096 }
  0xcb   :  { %p4399_p8 = scmp.ne.s32.totalorder %s5217_s4, %s4398_s7  ;;  %p4402_p9 = scmp.lt.u32.totalorder %s4398_s7, %s5217_s4 }
  0xcd   :  { %p4404_p10 = pnand %p4402_p9, %p4399_p8 }
  0xcf   :  { %4407 = shalt.err (!%p4404_p10)
}
  0xd0   :  { %s4408_s10 = scalar_lea.vmem %s277_s6, 4096  ;;  %p4413_p12 = scmp.lt.s32.totalorder %s277_s6, %s277_s6 }
  0xd1   :  { %p4409_p11 = scmp.ne.s32.totalorder %s277_s6, %s4408_s10  ;;  %p4414_p13 = scmp.lt.s32.totalorder %s4408_s10, %s4408_s10 }
  0xd3   :  { %p4415_p0 = por %p4414_p13, %p4413_p12 }
  0xd5   :  { %p4416_p1 = pnand %p4415_p0, %p4409_p11 }
  0xd7   :  { %4419 = shalt.err (!%p4416_p1)
}
  0xd8   :  { %s5089_s11 = smov 256   ;;  %s5090_s20 = smov 16  }
  0xd9   :  { %282 = dma.hbm_to_vmem [thread:$0]  %s5217_s4, 4096, %s277_s6, [#allocation30], %s5089_s11, %s5089_s11, %s5090_s20  }
  0xda   :  { %s4420_s3 = scalar_lea.hbm %s5227_s30, 64 }
  0xdb   :  { %p4421_p2 = scmp.ne.s32.totalorder %s5227_s30, %s4420_s3  ;;  %p4424_p3 = scmp.lt.u32.totalorder %s4420_s3, %s5227_s30 }
  0xdd   :  { %p4426_p4 = pnand %p4424_p3, %p4421_p2 }
  0xdf   :  { %4429 = shalt.err (!%p4426_p4)
}
  0xe0   :  { %s4430_s9 = scalar_lea.vmem %s302_s2, 64  ;;  %p4435_p6 = scmp.lt.s32.totalorder %s302_s2, %s302_s2 }
  0xe1   :  { %p4431_p5 = scmp.ne.s32.totalorder %s302_s2, %s4430_s9  ;;  %p4436_p7 = scmp.lt.s32.totalorder %s4430_s9, %s4430_s9 }
  0xe3   :  { %p4437_p8 = por %p4436_p7, %p4435_p6 }
  0xe5   :  { %p4438_p9 = pnand %p4437_p8, %p4431_p5 }
  0xe7   :  { %4441 = shalt.err (!%p4438_p9)
}
  0xe8   :  { %304 = dma.hbm_to_vmem [thread:$0]  %s5227_s30, 64, %s302_s2, [#allocation33]  }
  0xe9   :  { %s5091_s15 = smov [#allocation35]   ;;  %s5092_s4 = smov [#allocation38]  }
  0xea   :  { %s322_s16 = sshll.u32 %s5091_s15, 4  ;;  %s345_s14 = sshll.u32 %s5092_s4, 4  ;;  %s323_s16 = int_to_ptr.vmem [resolvable:$true] %s322_s16  ;;  %s346_s14 = int_to_ptr.vmem [resolvable:$true] %s345_s14 }
  0xeb   :  { %s4442_s18 = scalar_lea.hbm %s5237_s19, 4096 }
  0xec   :  { %p4443_p10 = scmp.ne.s32.totalorder %s5237_s19, %s4442_s18  ;;  %p4446_p11 = scmp.lt.u32.totalorder %s4442_s18, %s5237_s19 }
  0xee   :  { %p4448_p12 = pnand %p4446_p11, %p4443_p10 }
  0xf0   :  { %4451 = shalt.err (!%p4448_p12)
}
  0xf1   :  { %s4452_s0 = scalar_lea.vmem %s323_s16, 4096  ;;  %p4457_p0 = scmp.lt.s32.totalorder %s323_s16, %s323_s16 }
  0xf2   :  { %p4453_p13 = scmp.ne.s32.totalorder %s323_s16, %s4452_s0  ;;  %p4458_p1 = scmp.lt.s32.totalorder %s4452_s0, %s4452_s0 }
  0xf4   :  { %p4459_p2 = por %p4458_p1, %p4457_p0 }
  0xf6   :  { %p4460_p3 = pnand %p4459_p2, %p4453_p13 }
  0xf8   :  { %4463 = shalt.err (!%p4460_p3)
}
  0xf9   :  { %328 = dma.hbm_to_vmem [thread:$0]  %s5237_s19, 4096, %s323_s16, [#allocation36], %s5089_s11, %s5089_s11, %s5090_s20  }
  0xfa   :  { %s4464_s30 = scalar_lea.hbm %s5247_s8, 16 }
  0xfb   :  { %p4465_p4 = scmp.ne.s32.totalorder %s5247_s8, %s4464_s30  ;;  %p4468_p5 = scmp.lt.u32.totalorder %s4464_s30, %s5247_s8 }
  0xfd   :  { %p4470_p6 = pnand %p4468_p5, %p4465_p4 }
  0xff   :  { %4473 = shalt.err (!%p4470_p6)
}
 0x100   :  { %s4474_s22 = scalar_lea.vmem %s346_s14, 16  ;;  %s4478_s17 = scalar_lea.vmem %s346_s14, 32 }
 0x101   :  { %p4475_p7 = scmp.ne.s32.totalorder %s346_s14, %s4474_s22  ;;  %p4479_p8 = scmp.lt.s32.totalorder %s346_s14, %s346_s14 }
 0x102   :  { %p4480_p9 = scmp.lt.s32.totalorder %s4478_s17, %s4474_s22 }
 0x104   :  { %p4481_p10 = por %p4480_p9, %p4479_p8 }
 0x106   :  { %p4482_p11 = pnand %p4481_p10, %p4475_p7 }
 0x108   :  { %4485 = shalt.err (!%p4482_p11)
}
 0x109   :  { %348 = dma.hbm_to_vmem [thread:$0]  %s5247_s8, 16, %s346_s14, [#allocation39]  }
 0x10a   :  { %s5093_s23 = smov [#allocation41]   ;;  %s5094_s24 = smov [#allocation44]  }
 0x10b   :  { %s365_s19 = sshll.u32 %s5093_s23, 4  ;;  %s385_s26 = sshll.u32 %s5094_s24, 4  ;;  %s366_s19 = int_to_ptr.vmem [resolvable:$true] %s365_s19  ;;  %s386_s26 = int_to_ptr.vmem [resolvable:$true] %s385_s26 }
 0x10c   :  { %s4486_s28 = scalar_lea.hbm %s5257_s29, 16 }
 0x10d   :  { %p4487_p12 = scmp.ne.s32.totalorder %s5257_s29, %s4486_s28  ;;  %p4490_p13 = scmp.lt.u32.totalorder %s4486_s28, %s5257_s29 }
 0x10f   :  { %p4492_p0 = pnand %p4490_p13, %p4487_p12 }
 0x111   :  { %4495 = shalt.err (!%p4492_p0)
}
 0x112   :  { %s4496_s25 = scalar_lea.vmem %s366_s19, 16  ;;  %s4500_s6 = scalar_lea.vmem %s366_s19, 32 }
 0x113   :  { %p4497_p1 = scmp.ne.s32.totalorder %s366_s19, %s4496_s25  ;;  %p4501_p2 = scmp.lt.s32.totalorder %s366_s19, %s366_s19 }
 0x114   :  { %p4502_p3 = scmp.lt.s32.totalorder %s4500_s6, %s4496_s25 }
 0x116   :  { %p4503_p4 = por %p4502_p3, %p4501_p2 }
 0x118   :  { %p4504_p5 = pnand %p4503_p4, %p4497_p1 }
 0x11a   :  { %4507 = shalt.err (!%p4504_p5)
}
 0x11b   :  { %368 = dma.hbm_to_vmem [thread:$0]  %s5257_s29, 16, %s366_s19, [#allocation42]  }
 0x11c   :  { %s4508_s8 = scalar_lea.hbm %s5267_s21, 16 }
 0x11d   :  { %p4509_p6 = scmp.ne.s32.totalorder %s5267_s21, %s4508_s8  ;;  %p4512_p7 = scmp.lt.u32.totalorder %s4508_s8, %s5267_s21 }
 0x11f   :  { %p4514_p8 = pnand %p4512_p7, %p4509_p6 }
 0x121   :  { %4517 = shalt.err (!%p4514_p8)
}
 0x122   :  { %s4518_s1 = scalar_lea.vmem %s386_s26, 16  ;;  %s4522_s2 = scalar_lea.vmem %s386_s26, 32 }
 0x123   :  { %p4519_p9 = scmp.ne.s32.totalorder %s386_s26, %s4518_s1  ;;  %p4523_p10 = scmp.lt.s32.totalorder %s386_s26, %s386_s26 }
 0x124   :  { %p4524_p11 = scmp.lt.s32.totalorder %s4522_s2, %s4518_s1 }
 0x126   :  { %p4525_p12 = por %p4524_p11, %p4523_p10 }
 0x128   :  { %p4526_p13 = pnand %p4525_p12, %p4519_p9 }
 0x12a   :  { %4529 = shalt.err (!%p4526_p13)
}
 0x12b   :  { %388 = dma.hbm_to_vmem [thread:$0]  %s5267_s21, 16, %s386_s26, [#allocation45]  }
 0x12c   :  { %s5095_s7 = smov [#allocation47]   ;;  %s5096_s10 = smov [#allocation2]  }
 0x12d   :  { %s405_s29 = sshll.u32 %s5095_s7, 4  ;;  %s90_s3 = sshll.u32 %s5096_s10, 4  ;;  %s406_s29 = int_to_ptr.vmem [resolvable:$true] %s405_s29  ;;  %s5351_s3 = int_to_ptr.vmem [resolvable:$true] %s90_s3 }
 0x12e   :  { %s4530_s9 = scalar_lea.hbm %s5277_s13, 16 }
 0x12f   :  { %p4531_p0 = scmp.ne.s32.totalorder %s5277_s13, %s4530_s9  ;;  %p4534_p1 = scmp.lt.u32.totalorder %s4530_s9, %s5277_s13 }
 0x131   :  { %p4536_p2 = pnand %p4534_p1, %p4531_p0 }
 0x133   :  { %4539 = shalt.err (!%p4536_p2)
}
 0x134   :  { %s4540_s15 = scalar_lea.vmem %s406_s29, 16  ;;  %s4544_s16 = scalar_lea.vmem %s406_s29, 32 }
 0x135   :  { %p4541_p3 = scmp.ne.s32.totalorder %s406_s29, %s4540_s15  ;;  %p4545_p4 = scmp.lt.s32.totalorder %s406_s29, %s406_s29 }
 0x136   :  { %p4546_p5 = scmp.lt.s32.totalorder %s4544_s16, %s4540_s15 }
 0x138   :  { %p4547_p6 = por %p4546_p5, %p4545_p4 }
 0x13a   :  { %p4548_p7 = pnand %p4547_p6, %p4541_p3 }
 0x13c   :  { %4551 = shalt.err (!%p4548_p7)
}
 0x13d   :  { %s7139_s21 = sld [smem:[#allocation68_spill]] }
 0x13e   :  { %408 = dma.hbm_to_vmem [thread:$0]  %s5277_s13, 16, %s406_s29, [#allocation48]  }
 0x143   :  { %s4552_s4 = scalar_lea.hbm %s7139_s21, 256 }
 0x144   :  { %p4553_p8 = scmp.ne.s32.totalorder %s7139_s21, %s4552_s4  ;;  %p4556_p9 = scmp.lt.u32.totalorder %s4552_s4, %s7139_s21 }
 0x146   :  { %p4558_p10 = pnand %p4556_p9, %p4553_p8 }
 0x148   :  { %4561 = shalt.err (!%p4558_p10)
}
 0x149   :  { %s4562_s14 = scalar_lea.vmem %s5351_s3, 256  ;;  %p4567_p12 = scmp.lt.s32.totalorder %s5351_s3, %s5351_s3 }
 0x14a   :  { %p4563_p11 = scmp.ne.s32.totalorder %s5351_s3, %s4562_s14  ;;  %p4568_p13 = scmp.lt.s32.totalorder %s4562_s14, %s4562_s14 }
 0x14c   :  { %p4569_p0 = por %p4568_p13, %p4567_p12 }
 0x14e   :  { %p4570_p1 = pnand %p4569_p0, %p4563_p11 }
 0x150   :  { %4573 = shalt.err (!%p4570_p1)
}
 0x151   :  { %s5097_s18 = smov 128   ;;  %s7140_s13 = sld [smem:[#allocation69_spill]] }
 0x152   :  { %s5098_s0 = smov 8   ;;  %s5099_s30 = smov [#allocation7]  }
 0x153   :  { %96 = dma.hbm_to_vmem [thread:$0]  %s7139_s21, 256, %s5351_s3, [#allocation3], %s5097_s18, %s5097_s18, %s5098_s0  }
 0x154   :  { %s113_s22 = sshll.u32 %s5099_s30, 4  ;;  %s5100_s17 = smov [#allocation10]   ;;  %s114_s22 = int_to_ptr.vmem [resolvable:$true] %s113_s22 }
 0x155   :  { %s132_s23 = sshll.u32 %s5100_s17, 4  ;;  %s5366_s23 = int_to_ptr.vmem [resolvable:$true] %s132_s23 }
 0x157   :  { %s4574_s19 = scalar_lea.hbm %s7140_s13, 16 }
 0x158   :  { %p4575_p2 = scmp.ne.s32.totalorder %s7140_s13, %s4574_s19  ;;  %p4578_p3 = scmp.lt.u32.totalorder %s4574_s19, %s7140_s13 }
 0x15a   :  { %p4580_p4 = pnand %p4578_p3, %p4575_p2 }
 0x15c   :  { %4583 = shalt.err (!%p4580_p4)
}
 0x15d   :  { %s4584_s24 = scalar_lea.vmem %s114_s22, 16  ;;  %s4588_s26 = scalar_lea.vmem %s114_s22, 32 }
 0x15e   :  { %p4585_p5 = scmp.ne.s32.totalorder %s114_s22, %s4584_s24  ;;  %p4589_p6 = scmp.lt.s32.totalorder %s114_s22, %s114_s22 }
 0x15f   :  { %p4590_p7 = scmp.lt.s32.totalorder %s4588_s26, %s4584_s24 }
 0x161   :  { %p4591_p8 = por %p4590_p7, %p4589_p6 }
 0x163   :  { %p4592_p9 = pnand %p4591_p8, %p4585_p5 }
 0x165   :  { %4595 = shalt.err (!%p4592_p9)
}
 0x166   :  { %s7141_s28 = sld [smem:[#allocation70_spill]] }
 0x167   :  { %116 = dma.hbm_to_vmem [thread:$0]  %s7140_s13, 16, %s114_s22, [#allocation6]  }
 0x16c   :  { %s4596_s25 = scalar_lea.hbm %s7141_s28, 1024 }
 0x16d   :  { %p4597_p10 = scmp.ne.s32.totalorder %s7141_s28, %s4596_s25  ;;  %p4600_p11 = scmp.lt.u32.totalorder %s4596_s25, %s7141_s28 }
 0x16f   :  { %p4602_p12 = pnand %p4600_p11, %p4597_p10 }
 0x171   :  { %4605 = shalt.err (!%p4602_p12)
}
 0x172   :  { %s4606_s6 = scalar_lea.vmem %s5366_s23, 1024  ;;  %p4611_p0 = scmp.lt.s32.totalorder %s5366_s23, %s5366_s23 }
 0x173   :  { %p4607_p13 = scmp.ne.s32.totalorder %s5366_s23, %s4606_s6  ;;  %p4612_p1 = scmp.lt.s32.totalorder %s4606_s6, %s4606_s6 }
 0x175   :  { %p4613_p2 = por %p4612_p1, %p4611_p0 }
 0x177   :  { %p4614_p3 = pnand %p4613_p2, %p4607_p13 }
 0x179   :  { %4617 = shalt.err (!%p4614_p3)
}
 0x17a   :  { %s5101_s8 = smov 64   ;;  %s7142_s1 = sld [smem:[#allocation71_spill]] }
 0x17b   :  { %s5102_s2 = smov 4   ;;  %s5103_s7 = smov [#allocation13]  }
 0x17c   :  { %138 = dma.hbm_to_vmem [thread:$0]  %s7141_s28, 1024, %s5366_s23, [#allocation9], %s5101_s8, %s5101_s8, %s5102_s2  }
 0x17d   :  { %s154_s29 = sshll.u32 %s5103_s7, 4  ;;  %s5104_s10 = smov [#allocation16]   ;;  %s155_s29 = int_to_ptr.vmem [resolvable:$true] %s154_s29 }
 0x17e   :  { %s176_s3 = sshll.u32 %s5104_s10, 4  ;;  %s5384_s3 = int_to_ptr.vmem [resolvable:$true] %s176_s3 }
 0x180   :  { %s4618_s9 = scalar_lea.hbm %s7142_s1, 1024 }
 0x181   :  { %p4619_p4 = scmp.ne.s32.totalorder %s7142_s1, %s4618_s9  ;;  %p4622_p5 = scmp.lt.u32.totalorder %s4618_s9, %s7142_s1 }
 0x183   :  { %p4624_p6 = pnand %p4622_p5, %p4619_p4 }
 0x185   :  { %4627 = shalt.err (!%p4624_p6)
}
 0x186   :  { %s4628_s15 = scalar_lea.vmem %s155_s29, 1024  ;;  %p4633_p8 = scmp.lt.s32.totalorder %s155_s29, %s155_s29 }
 0x187   :  { %p4629_p7 = scmp.ne.s32.totalorder %s155_s29, %s4628_s15  ;;  %p4634_p9 = scmp.lt.s32.totalorder %s4628_s15, %s4628_s15 }
 0x189   :  { %p4635_p10 = por %p4634_p9, %p4633_p8 }
 0x18b   :  { %p4636_p11 = pnand %p4635_p10, %p4629_p7 }
 0x18d   :  { %4639 = shalt.err (!%p4636_p11)
}
 0x18e   :  { %s7143_s16 = sld [smem:[#allocation72_spill]] }
 0x18f   :  { %160 = dma.hbm_to_vmem [thread:$0]  %s7142_s1, 1024, %s155_s29, [#allocation12], %s5101_s8, %s5101_s8, %s5102_s2  }
 0x194   :  { %s4640_s21 = scalar_lea.hbm %s7143_s16, 1024 }
 0x195   :  { %p4641_p12 = scmp.ne.s32.totalorder %s7143_s16, %s4640_s21  ;;  %p4644_p13 = scmp.lt.u32.totalorder %s4640_s21, %s7143_s16 }
 0x197   :  { %p4646_p0 = pnand %p4644_p13, %p4641_p12 }
 0x199   :  { %4649 = shalt.err (!%p4646_p0)
}
 0x19a   :  { %s4650_s4 = scalar_lea.vmem %s5384_s3, 1024  ;;  %p4655_p2 = scmp.lt.s32.totalorder %s5384_s3, %s5384_s3 }
 0x19b   :  { %p4651_p1 = scmp.ne.s32.totalorder %s5384_s3, %s4650_s4  ;;  %p4656_p3 = scmp.lt.s32.totalorder %s4650_s4, %s4650_s4 }
 0x19d   :  { %p4657_p4 = por %p4656_p3, %p4655_p2 }
 0x19f   :  { %p4658_p5 = pnand %p4657_p4, %p4651_p1 }
 0x1a1   :  { %4661 = shalt.err (!%p4658_p5)
}
 0x1a2   :  { %s7144_s14 = sld [smem:[#allocation73_spill]]  ;;  %s5105_s18 = smov [#allocation19]  }
 0x1a3   :  { %182 = dma.hbm_to_vmem [thread:$0]  %s7143_s16, 1024, %s5384_s3, [#allocation15], %s5101_s8, %s5101_s8, %s5102_s2  }
 0x1a4   :  { %s198_s13 = sshll.u32 %s5105_s18, 4  ;;  %s5106_s0 = smov [#allocation22]   ;;  %s199_s13 = int_to_ptr.vmem [resolvable:$true] %s198_s13 }
 0x1a5   :  { %s220_s30 = sshll.u32 %s5106_s0, 4  ;;  %s5405_s30 = int_to_ptr.vmem [resolvable:$true] %s220_s30 }
 0x1a8   :  { %s4662_s22 = scalar_lea.hbm %s7144_s14, 1024 }
 0x1a9   :  { %p4663_p6 = scmp.ne.s32.totalorder %s7144_s14, %s4662_s22  ;;  %p4666_p7 = scmp.lt.u32.totalorder %s4662_s22, %s7144_s14 }
 0x1ab   :  { %p4668_p8 = pnand %p4666_p7, %p4663_p6 }
 0x1ad   :  { %4671 = shalt.err (!%p4668_p8)
}
 0x1ae   :  { %s4672_s17 = scalar_lea.vmem %s199_s13, 1024  ;;  %p4677_p10 = scmp.lt.s32.totalorder %s199_s13, %s199_s13 }
 0x1af   :  { %p4673_p9 = scmp.ne.s32.totalorder %s199_s13, %s4672_s17  ;;  %p4678_p11 = scmp.lt.s32.totalorder %s4672_s17, %s4672_s17 }
 0x1b1   :  { %p4679_p12 = por %p4678_p11, %p4677_p10 }
 0x1b3   :  { %p4680_p13 = pnand %p4679_p12, %p4673_p9 }
 0x1b5   :  { %4683 = shalt.err (!%p4680_p13)
}
 0x1b6   :  { %s7145_s23 = sld [smem:[#allocation74_spill]] }
 0x1b7   :  { %204 = dma.hbm_to_vmem [thread:$0]  %s7144_s14, 1024, %s199_s13, [#allocation18], %s5101_s8, %s5101_s8, %s5102_s2  }
 0x1bc   :  { %s4684_s19 = scalar_lea.hbm %s7145_s23, 1024 }
 0x1bd   :  { %p4685_p0 = scmp.ne.s32.totalorder %s7145_s23, %s4684_s19  ;;  %p4688_p1 = scmp.lt.u32.totalorder %s4684_s19, %s7145_s23 }
 0x1bf   :  { %p4690_p2 = pnand %p4688_p1, %p4685_p0 }
 0x1c1   :  { %4693 = shalt.err (!%p4690_p2)
}
 0x1c2   :  { %s4694_s24 = scalar_lea.vmem %s5405_s30, 1024  ;;  %p4699_p4 = scmp.lt.s32.totalorder %s5405_s30, %s5405_s30 }
 0x1c3   :  { %p4695_p3 = scmp.ne.s32.totalorder %s5405_s30, %s4694_s24  ;;  %p4700_p5 = scmp.lt.s32.totalorder %s4694_s24, %s4694_s24 }
 0x1c5   :  { %p4701_p6 = por %p4700_p5, %p4699_p4 }
 0x1c7   :  { %p4702_p7 = pnand %p4701_p6, %p4695_p3 }
 0x1c9   :  { %4705 = shalt.err (!%p4702_p7)
}
 0x1ca   :  { %s7146_s26 = sld [smem:[#allocation75_spill]]  ;;  %s5107_s28 = smov [#allocation25]  }
 0x1cb   :  { %226 = dma.hbm_to_vmem [thread:$0]  %s7145_s23, 1024, %s5405_s30, [#allocation21], %s5101_s8, %s5101_s8, %s5102_s2  }
 0x1cc   :  { %s242_s25 = sshll.u32 %s5107_s28, 4  ;;  %s5108_s6 = smov [#allocation28]   ;;  %s243_s25 = int_to_ptr.vmem [resolvable:$true] %s242_s25 }
 0x1cd   :  { %s264_s1 = sshll.u32 %s5108_s6, 4  ;;  %s5426_s1 = int_to_ptr.vmem [resolvable:$true] %s264_s1 }
 0x1d0   :  { %s4706_s7 = scalar_lea.hbm %s7146_s26, 1024 }
 0x1d1   :  { %p4707_p8 = scmp.ne.s32.totalorder %s7146_s26, %s4706_s7  ;;  %p4710_p9 = scmp.lt.u32.totalorder %s4706_s7, %s7146_s26 }
 0x1d3   :  { %p4712_p10 = pnand %p4710_p9, %p4707_p8 }
 0x1d5   :  { %4715 = shalt.err (!%p4712_p10)
}
 0x1d6   :  { %s4716_s29 = scalar_lea.vmem %s243_s25, 1024  ;;  %p4721_p12 = scmp.lt.s32.totalorder %s243_s25, %s243_s25 }
 0x1d7   :  { %p4717_p11 = scmp.ne.s32.totalorder %s243_s25, %s4716_s29  ;;  %p4722_p13 = scmp.lt.s32.totalorder %s4716_s29, %s4716_s29 }
 0x1d9   :  { %p4723_p0 = por %p4722_p13, %p4721_p12 }
 0x1db   :  { %p4724_p1 = pnand %p4723_p0, %p4717_p11 }
 0x1dd   :  { %4727 = shalt.err (!%p4724_p1)
}
 0x1de   :  { %s7147_s10 = sld [smem:[#allocation76_spill]] }
 0x1df   :  { %248 = dma.hbm_to_vmem [thread:$0]  %s7146_s26, 1024, %s243_s25, [#allocation24], %s5101_s8, %s5101_s8, %s5102_s2  }
 0x1e4   :  { %s4728_s3 = scalar_lea.hbm %s7147_s10, 4096 }
 0x1e5   :  { %p4729_p2 = scmp.ne.s32.totalorder %s7147_s10, %s4728_s3  ;;  %p4732_p3 = scmp.lt.u32.totalorder %s4728_s3, %s7147_s10 }
 0x1e7   :  { %p4734_p4 = pnand %p4732_p3, %p4729_p2 }
 0x1e9   :  { %4737 = shalt.err (!%p4734_p4)
}
 0x1ea   :  { %s4738_s9 = scalar_lea.vmem %s5426_s1, 4096  ;;  %p4743_p6 = scmp.lt.s32.totalorder %s5426_s1, %s5426_s1 }
 0x1eb   :  { %p4739_p5 = scmp.ne.s32.totalorder %s5426_s1, %s4738_s9  ;;  %p4744_p7 = scmp.lt.s32.totalorder %s4738_s9, %s4738_s9 }
 0x1ed   :  { %p4745_p8 = por %p4744_p7, %p4743_p6 }
 0x1ef   :  { %p4746_p9 = pnand %p4745_p8, %p4739_p5 }
 0x1f1   :  { %4749 = shalt.err (!%p4746_p9)
}
 0x1f2   :  { %s7148_s8 = sld [smem:[#allocation77_spill]]  ;;  %s5109_s2 = smov [#allocation31]  }
 0x1f3   :  { %270 = dma.hbm_to_vmem [thread:$0]  %s7147_s10, 4096, %s5426_s1, [#allocation27], %s5089_s11, %s5089_s11, %s5090_s20  }
 0x1f4   :  { %s288_s15 = sshll.u32 %s5109_s2, 4  ;;  %s5110_s16 = smov [#allocation34]   ;;  %s289_s15 = int_to_ptr.vmem [resolvable:$true] %s288_s15 }
 0x1f5   :  { %s310_s21 = sshll.u32 %s5110_s16, 4  ;;  %s5447_s21 = int_to_ptr.vmem [resolvable:$true] %s310_s21 }
 0x1f8   :  { %s4750_s4 = scalar_lea.hbm %s7148_s8, 4096 }
 0x1f9   :  { %p4751_p10 = scmp.ne.s32.totalorder %s7148_s8, %s4750_s4  ;;  %p4754_p11 = scmp.lt.u32.totalorder %s4750_s4, %s7148_s8 }
 0x1fb   :  { %p4756_p12 = pnand %p4754_p11, %p4751_p10 }
 0x1fd   :  { %4759 = shalt.err (!%p4756_p12)
}
 0x1fe   :  { %s4760_s14 = scalar_lea.vmem %s289_s15, 4096  ;;  %p4765_p0 = scmp.lt.s32.totalorder %s289_s15, %s289_s15 }
 0x1ff   :  { %p4761_p13 = scmp.ne.s32.totalorder %s289_s15, %s4760_s14  ;;  %p4766_p1 = scmp.lt.s32.totalorder %s4760_s14, %s4760_s14 }
 0x201   :  { %p4767_p2 = por %p4766_p1, %p4765_p0 }
 0x203   :  { %p4768_p3 = pnand %p4767_p2, %p4761_p13 }
 0x205   :  { %4771 = shalt.err (!%p4768_p3)
}
 0x206   :  { %s7149_s18 = sld [smem:[#allocation78_spill]] }
 0x207   :  { %294 = dma.hbm_to_vmem [thread:$0]  %s7148_s8, 4096, %s289_s15, [#allocation30], %s5089_s11, %s5089_s11, %s5090_s20  }
 0x20c   :  { %s4772_s13 = scalar_lea.hbm %s7149_s18, 4096 }
 0x20d   :  { %p4773_p4 = scmp.ne.s32.totalorder %s7149_s18, %s4772_s13  ;;  %p4776_p5 = scmp.lt.u32.totalorder %s4772_s13, %s7149_s18 }
 0x20f   :  { %p4778_p6 = pnand %p4776_p5, %p4773_p4 }
 0x211   :  { %4781 = shalt.err (!%p4778_p6)
}
 0x212   :  { %s4782_s0 = scalar_lea.vmem %s5447_s21, 4096  ;;  %p4787_p8 = scmp.lt.s32.totalorder %s5447_s21, %s5447_s21 }
 0x213   :  { %p4783_p7 = scmp.ne.s32.totalorder %s5447_s21, %s4782_s0  ;;  %p4788_p9 = scmp.lt.s32.totalorder %s4782_s0, %s4782_s0 }
 0x215   :  { %p4789_p10 = por %p4788_p9, %p4787_p8 }
 0x217   :  { %p4790_p11 = pnand %p4789_p10, %p4783_p7 }
 0x219   :  { %4793 = shalt.err (!%p4790_p11)
}
 0x21a   :  { %s7150_s30 = sld [smem:[#allocation79_spill]]  ;;  %s5111_s22 = smov [#allocation37]  }
 0x21b   :  { %316 = dma.hbm_to_vmem [thread:$0]  %s7149_s18, 4096, %s5447_s21, [#allocation33], %s5089_s11, %s5089_s11, %s5090_s20  }
 0x21c   :  { %s335_s17 = sshll.u32 %s5111_s22, 4  ;;  %s5112_s23 = smov [#allocation40]   ;;  %s336_s17 = int_to_ptr.vmem [resolvable:$true] %s335_s17 }
 0x21d   :  { %s355_s19 = sshll.u32 %s5112_s23, 4  ;;  %s356_s19 = int_to_ptr.vmem [resolvable:$true] %s355_s19 }
 0x220   :  { %s4794_s24 = scalar_lea.hbm %s7150_s30, 64 }
 0x221   :  { %p4795_p12 = scmp.ne.s32.totalorder %s7150_s30, %s4794_s24  ;;  %p4798_p13 = scmp.lt.u32.totalorder %s4794_s24, %s7150_s30 }
 0x223   :  { %p4800_p0 = pnand %p4798_p13, %p4795_p12 }
 0x225   :  { %4803 = shalt.err (!%p4800_p0)
}
 0x226   :  { %s4804_s26 = scalar_lea.vmem %s336_s17, 64  ;;  %p4809_p2 = scmp.lt.s32.totalorder %s336_s17, %s336_s17 }
 0x227   :  { %p4805_p1 = scmp.ne.s32.totalorder %s336_s17, %s4804_s26  ;;  %p4810_p3 = scmp.lt.s32.totalorder %s4804_s26, %s4804_s26 }
 0x229   :  { %p4811_p4 = por %p4810_p3, %p4809_p2 }
 0x22b   :  { %p4812_p5 = pnand %p4811_p4, %p4805_p1 }
 0x22d   :  { %4815 = shalt.err (!%p4812_p5)
}
 0x22e   :  { %s7151_s11 = sld [smem:[#allocation80_spill]] }
 0x22f   :  { %338 = dma.hbm_to_vmem [thread:$0]  %s7150_s30, 64, %s336_s17, [#allocation36]  }
 0x234   :  { %s4816_s20 = scalar_lea.hbm %s7151_s11, 16 }
 0x235   :  { %p4817_p6 = scmp.ne.s32.totalorder %s7151_s11, %s4816_s20  ;;  %p4820_p7 = scmp.lt.u32.totalorder %s4816_s20, %s7151_s11 }
 0x237   :  { %p4822_p8 = pnand %p4820_p7, %p4817_p6 }
 0x239   :  { %4825 = shalt.err (!%p4822_p8)
}
 0x23a   :  { %s4826_s28 = scalar_lea.vmem %s356_s19, 16  ;;  %s4830_s25 = scalar_lea.vmem %s356_s19, 32 }
 0x23b   :  { %p4827_p9 = scmp.ne.s32.totalorder %s356_s19, %s4826_s28  ;;  %p4831_p10 = scmp.lt.s32.totalorder %s356_s19, %s356_s19 }
 0x23c   :  { %p4832_p11 = scmp.lt.s32.totalorder %s4830_s25, %s4826_s28 }
 0x23e   :  { %p4833_p12 = por %p4832_p11, %p4831_p10 }
 0x240   :  { %p4834_p13 = pnand %p4833_p12, %p4827_p9 }
 0x242   :  { %4837 = shalt.err (!%p4834_p13)
}
 0x243   :  { %s7152_s6 = sld [smem:[#allocation81_spill]]  ;;  %s5113_s1 = smov [#allocation43]  }
 0x244   :  { %358 = dma.hbm_to_vmem [thread:$0]  %s7151_s11, 16, %s356_s19, [#allocation39]  }
 0x245   :  { %s375_s7 = sshll.u32 %s5113_s1, 4  ;;  %s5114_s29 = smov [#allocation46]   ;;  %s376_s7 = int_to_ptr.vmem [resolvable:$true] %s375_s7 }
 0x246   :  { %s395_s10 = sshll.u32 %s5114_s29, 4  ;;  %s396_s10 = int_to_ptr.vmem [resolvable:$true] %s395_s10 }
 0x249   :  { %s4838_s3 = scalar_lea.hbm %s7152_s6, 16 }
 0x24a   :  { %p4839_p0 = scmp.ne.s32.totalorder %s7152_s6, %s4838_s3  ;;  %p4842_p1 = scmp.lt.u32.totalorder %s4838_s3, %s7152_s6 }
 0x24c   :  { %p4844_p2 = pnand %p4842_p1, %p4839_p0 }
 0x24e   :  { %4847 = shalt.err (!%p4844_p2)
}
 0x24f   :  { %s4848_s9 = scalar_lea.vmem %s376_s7, 16  ;;  %s4852_s8 = scalar_lea.vmem %s376_s7, 32 }
 0x250   :  { %p4849_p3 = scmp.ne.s32.totalorder %s376_s7, %s4848_s9  ;;  %p4853_p4 = scmp.lt.s32.totalorder %s376_s7, %s376_s7 }
 0x251   :  { %p4854_p5 = scmp.lt.s32.totalorder %s4852_s8, %s4848_s9 }
 0x253   :  { %p4855_p6 = por %p4854_p5, %p4853_p4 }
 0x255   :  { %p4856_p7 = pnand %p4855_p6, %p4849_p3 }
 0x257   :  { %4859 = shalt.err (!%p4856_p7)
}
 0x258   :  { %378 = dma.hbm_to_vmem [thread:$0]  %s7152_s6, 16, %s376_s7, [#allocation42]  }
 0x259   :  { %s4860_s2 = scalar_lea.hbm %s5272_s27, 16 }
 0x25a   :  { %p4861_p8 = scmp.ne.s32.totalorder %s5272_s27, %s4860_s2  ;;  %p4864_p9 = scmp.lt.u32.totalorder %s4860_s2, %s5272_s27 }
 0x25c   :  { %p4866_p10 = pnand %p4864_p9, %p4861_p8 }
 0x25e   :  { %4869 = shalt.err (!%p4866_p10)
}
 0x25f   :  { %s4870_s15 = scalar_lea.vmem %s396_s10, 16  ;;  %s4874_s16 = scalar_lea.vmem %s396_s10, 32 }
 0x260   :  { %p4871_p11 = scmp.ne.s32.totalorder %s396_s10, %s4870_s15  ;;  %p4875_p12 = scmp.lt.s32.totalorder %s396_s10, %s396_s10 }
 0x261   :  { %p4876_p13 = scmp.lt.s32.totalorder %s4874_s16, %s4870_s15 }
 0x263   :  { %p4877_p0 = por %p4876_p13, %p4875_p12 }
 0x265   :  { %p4878_p1 = pnand %p4877_p0, %p4871_p11 }
 0x267   :  { %4881 = shalt.err (!%p4878_p1)
}
 0x268   :  { %398 = dma.hbm_to_vmem [thread:$0]  %s5272_s27, 16, %s396_s10, [#allocation45]  }
 0x269   :  { %s5115_s21 = smov [#allocation49]   ;;  %s4882_s14 = scalar_lea.hbm %s5282_s12, 16 }
 0x26a   :  { %s415_s4 = sshll.u32 %s5115_s21, 4  ;;  %p4883_p2 = scmp.ne.s32.totalorder %s5282_s12, %s4882_s14  ;;  %s416_s4 = int_to_ptr.vmem [resolvable:$true] %s415_s4 }
 0x26b   :  { %p4886_p3 = scmp.lt.u32.totalorder %s4882_s14, %s5282_s12 }
 0x26d   :  { %p4888_p4 = pnand %p4886_p3, %p4883_p2 }
 0x26f   :  { %4891 = shalt.err (!%p4888_p4)
}
 0x270   :  { %s4892_s18 = scalar_lea.vmem %s416_s4, 16  ;;  %s4896_s13 = scalar_lea.vmem %s416_s4, 32 }
 0x271   :  { %p4893_p5 = scmp.ne.s32.totalorder %s416_s4, %s4892_s18  ;;  %p4897_p6 = scmp.lt.s32.totalorder %s416_s4, %s416_s4 }
 0x272   :  { %p4898_p7 = scmp.lt.s32.totalorder %s4896_s13, %s4892_s18 }
 0x274   :  { %p4899_p8 = por %p4898_p7, %p4897_p6 }
 0x276   :  { %p4900_p9 = pnand %p4899_p8, %p4893_p5 }
 0x278   :  { %4903 = shalt.err (!%p4900_p9)
}
 0x279   :  { %418 = dma.hbm_to_vmem [thread:$0]  %s5282_s12, 16, %s416_s4, [#allocation48]  }
 0x27a   :  { %4970 = dma.done.wait [#allocation3], 256  }
 0x27b   :  { %4971 = vsyncadd [#allocation3], 4294967040 }
 0x27c   :  { %4972 = dma.done.wait [#allocation6], 48  }
 0x27d   :  { %4973 = vsyncadd [#allocation6], 4294967248 }
 0x27e   :  { %4974 = dma.done.wait [#allocation9], 1040  }
 0x27f   :  { %4975 = vsyncadd [#allocation9], 4294966256 }
 0x280   :  { %4976 = dma.done.wait [#allocation12], 1040  }
 0x281   :  { %4977 = vsyncadd [#allocation12], 4294966256 }
 0x282   :  { %4978 = dma.done.wait [#allocation15], 1040  }
 0x283   :  { %4979 = vsyncadd [#allocation15], 4294966256 }
 0x284   :  { %4980 = dma.done.wait [#allocation18], 1040  }
 0x285   :  { %4981 = vsyncadd [#allocation18], 4294966256 }
 0x286   :  { %4982 = dma.done.wait [#allocation21], 1040  }
 0x287   :  { %4983 = vsyncadd [#allocation21], 4294966256 }
 0x288   :  { %4984 = dma.done.wait [#allocation24], 1040  }
 0x289   :  { %4985 = vsyncadd [#allocation24], 4294966256 }
 0x28a   :  { %4986 = dma.done.wait [#allocation27], 4112  }
 0x28b   :  { %4987 = vsyncadd [#allocation27], 4294963184 }
 0x28c   :  { %4988 = dma.done.wait [#allocation30], 8192  }
 0x28d   :  { %4989 = vsyncadd [#allocation30], 4294959104 }
 0x28e   :  { %4990 = dma.done.wait [#allocation33], 4160  }
 0x28f   :  { %4991 = vsyncadd [#allocation33], 4294963136 }
 0x290   :  { %4992 = dma.done.wait [#allocation36], 4160  }
 0x291   :  { %4993 = vsyncadd [#allocation36], 4294963136 }
 0x292   :  { %4994 = dma.done.wait [#allocation39], 32  }
 0x293   :  { %4995 = vsyncadd [#allocation39], 4294967264 }
 0x294   :  { %4996 = dma.done.wait [#allocation42], 32  }
 0x295   :  { %4997 = vsyncadd [#allocation42], 4294967264 }
 0x296   :  { %4998 = dma.done.wait [#allocation45], 32  }
 0x297   :  { %4999 = vsyncadd [#allocation45], 4294967264 }
 0x298   :  { %5000 = dma.done.wait [#allocation48], 32  }
 0x299   :  { %5001 = vsyncadd [#allocation48], 4294967264  ;;  %v5488_v0 = vld [vmem:[#allocation2] sm:$0xff]  ;;  %v5490_v1 = vld [vmem:[#allocation2 + $0x8] sm:$0xff]  ;;  %s6068_s12 = smov 0  }
 0x29a   :  { %7153 = vst [vmem:[#allocation82_spill] sm:$0xff] %v5488_v0  ;;  %7154 = vst [vmem:[#allocation83_spill] sm:$0xff] %v5490_v1  ;;  %v5492_v2 = vld [vmem:[#allocation10] sm:$0xf]  ;;  %v5494_v3 = vld [vmem:[#allocation10 + $0x4] sm:$0xf] }
 0x29b   :  { %7155 = vst [vmem:[#allocation84_spill] sm:$0xff] %v5492_v2  ;;  %7156 = vst [vmem:[#allocation85_spill] sm:$0xff] %v5494_v3  ;;  %v5496_v4 = vld [vmem:[#allocation10 + $0x8] sm:$0xf]  ;;  %v5498_v5 = vld [vmem:[#allocation10 + $0xc] sm:$0xf] }
 0x29c   :  { %7157 = vst [vmem:[#allocation86_spill] sm:$0xff] %v5496_v4  ;;  %7158 = vst [vmem:[#allocation87_spill] sm:$0xff] %v5498_v5  ;;  %v5500_v6 = vld [vmem:[#allocation10 + $0x10] sm:$0xf]  ;;  %v5502_v7 = vld [vmem:[#allocation10 + $0x14] sm:$0xf] }
 0x29d   :  { %7159 = vst [vmem:[#allocation88_spill] sm:$0xff] %v5500_v6  ;;  %7160 = vst [vmem:[#allocation89_spill] sm:$0xff] %v5502_v7  ;;  %v5504_v8 = vld [vmem:[#allocation10 + $0x18] sm:$0xf]  ;;  %v5506_v9 = vld [vmem:[#allocation10 + $0x1c] sm:$0xf] }
 0x29e   :  { %7161 = vst [vmem:[#allocation90_spill] sm:$0xff] %v5504_v8  ;;  %7162 = vst [vmem:[#allocation91_spill] sm:$0xff] %v5506_v9  ;;  %v5508_v10 = vld [vmem:[#allocation10 + $0x20] sm:$0xf]  ;;  %v5510_v11 = vld [vmem:[#allocation10 + $0x24] sm:$0xf] }
 0x29f   :  { %7163 = vst [vmem:[#allocation92_spill] sm:$0xff] %v5508_v10  ;;  %7164 = vst [vmem:[#allocation93_spill] sm:$0xff] %v5510_v11  ;;  %v5512_v12 = vld [vmem:[#allocation10 + $0x28] sm:$0xf]  ;;  %v5514_v13 = vld [vmem:[#allocation10 + $0x2c] sm:$0xf] }
 0x2a0   :  { %7165 = vst [vmem:[#allocation94_spill] sm:$0xff] %v5512_v12  ;;  %7166 = vst [vmem:[#allocation95_spill] sm:$0xff] %v5514_v13  ;;  %v5516_v14 = vld [vmem:[#allocation10 + $0x30] sm:$0xf]  ;;  %v5518_v15 = vld [vmem:[#allocation10 + $0x34] sm:$0xf] }
 0x2a1   :  { %7167 = vst [vmem:[#allocation96_spill] sm:$0xff] %v5516_v14  ;;  %7168 = vst [vmem:[#allocation97_spill] sm:$0xff] %v5518_v15  ;;  %v5520_v16 = vld [vmem:[#allocation10 + $0x38] sm:$0xf]  ;;  %v5522_v17 = vld [vmem:[#allocation10 + $0x3c] sm:$0xf] }
 0x2a2   :  { %7169 = vst [vmem:[#allocation98_spill] sm:$0xff] %v5520_v16  ;;  %7170 = vst [vmem:[#allocation99_spill] sm:$0xff] %v5522_v17  ;;  %v5524_v18 = vld [vmem:[#allocation13] sm:$0xf]  ;;  %v5526_v19 = vld [vmem:[#allocation13 + $0x4] sm:$0xf] }
 0x2a3   :  { %7171 = vst [vmem:[#allocation100_spill] sm:$0xff] %v5524_v18  ;;  %7172 = vst [vmem:[#allocation101_spill] sm:$0xff] %v5526_v19  ;;  %v5528_v20 = vld [vmem:[#allocation13 + $0x8] sm:$0xf]  ;;  %v5530_v21 = vld [vmem:[#allocation13 + $0xc] sm:$0xf] }
 0x2a4   :  { %7173 = vst [vmem:[#allocation102_spill] sm:$0xff] %v5528_v20  ;;  %7174 = vst [vmem:[#allocation103_spill] sm:$0xff] %v5530_v21  ;;  %v5532_v22 = vld [vmem:[#allocation13 + $0x10] sm:$0xf]  ;;  %v5534_v23 = vld [vmem:[#allocation13 + $0x14] sm:$0xf] }
 0x2a5   :  { %7175 = vst [vmem:[#allocation104_spill] sm:$0xff] %v5532_v22  ;;  %7176 = vst [vmem:[#allocation105_spill] sm:$0xff] %v5534_v23  ;;  %v5536_v24 = vld [vmem:[#allocation13 + $0x18] sm:$0xf]  ;;  %v5538_v25 = vld [vmem:[#allocation13 + $0x1c] sm:$0xf] }
 0x2a6   :  { %v5540_v26 = vld [vmem:[#allocation13 + $0x20] sm:$0xf]  ;;  %v5542_v27 = vld [vmem:[#allocation13 + $0x24] sm:$0xf]  ;;  %v5544_v28 = vld [vmem:[#allocation13 + $0x28] sm:$0xf] }
 0x2a7   :  { %v5546_v29 = vld [vmem:[#allocation13 + $0x2c] sm:$0xf]  ;;  %v5548_v30 = vld [vmem:[#allocation13 + $0x30] sm:$0xf]  ;;  %v5550_v31 = vld [vmem:[#allocation13 + $0x34] sm:$0xf] }
 0x2a8   :  { %v5552_v32 = vld [vmem:[#allocation13 + $0x38] sm:$0xf]  ;;  %v5554_v33 = vld [vmem:[#allocation13 + $0x3c] sm:$0xf]  ;;  %v5556_v34 = vld [vmem:[#allocation16] sm:$0xf] }
 0x2a9   :  { %v5558_v35 = vld [vmem:[#allocation16 + $0x4] sm:$0xf]  ;;  %v5560_v36 = vld [vmem:[#allocation16 + $0x8] sm:$0xf]  ;;  %v5562_v37 = vld [vmem:[#allocation16 + $0xc] sm:$0xf] }
 0x2aa   :  { %v5564_v38 = vld [vmem:[#allocation16 + $0x10] sm:$0xf]  ;;  %v5566_v39 = vld [vmem:[#allocation16 + $0x14] sm:$0xf]  ;;  %v5568_v40 = vld [vmem:[#allocation16 + $0x18] sm:$0xf] }
 0x2ab   :  { %v5570_v41 = vld [vmem:[#allocation16 + $0x1c] sm:$0xf]  ;;  %v5572_v42 = vld [vmem:[#allocation16 + $0x20] sm:$0xf]  ;;  %v5574_v43 = vld [vmem:[#allocation16 + $0x24] sm:$0xf] }
 0x2ac   :  { %v5576_v44 = vld [vmem:[#allocation16 + $0x28] sm:$0xf]  ;;  %v5578_v45 = vld [vmem:[#allocation16 + $0x2c] sm:$0xf]  ;;  %v5580_v46 = vld [vmem:[#allocation16 + $0x30] sm:$0xf] }
 0x2ad   :  { %7177 = vst [vmem:[#allocation106_spill] sm:$0xff] %v5580_v46  ;;  %v5582_v47 = vld [vmem:[#allocation16 + $0x34] sm:$0xf]  ;;  %v5584_v48 = vld [vmem:[#allocation16 + $0x38] sm:$0xf] }
 0x2ae   :  { %7178 = vst [vmem:[#allocation107_spill] sm:$0xff] %v5582_v47  ;;  %7179 = vst [vmem:[#allocation108_spill] sm:$0xff] %v5584_v48  ;;  %v5586_v49 = vld [vmem:[#allocation16 + $0x3c] sm:$0xf]  ;;  %v5588_v50 = vld [vmem:[#allocation19] sm:$0xf] }
 0x2af   :  { %7180 = vst [vmem:[#allocation109_spill] sm:$0xff] %v5586_v49  ;;  %7181 = vst [vmem:[#allocation110_spill] sm:$0xff] %v5588_v50  ;;  %v5590_v51 = vld [vmem:[#allocation19 + $0x4] sm:$0xf]  ;;  %v5592_v52 = vld [vmem:[#allocation19 + $0x8] sm:$0xf] }
 0x2b0   :  { %7182 = vst [vmem:[#allocation111_spill] sm:$0xff] %v5590_v51  ;;  %7183 = vst [vmem:[#allocation112_spill] sm:$0xff] %v5592_v52  ;;  %v5594_v53 = vld [vmem:[#allocation19 + $0xc] sm:$0xf]  ;;  %v5596_v54 = vld [vmem:[#allocation19 + $0x10] sm:$0xf] }
 0x2b1   :  { %7184 = vst [vmem:[#allocation113_spill] sm:$0xff] %v5594_v53  ;;  %7185 = vst [vmem:[#allocation114_spill] sm:$0xff] %v5596_v54  ;;  %v5598_v55 = vld [vmem:[#allocation19 + $0x14] sm:$0xf]  ;;  %v5600_v56 = vld [vmem:[#allocation19 + $0x18] sm:$0xf] }
 0x2b2   :  { %7186 = vst [vmem:[#allocation115_spill] sm:$0xff] %v5598_v55  ;;  %7187 = vst [vmem:[#allocation116_spill] sm:$0xff] %v5600_v56  ;;  %v5602_v57 = vld [vmem:[#allocation19 + $0x1c] sm:$0xf]  ;;  %v5604_v58 = vld [vmem:[#allocation19 + $0x20] sm:$0xf] }
 0x2b3   :  { %7188 = vst [vmem:[#allocation117_spill] sm:$0xff] %v5602_v57  ;;  %7189 = vst [vmem:[#allocation118_spill] sm:$0xff] %v5604_v58  ;;  %v5606_v59 = vld [vmem:[#allocation19 + $0x24] sm:$0xf]  ;;  %v5608_v60 = vld [vmem:[#allocation19 + $0x28] sm:$0xf] }
 0x2b4   :  { %7190 = vst [vmem:[#allocation119_spill] sm:$0xff] %v5606_v59  ;;  %7191 = vst [vmem:[#allocation120_spill] sm:$0xff] %v5608_v60  ;;  %v5610_v61 = vld [vmem:[#allocation19 + $0x2c] sm:$0xf]  ;;  %v5612_v62 = vld [vmem:[#allocation19 + $0x30] sm:$0xf] }
 0x2b5   :  { %7192 = vst [vmem:[#allocation121_spill] sm:$0xff] %v5610_v61  ;;  %7193 = vst [vmem:[#allocation122_spill] sm:$0xff] %v5612_v62  ;;  %v5614_v63 = vld [vmem:[#allocation19 + $0x34] sm:$0xf]  ;;  %v5616_v52 = vld [vmem:[#allocation19 + $0x38] sm:$0xf] }
 0x2b6   :  { %7194 = vst [vmem:[#allocation123_spill] sm:$0xff] %v5614_v63  ;;  %7195 = vst [vmem:[#allocation124_spill] sm:$0xff] %v5616_v52  ;;  %v5618_v54 = vld [vmem:[#allocation19 + $0x3c] sm:$0xf]  ;;  %v5620_v55 = vld [vmem:[#allocation22] sm:$0xf] }
 0x2b7   :  { %7196 = vst [vmem:[#allocation125_spill] sm:$0xff] %v5618_v54  ;;  %7197 = vst [vmem:[#allocation126_spill] sm:$0xff] %v5620_v55  ;;  %v5622_v56 = vld [vmem:[#allocation22 + $0x4] sm:$0xf]  ;;  %v5624_v57 = vld [vmem:[#allocation22 + $0x8] sm:$0xf] }
 0x2b8   :  { %7198 = vst [vmem:[#allocation127_spill] sm:$0xff] %v5622_v56  ;;  %7199 = vst [vmem:[#allocation128_spill] sm:$0xff] %v5624_v57  ;;  %v5626_v58 = vld [vmem:[#allocation22 + $0xc] sm:$0xf]  ;;  %v5628_v59 = vld [vmem:[#allocation22 + $0x10] sm:$0xf] }
 0x2b9   :  { %7200 = vst [vmem:[#allocation129_spill] sm:$0xff] %v5626_v58  ;;  %7201 = vst [vmem:[#allocation130_spill] sm:$0xff] %v5628_v59  ;;  %v5630_v60 = vld [vmem:[#allocation22 + $0x14] sm:$0xf]  ;;  %v5632_v61 = vld [vmem:[#allocation22 + $0x18] sm:$0xf] }
 0x2ba   :  { %7202 = vst [vmem:[#allocation131_spill] sm:$0xff] %v5630_v60  ;;  %7203 = vst [vmem:[#allocation132_spill] sm:$0xff] %v5632_v61  ;;  %v5634_v62 = vld [vmem:[#allocation22 + $0x1c] sm:$0xf]  ;;  %v5636_v63 = vld [vmem:[#allocation22 + $0x20] sm:$0xf] }
 0x2bb   :  { %7204 = vst [vmem:[#allocation133_spill] sm:$0xff] %v5634_v62  ;;  %7205 = vst [vmem:[#allocation134_spill] sm:$0xff] %v5636_v63  ;;  %v5638_v52 = vld [vmem:[#allocation22 + $0x24] sm:$0xf]  ;;  %v5640_v54 = vld [vmem:[#allocation22 + $0x28] sm:$0xf] }
 0x2bc   :  { %7206 = vst [vmem:[#allocation135_spill] sm:$0xff] %v5638_v52  ;;  %7207 = vst [vmem:[#allocation136_spill] sm:$0xff] %v5640_v54  ;;  %v5642_v55 = vld [vmem:[#allocation22 + $0x2c] sm:$0xf]  ;;  %v5644_v56 = vld [vmem:[#allocation22 + $0x30] sm:$0xf] }
 0x2bd   :  { %7208 = vst [vmem:[#allocation137_spill] sm:$0xff] %v5642_v55  ;;  %7209 = vst [vmem:[#allocation138_spill] sm:$0xff] %v5644_v56  ;;  %v5646_v57 = vld [vmem:[#allocation22 + $0x34] sm:$0xf]  ;;  %v5648_v58 = vld [vmem:[#allocation22 + $0x38] sm:$0xf] }
 0x2be   :  { %7210 = vst [vmem:[#allocation139_spill] sm:$0xff] %v5646_v57  ;;  %7211 = vst [vmem:[#allocation140_spill] sm:$0xff] %v5648_v58  ;;  %v5650_v59 = vld [vmem:[#allocation22 + $0x3c] sm:$0xf]  ;;  %v5652_v60 = vld [vmem:[#allocation25] sm:$0xf] }
 0x2bf   :  { %7212 = vst [vmem:[#allocation141_spill] sm:$0xff] %v5650_v59  ;;  %7213 = vst [vmem:[#allocation142_spill] sm:$0xff] %v5652_v60  ;;  %v5654_v61 = vld [vmem:[#allocation25 + $0x4] sm:$0xf]  ;;  %v5656_v62 = vld [vmem:[#allocation25 + $0x8] sm:$0xf] }
 0x2c0   :  { %7214 = vst [vmem:[#allocation143_spill] sm:$0xff] %v5654_v61  ;;  %7215 = vst [vmem:[#allocation144_spill] sm:$0xff] %v5656_v62  ;;  %v5658_v63 = vld [vmem:[#allocation25 + $0xc] sm:$0xf]  ;;  %v5660_v52 = vld [vmem:[#allocation25 + $0x10] sm:$0xf] }
 0x2c1   :  { %7216 = vst [vmem:[#allocation145_spill] sm:$0xff] %v5658_v63  ;;  %7217 = vst [vmem:[#allocation146_spill] sm:$0xff] %v5660_v52  ;;  %v5662_v54 = vld [vmem:[#allocation25 + $0x14] sm:$0xf]  ;;  %v5664_v55 = vld [vmem:[#allocation25 + $0x18] sm:$0xf] }
 0x2c2   :  { %7218 = vst [vmem:[#allocation147_spill] sm:$0xff] %v5662_v54  ;;  %7219 = vst [vmem:[#allocation148_spill] sm:$0xff] %v5664_v55  ;;  %v5666_v56 = vld [vmem:[#allocation25 + $0x1c] sm:$0xf]  ;;  %v5668_v57 = vld [vmem:[#allocation25 + $0x20] sm:$0xf] }
 0x2c3   :  { %7220 = vst [vmem:[#allocation149_spill] sm:$0xff] %v5666_v56  ;;  %7221 = vst [vmem:[#allocation150_spill] sm:$0xff] %v5668_v57  ;;  %v5670_v58 = vld [vmem:[#allocation25 + $0x24] sm:$0xf]  ;;  %v5672_v59 = vld [vmem:[#allocation25 + $0x28] sm:$0xf] }
 0x2c4   :  { %7222 = vst [vmem:[#allocation151_spill] sm:$0xff] %v5670_v58  ;;  %7223 = vst [vmem:[#allocation152_spill] sm:$0xff] %v5672_v59  ;;  %v5674_v60 = vld [vmem:[#allocation25 + $0x2c] sm:$0xf]  ;;  %v5676_v61 = vld [vmem:[#allocation25 + $0x30] sm:$0xf] }
 0x2c5   :  { %7224 = vst [vmem:[#allocation153_spill] sm:$0xff] %v5674_v60  ;;  %7225 = vst [vmem:[#allocation154_spill] sm:$0xff] %v5676_v61  ;;  %v5678_v62 = vld [vmem:[#allocation25 + $0x34] sm:$0xf]  ;;  %v5680_v63 = vld [vmem:[#allocation25 + $0x38] sm:$0xf] }
 0x2c6   :  { %7226 = vst [vmem:[#allocation155_spill] sm:$0xff] %v5678_v62  ;;  %7227 = vst [vmem:[#allocation156_spill] sm:$0xff] %v5680_v63  ;;  %v5682_v52 = vld [vmem:[#allocation25 + $0x3c] sm:$0xf]  ;;  %v5684_v54 = vld [vmem:[#allocation28] sm:$0xff] }
 0x2c7   :  { %7228 = vst [vmem:[#allocation157_spill] sm:$0xff] %v5682_v52  ;;  %7229 = vst [vmem:[#allocation158_spill] sm:$0xff] %v5684_v54  ;;  %v5686_v55 = vld [vmem:[#allocation28 + $0x8] sm:$0xff]  ;;  %v5688_v56 = vld [vmem:[#allocation28 + $0x10] sm:$0xff] }
 0x2c8   :  { %7230 = vst [vmem:[#allocation159_spill] sm:$0xff] %v5686_v55  ;;  %7231 = vst [vmem:[#allocation160_spill] sm:$0xff] %v5688_v56  ;;  %v5690_v57 = vld [vmem:[#allocation28 + $0x18] sm:$0xff]  ;;  %v5692_v58 = vld [vmem:[#allocation28 + $0x20] sm:$0xff] }
 0x2c9   :  { %7232 = vst [vmem:[#allocation161_spill] sm:$0xff] %v5690_v57  ;;  %7233 = vst [vmem:[#allocation162_spill] sm:$0xff] %v5692_v58  ;;  %v5694_v59 = vld [vmem:[#allocation28 + $0x28] sm:$0xff]  ;;  %v5696_v60 = vld [vmem:[#allocation28 + $0x30] sm:$0xff] }
 0x2ca   :  { %7234 = vst [vmem:[#allocation163_spill] sm:$0xff] %v5694_v59  ;;  %7235 = vst [vmem:[#allocation164_spill] sm:$0xff] %v5696_v60  ;;  %v5698_v61 = vld [vmem:[#allocation28 + $0x38] sm:$0xff]  ;;  %v5700_v62 = vld [vmem:[#allocation28 + $0x40] sm:$0xff] }
 0x2cb   :  { %7236 = vst [vmem:[#allocation165_spill] sm:$0xff] %v5698_v61  ;;  %7237 = vst [vmem:[#allocation166_spill] sm:$0xff] %v5700_v62  ;;  %v5702_v63 = vld [vmem:[#allocation28 + $0x48] sm:$0xff]  ;;  %v5704_v52 = vld [vmem:[#allocation28 + $0x50] sm:$0xff] }
 0x2cc   :  { %7238 = vst [vmem:[#allocation167_spill] sm:$0xff] %v5702_v63  ;;  %7239 = vst [vmem:[#allocation168_spill] sm:$0xff] %v5704_v52  ;;  %v5706_v54 = vld [vmem:[#allocation28 + $0x58] sm:$0xff]  ;;  %v5708_v55 = vld [vmem:[#allocation28 + $0x60] sm:$0xff] }
 0x2cd   :  { %7240 = vst [vmem:[#allocation169_spill] sm:$0xff] %v5706_v54  ;;  %7241 = vst [vmem:[#allocation170_spill] sm:$0xff] %v5708_v55  ;;  %v5710_v56 = vld [vmem:[#allocation28 + $0x68] sm:$0xff]  ;;  %v5712_v57 = vld [vmem:[#allocation28 + $0x70] sm:$0xff] }
 0x2ce   :  { %7242 = vst [vmem:[#allocation171_spill] sm:$0xff] %v5710_v56  ;;  %7243 = vst [vmem:[#allocation172_spill] sm:$0xff] %v5712_v57  ;;  %v5714_v58 = vld [vmem:[#allocation28 + $0x78] sm:$0xff]  ;;  %v5716_v59 = vld [vmem:[#allocation28 + $0x80] sm:$0xff] }
 0x2cf   :  { %7244 = vst [vmem:[#allocation173_spill] sm:$0xff] %v5714_v58  ;;  %7245 = vst [vmem:[#allocation174_spill] sm:$0xff] %v5716_v59  ;;  %v5718_v60 = vld [vmem:[#allocation28 + $0x88] sm:$0xff]  ;;  %v5720_v61 = vld [vmem:[#allocation28 + $0x90] sm:$0xff] }
 0x2d0   :  { %7246 = vst [vmem:[#allocation175_spill] sm:$0xff] %v5718_v60  ;;  %7247 = vst [vmem:[#allocation176_spill] sm:$0xff] %v5720_v61  ;;  %v5722_v62 = vld [vmem:[#allocation28 + $0x98] sm:$0xff]  ;;  %v5724_v63 = vld [vmem:[#allocation28 + $0xa0] sm:$0xff] }
 0x2d1   :  { %7248 = vst [vmem:[#allocation177_spill] sm:$0xff] %v5722_v62  ;;  %7249 = vst [vmem:[#allocation178_spill] sm:$0xff] %v5724_v63  ;;  %v5726_v52 = vld [vmem:[#allocation28 + $0xa8] sm:$0xff]  ;;  %v5728_v54 = vld [vmem:[#allocation28 + $0xb0] sm:$0xff] }
 0x2d2   :  { %7250 = vst [vmem:[#allocation179_spill] sm:$0xff] %v5726_v52  ;;  %7251 = vst [vmem:[#allocation180_spill] sm:$0xff] %v5728_v54  ;;  %v5730_v55 = vld [vmem:[#allocation28 + $0xb8] sm:$0xff]  ;;  %v5732_v56 = vld [vmem:[#allocation28 + $0xc0] sm:$0xff] }
 0x2d3   :  { %7252 = vst [vmem:[#allocation181_spill] sm:$0xff] %v5730_v55  ;;  %7253 = vst [vmem:[#allocation182_spill] sm:$0xff] %v5732_v56  ;;  %v5734_v57 = vld [vmem:[#allocation28 + $0xc8] sm:$0xff]  ;;  %v5736_v58 = vld [vmem:[#allocation28 + $0xd0] sm:$0xff] }
 0x2d4   :  { %7254 = vst [vmem:[#allocation183_spill] sm:$0xff] %v5734_v57  ;;  %7255 = vst [vmem:[#allocation184_spill] sm:$0xff] %v5736_v58  ;;  %v5738_v59 = vld [vmem:[#allocation28 + $0xd8] sm:$0xff]  ;;  %v5740_v60 = vld [vmem:[#allocation28 + $0xe0] sm:$0xff] }
 0x2d5   :  { %7256 = vst [vmem:[#allocation185_spill] sm:$0xff] %v5738_v59  ;;  %7257 = vst [vmem:[#allocation186_spill] sm:$0xff] %v5740_v60  ;;  %v5742_v61 = vld [vmem:[#allocation28 + $0xe8] sm:$0xff]  ;;  %v5744_v62 = vld [vmem:[#allocation28 + $0xf0] sm:$0xff] }
 0x2d6   :  { %7258 = vst [vmem:[#allocation187_spill] sm:$0xff] %v5742_v61  ;;  %7259 = vst [vmem:[#allocation188_spill] sm:$0xff] %v5744_v62  ;;  %v5746_v63 = vld [vmem:[#allocation28 + $0xf8] sm:$0xff]  ;;  %v5748_v52 = vld [vmem:[#allocation29] sm:$0xff] }
 0x2d7   :  { %7260 = vst [vmem:[#allocation189_spill] sm:$0xff] %v5746_v63  ;;  %7261 = vst [vmem:[#allocation190_spill] sm:$0xff] %v5748_v52  ;;  %v5750_v54 = vld [vmem:[#allocation29 + $0x8] sm:$0xff]  ;;  %v5752_v55 = vld [vmem:[#allocation29 + $0x10] sm:$0xff] }
 0x2d8   :  { %7262 = vst [vmem:[#allocation191_spill] sm:$0xff] %v5750_v54  ;;  %7263 = vst [vmem:[#allocation192_spill] sm:$0xff] %v5752_v55  ;;  %v5754_v56 = vld [vmem:[#allocation29 + $0x18] sm:$0xff]  ;;  %v5756_v57 = vld [vmem:[#allocation29 + $0x20] sm:$0xff] }
 0x2d9   :  { %7264 = vst [vmem:[#allocation193_spill] sm:$0xff] %v5754_v56  ;;  %7265 = vst [vmem:[#allocation194_spill] sm:$0xff] %v5756_v57  ;;  %v5758_v58 = vld [vmem:[#allocation29 + $0x28] sm:$0xff]  ;;  %v5760_v59 = vld [vmem:[#allocation29 + $0x30] sm:$0xff] }
 0x2da   :  { %7266 = vst [vmem:[#allocation195_spill] sm:$0xff] %v5758_v58  ;;  %7267 = vst [vmem:[#allocation196_spill] sm:$0xff] %v5760_v59  ;;  %v5762_v60 = vld [vmem:[#allocation29 + $0x38] sm:$0xff]  ;;  %v5764_v61 = vld [vmem:[#allocation29 + $0x40] sm:$0xff] }
 0x2db   :  { %7268 = vst [vmem:[#allocation197_spill] sm:$0xff] %v5762_v60  ;;  %7269 = vst [vmem:[#allocation198_spill] sm:$0xff] %v5764_v61  ;;  %v5766_v62 = vld [vmem:[#allocation29 + $0x48] sm:$0xff]  ;;  %v5768_v63 = vld [vmem:[#allocation29 + $0x50] sm:$0xff] }
 0x2dc   :  { %7270 = vst [vmem:[#allocation199_spill] sm:$0xff] %v5766_v62  ;;  %7271 = vst [vmem:[#allocation200_spill] sm:$0xff] %v5768_v63  ;;  %v5770_v52 = vld [vmem:[#allocation29 + $0x58] sm:$0xff]  ;;  %v5772_v54 = vld [vmem:[#allocation29 + $0x60] sm:$0xff] }
 0x2dd   :  { %7272 = vst [vmem:[#allocation201_spill] sm:$0xff] %v5770_v52  ;;  %7273 = vst [vmem:[#allocation202_spill] sm:$0xff] %v5772_v54  ;;  %v5774_v55 = vld [vmem:[#allocation29 + $0x68] sm:$0xff]  ;;  %v5776_v56 = vld [vmem:[#allocation29 + $0x70] sm:$0xff] }
 0x2de   :  { %7274 = vst [vmem:[#allocation203_spill] sm:$0xff] %v5774_v55  ;;  %7275 = vst [vmem:[#allocation204_spill] sm:$0xff] %v5776_v56  ;;  %v5778_v57 = vld [vmem:[#allocation29 + $0x78] sm:$0xff]  ;;  %v5780_v58 = vld [vmem:[#allocation29 + $0x80] sm:$0xff] }
 0x2df   :  { %7276 = vst [vmem:[#allocation205_spill] sm:$0xff] %v5778_v57  ;;  %7277 = vst [vmem:[#allocation206_spill] sm:$0xff] %v5780_v58  ;;  %v5782_v59 = vld [vmem:[#allocation29 + $0x88] sm:$0xff]  ;;  %v5784_v60 = vld [vmem:[#allocation29 + $0x90] sm:$0xff] }
 0x2e0   :  { %7278 = vst [vmem:[#allocation207_spill] sm:$0xff] %v5782_v59  ;;  %7279 = vst [vmem:[#allocation208_spill] sm:$0xff] %v5784_v60  ;;  %v5786_v61 = vld [vmem:[#allocation29 + $0x98] sm:$0xff]  ;;  %v5788_v62 = vld [vmem:[#allocation29 + $0xa0] sm:$0xff] }
 0x2e1   :  { %7280 = vst [vmem:[#allocation209_spill] sm:$0xff] %v5786_v61  ;;  %7281 = vst [vmem:[#allocation210_spill] sm:$0xff] %v5788_v62  ;;  %v5790_v63 = vld [vmem:[#allocation29 + $0xa8] sm:$0xff]  ;;  %v5792_v52 = vld [vmem:[#allocation29 + $0xb0] sm:$0xff] }
 0x2e2   :  { %7282 = vst [vmem:[#allocation211_spill] sm:$0xff] %v5790_v63  ;;  %7283 = vst [vmem:[#allocation212_spill] sm:$0xff] %v5792_v52  ;;  %v5794_v54 = vld [vmem:[#allocation29 + $0xb8] sm:$0xff]  ;;  %v5796_v55 = vld [vmem:[#allocation29 + $0xc0] sm:$0xff] }
 0x2e3   :  { %7284 = vst [vmem:[#allocation213_spill] sm:$0xff] %v5794_v54  ;;  %7285 = vst [vmem:[#allocation214_spill] sm:$0xff] %v5796_v55  ;;  %v5798_v56 = vld [vmem:[#allocation29 + $0xc8] sm:$0xff]  ;;  %v5800_v57 = vld [vmem:[#allocation29 + $0xd0] sm:$0xff] }
 0x2e4   :  { %7286 = vst [vmem:[#allocation215_spill] sm:$0xff] %v5798_v56  ;;  %7287 = vst [vmem:[#allocation216_spill] sm:$0xff] %v5800_v57  ;;  %v5802_v58 = vld [vmem:[#allocation29 + $0xd8] sm:$0xff]  ;;  %v5804_v59 = vld [vmem:[#allocation29 + $0xe0] sm:$0xff] }
 0x2e5   :  { %7288 = vst [vmem:[#allocation217_spill] sm:$0xff] %v5802_v58  ;;  %7289 = vst [vmem:[#allocation218_spill] sm:$0xff] %v5804_v59  ;;  %v5806_v60 = vld [vmem:[#allocation29 + $0xe8] sm:$0xff]  ;;  %v5808_v61 = vld [vmem:[#allocation29 + $0xf0] sm:$0xff] }
 0x2e6   :  { %7290 = vst [vmem:[#allocation219_spill] sm:$0xff] %v5806_v60  ;;  %7291 = vst [vmem:[#allocation220_spill] sm:$0xff] %v5808_v61  ;;  %v5810_v62 = vld [vmem:[#allocation29 + $0xf8] sm:$0xff]  ;;  %v5812_v63 = vld [vmem:[#allocation31] sm:$0xff] }
 0x2e7   :  { %7292 = vst [vmem:[#allocation221_spill] sm:$0xff] %v5810_v62  ;;  %7293 = vst [vmem:[#allocation222_spill] sm:$0xff] %v5812_v63  ;;  %v5814_v52 = vld [vmem:[#allocation31 + $0x8] sm:$0xff]  ;;  %v5816_v54 = vld [vmem:[#allocation31 + $0x10] sm:$0xff] }
 0x2e8   :  { %7294 = vst [vmem:[#allocation223_spill] sm:$0xff] %v5814_v52  ;;  %7295 = vst [vmem:[#allocation224_spill] sm:$0xff] %v5816_v54  ;;  %v5818_v55 = vld [vmem:[#allocation31 + $0x18] sm:$0xff]  ;;  %v5820_v56 = vld [vmem:[#allocation31 + $0x20] sm:$0xff] }
 0x2e9   :  { %7296 = vst [vmem:[#allocation225_spill] sm:$0xff] %v5818_v55  ;;  %7297 = vst [vmem:[#allocation226_spill] sm:$0xff] %v5820_v56  ;;  %v5822_v57 = vld [vmem:[#allocation31 + $0x28] sm:$0xff]  ;;  %v5824_v58 = vld [vmem:[#allocation31 + $0x30] sm:$0xff] }
 0x2ea   :  { %7298 = vst [vmem:[#allocation227_spill] sm:$0xff] %v5822_v57  ;;  %7299 = vst [vmem:[#allocation228_spill] sm:$0xff] %v5824_v58  ;;  %v5826_v59 = vld [vmem:[#allocation31 + $0x38] sm:$0xff]  ;;  %v5828_v60 = vld [vmem:[#allocation31 + $0x40] sm:$0xff] }
 0x2eb   :  { %7300 = vst [vmem:[#allocation229_spill] sm:$0xff] %v5826_v59  ;;  %7301 = vst [vmem:[#allocation230_spill] sm:$0xff] %v5828_v60  ;;  %v5830_v61 = vld [vmem:[#allocation31 + $0x48] sm:$0xff]  ;;  %v5832_v62 = vld [vmem:[#allocation31 + $0x50] sm:$0xff] }
 0x2ec   :  { %7302 = vst [vmem:[#allocation231_spill] sm:$0xff] %v5830_v61  ;;  %7303 = vst [vmem:[#allocation232_spill] sm:$0xff] %v5832_v62  ;;  %v5834_v63 = vld [vmem:[#allocation31 + $0x58] sm:$0xff]  ;;  %v5836_v52 = vld [vmem:[#allocation31 + $0x60] sm:$0xff] }
 0x2ed   :  { %7304 = vst [vmem:[#allocation233_spill] sm:$0xff] %v5834_v63  ;;  %7305 = vst [vmem:[#allocation234_spill] sm:$0xff] %v5836_v52  ;;  %v5838_v54 = vld [vmem:[#allocation31 + $0x68] sm:$0xff]  ;;  %v5840_v55 = vld [vmem:[#allocation31 + $0x70] sm:$0xff] }
 0x2ee   :  { %7306 = vst [vmem:[#allocation235_spill] sm:$0xff] %v5838_v54  ;;  %7307 = vst [vmem:[#allocation236_spill] sm:$0xff] %v5840_v55  ;;  %v5842_v56 = vld [vmem:[#allocation31 + $0x78] sm:$0xff]  ;;  %v5844_v57 = vld [vmem:[#allocation31 + $0x80] sm:$0xff] }
 0x2ef   :  { %7308 = vst [vmem:[#allocation237_spill] sm:$0xff] %v5842_v56  ;;  %7309 = vst [vmem:[#allocation238_spill] sm:$0xff] %v5844_v57  ;;  %v5846_v58 = vld [vmem:[#allocation31 + $0x88] sm:$0xff]  ;;  %v5848_v59 = vld [vmem:[#allocation31 + $0x90] sm:$0xff] }
 0x2f0   :  { %7310 = vst [vmem:[#allocation239_spill] sm:$0xff] %v5846_v58  ;;  %7311 = vst [vmem:[#allocation240_spill] sm:$0xff] %v5848_v59  ;;  %v5850_v60 = vld [vmem:[#allocation31 + $0x98] sm:$0xff]  ;;  %v5852_v61 = vld [vmem:[#allocation31 + $0xa0] sm:$0xff] }
 0x2f1   :  { %7312 = vst [vmem:[#allocation241_spill] sm:$0xff] %v5850_v60  ;;  %7313 = vst [vmem:[#allocation242_spill] sm:$0xff] %v5852_v61  ;;  %v5854_v62 = vld [vmem:[#allocation31 + $0xa8] sm:$0xff]  ;;  %v5856_v63 = vld [vmem:[#allocation31 + $0xb0] sm:$0xff] }
 0x2f2   :  { %7314 = vst [vmem:[#allocation243_spill] sm:$0xff] %v5854_v62  ;;  %7315 = vst [vmem:[#allocation244_spill] sm:$0xff] %v5856_v63  ;;  %v5858_v52 = vld [vmem:[#allocation31 + $0xb8] sm:$0xff]  ;;  %v5860_v54 = vld [vmem:[#allocation31 + $0xc0] sm:$0xff] }
 0x2f3   :  { %7316 = vst [vmem:[#allocation245_spill] sm:$0xff] %v5858_v52  ;;  %7317 = vst [vmem:[#allocation246_spill] sm:$0xff] %v5860_v54  ;;  %v5862_v55 = vld [vmem:[#allocation31 + $0xc8] sm:$0xff]  ;;  %v5864_v56 = vld [vmem:[#allocation31 + $0xd0] sm:$0xff] }
 0x2f4   :  { %7318 = vst [vmem:[#allocation247_spill] sm:$0xff] %v5862_v55  ;;  %7319 = vst [vmem:[#allocation248_spill] sm:$0xff] %v5864_v56  ;;  %v5866_v57 = vld [vmem:[#allocation31 + $0xd8] sm:$0xff]  ;;  %v5868_v58 = vld [vmem:[#allocation31 + $0xe0] sm:$0xff] }
 0x2f5   :  { %7320 = vst [vmem:[#allocation249_spill] sm:$0xff] %v5866_v57  ;;  %7321 = vst [vmem:[#allocation250_spill] sm:$0xff] %v5868_v58  ;;  %v5870_v59 = vld [vmem:[#allocation31 + $0xe8] sm:$0xff]  ;;  %v5872_v60 = vld [vmem:[#allocation31 + $0xf0] sm:$0xff] }
 0x2f6   :  { %7322 = vst [vmem:[#allocation251_spill] sm:$0xff] %v5870_v59  ;;  %7323 = vst [vmem:[#allocation252_spill] sm:$0xff] %v5872_v60  ;;  %v5874_v61 = vld [vmem:[#allocation31 + $0xf8] sm:$0xff]  ;;  %v5876_v62 = vld [vmem:[#allocation34] sm:$0xff] }
 0x2f7   :  { %7324 = vst [vmem:[#allocation253_spill] sm:$0xff] %v5874_v61  ;;  %7325 = vst [vmem:[#allocation254_spill] sm:$0xff] %v5876_v62  ;;  %v5878_v63 = vld [vmem:[#allocation34 + $0x8] sm:$0xff]  ;;  %v5880_v52 = vld [vmem:[#allocation34 + $0x10] sm:$0xff] }
 0x2f8   :  { %7326 = vst [vmem:[#allocation255_spill] sm:$0xff] %v5878_v63  ;;  %7327 = vst [vmem:[#allocation256_spill] sm:$0xff] %v5880_v52  ;;  %v5882_v54 = vld [vmem:[#allocation34 + $0x18] sm:$0xff]  ;;  %v5884_v55 = vld [vmem:[#allocation34 + $0x20] sm:$0xff] }
 0x2f9   :  { %7328 = vst [vmem:[#allocation257_spill] sm:$0xff] %v5882_v54  ;;  %7329 = vst [vmem:[#allocation258_spill] sm:$0xff] %v5884_v55  ;;  %v5886_v56 = vld [vmem:[#allocation34 + $0x28] sm:$0xff]  ;;  %v5888_v57 = vld [vmem:[#allocation34 + $0x30] sm:$0xff] }
 0x2fa   :  { %7330 = vst [vmem:[#allocation259_spill] sm:$0xff] %v5886_v56  ;;  %7331 = vst [vmem:[#allocation260_spill] sm:$0xff] %v5888_v57  ;;  %v5890_v58 = vld [vmem:[#allocation34 + $0x38] sm:$0xff]  ;;  %v5892_v59 = vld [vmem:[#allocation34 + $0x40] sm:$0xff] }
 0x2fb   :  { %7332 = vst [vmem:[#allocation261_spill] sm:$0xff] %v5890_v58  ;;  %7333 = vst [vmem:[#allocation262_spill] sm:$0xff] %v5892_v59  ;;  %v5894_v60 = vld [vmem:[#allocation34 + $0x48] sm:$0xff]  ;;  %v5896_v61 = vld [vmem:[#allocation34 + $0x50] sm:$0xff] }
 0x2fc   :  { %7334 = vst [vmem:[#allocation263_spill] sm:$0xff] %v5894_v60  ;;  %7335 = vst [vmem:[#allocation264_spill] sm:$0xff] %v5896_v61  ;;  %v5898_v53 = vld [vmem:[#allocation34 + $0x58] sm:$0xff]  ;;  %v5900_v50 = vld [vmem:[#allocation34 + $0x60] sm:$0xff] }
 0x2fd   :  { %7336 = vst [vmem:[#allocation265_spill] sm:$0xff] %v5898_v53  ;;  %7337 = vst [vmem:[#allocation266_spill] sm:$0xff] %v5900_v50  ;;  %v5902_v51 = vld [vmem:[#allocation34 + $0x68] sm:$0xff]  ;;  %v5904_v62 = vld [vmem:[#allocation34 + $0x70] sm:$0xff] }
 0x2fe   :  { %7338 = vst [vmem:[#allocation267_spill] sm:$0xff] %v5902_v51  ;;  %7339 = vst [vmem:[#allocation268_spill] sm:$0xff] %v5904_v62  ;;  %v5906_v55 = vld [vmem:[#allocation34 + $0x78] sm:$0xff]  ;;  %v5908_v52 = vld [vmem:[#allocation34 + $0x80] sm:$0xff] }
 0x2ff   :  { %7340 = vst [vmem:[#allocation269_spill] sm:$0xff] %v5906_v55  ;;  %7341 = vst [vmem:[#allocation270_spill] sm:$0xff] %v5908_v52  ;;  %v5910_v57 = vld [vmem:[#allocation34 + $0x88] sm:$0xff]  ;;  %v5912_v56 = vld [vmem:[#allocation34 + $0x90] sm:$0xff] }
 0x300   :  { %7342 = vst [vmem:[#allocation271_spill] sm:$0xff] %v5910_v57  ;;  %7343 = vst [vmem:[#allocation272_spill] sm:$0xff] %v5912_v56  ;;  %v5914_v59 = vld [vmem:[#allocation34 + $0x98] sm:$0xff]  ;;  %v5916_v60 = vld [vmem:[#allocation34 + $0xa0] sm:$0xff] }
 0x301   :  { %7344 = vst [vmem:[#allocation273_spill] sm:$0xff] %v5914_v59  ;;  %7345 = vst [vmem:[#allocation274_spill] sm:$0xff] %v5916_v60  ;;  %v5918_v61 = vld [vmem:[#allocation34 + $0xa8] sm:$0xff]  ;;  %v5920_v53 = vld [vmem:[#allocation34 + $0xb0] sm:$0xff] }
 0x302   :  { %7346 = vst [vmem:[#allocation275_spill] sm:$0xff] %v5918_v61  ;;  %7347 = vst [vmem:[#allocation276_spill] sm:$0xff] %v5920_v53  ;;  %v5922_v50 = vld [vmem:[#allocation34 + $0xb8] sm:$0xff]  ;;  %v5924_v51 = vld [vmem:[#allocation34 + $0xc0] sm:$0xff] }
 0x303   :  { %7348 = vst [vmem:[#allocation277_spill] sm:$0xff] %v5922_v50  ;;  %7349 = vst [vmem:[#allocation278_spill] sm:$0xff] %v5924_v51  ;;  %v5926_v62 = vld [vmem:[#allocation34 + $0xc8] sm:$0xff]  ;;  %v5928_v55 = vld [vmem:[#allocation34 + $0xd0] sm:$0xff] }
 0x304   :  { %7350 = vst [vmem:[#allocation279_spill] sm:$0xff] %v5926_v62  ;;  %7351 = vst [vmem:[#allocation280_spill] sm:$0xff] %v5928_v55  ;;  %v5930_v52 = vld [vmem:[#allocation34 + $0xd8] sm:$0xff]  ;;  %v5932_v57 = vld [vmem:[#allocation34 + $0xe0] sm:$0xff]  ;;  %v815_v55 = vlaneseq }
 0x305   :  { %7352 = vst [vmem:[#allocation281_spill] sm:$0xff] %v5930_v52  ;;  %7353 = vst [vmem:[#allocation282_spill] sm:$0xff] %v5932_v57  ;;  %v5934_v56 = vld [vmem:[#allocation34 + $0xe8] sm:$0xff]  ;;  %v5936_v59 = vld [vmem:[#allocation34 + $0xf0] sm:$0xff] }
 0x306   :  { %7354 = vst [vmem:[#allocation283_spill] sm:$0xff] %v5934_v56  ;;  %7355 = vst [vmem:[#allocation284_spill] sm:$0xff] %v5936_v59  ;;  %v5938_v60 = vld [vmem:[#allocation34 + $0xf8] sm:$0xff]  ;;  %v5940_v61 = vld [vmem:[#allocation35] sm:$0xff] }
 0x307   :  { %7356 = vst [vmem:[#allocation285_spill] sm:$0xff] %v5938_v60  ;;  %7357 = vst [vmem:[#allocation286_spill] sm:$0xff] %v5940_v61  ;;  %v5942_v53 = vld [vmem:[#allocation35 + $0x8] sm:$0xff]  ;;  %v5944_v50 = vld [vmem:[#allocation35 + $0x10] sm:$0xff] }
 0x308   :  { %7358 = vst [vmem:[#allocation287_spill] sm:$0xff] %v5942_v53  ;;  %7359 = vst [vmem:[#allocation288_spill] sm:$0xff] %v5944_v50  ;;  %v5946_v51 = vld [vmem:[#allocation35 + $0x18] sm:$0xff]  ;;  %v5948_v62 = vld [vmem:[#allocation35 + $0x20] sm:$0xff] }
 0x309   :  { %7360 = vst [vmem:[#allocation289_spill] sm:$0xff] %v5946_v51  ;;  %7361 = vst [vmem:[#allocation290_spill] sm:$0xff] %v5948_v62  ;;  %v5950_v52 = vld [vmem:[#allocation35 + $0x28] sm:$0xff]  ;;  %v5952_v57 = vld [vmem:[#allocation35 + $0x30] sm:$0xff] }
 0x30a   :  { %7362 = vst [vmem:[#allocation291_spill] sm:$0xff] %v5950_v52  ;;  %7363 = vst [vmem:[#allocation292_spill] sm:$0xff] %v5952_v57  ;;  %v5954_v56 = vld [vmem:[#allocation35 + $0x38] sm:$0xff]  ;;  %v5956_v59 = vld [vmem:[#allocation35 + $0x40] sm:$0xff]  ;;  %v816_v57 = vshrl.u32 %v815_v55, 7 }
 0x30b   :  { %7364 = vst [vmem:[#allocation293_spill] sm:$0xff] %v5954_v56  ;;  %7365 = vst [vmem:[#allocation294_spill] sm:$0xff] %v5956_v59  ;;  %v5958_v60 = vld [vmem:[#allocation35 + $0x48] sm:$0xff]  ;;  %v5960_v61 = vld [vmem:[#allocation35 + $0x50] sm:$0xff] }
 0x30c   :  { %7366 = vst [vmem:[#allocation295_spill] sm:$0xff] %v5958_v60  ;;  %7367 = vst [vmem:[#allocation296_spill] sm:$0xff] %v5960_v61  ;;  %v5962_v58 = vld [vmem:[#allocation35 + $0x58] sm:$0xff]  ;;  %v5964_v50 = vld [vmem:[#allocation35 + $0x60] sm:$0xff]  ;;  %v825_v53 = vsub.s32 2, %v816_v57 }
 0x30d   :  { %7368 = vst [vmem:[#allocation297_spill] sm:$0xff] %v5962_v58  ;;  %7369 = vst [vmem:[#allocation298_spill] sm:$0xff] %v5964_v50  ;;  %v5966_v63 = vld [vmem:[#allocation35 + $0x68] sm:$0xff]  ;;  %v5968_v62 = vld [vmem:[#allocation35 + $0x70] sm:$0xff] }
 0x30e   :  { %7370 = vst [vmem:[#allocation299_spill] sm:$0xff] %v5966_v63  ;;  %7371 = vst [vmem:[#allocation300_spill] sm:$0xff] %v5968_v62  ;;  %v5970_v54 = vld [vmem:[#allocation35 + $0x78] sm:$0xff]  ;;  %v5972_v52 = vld [vmem:[#allocation35 + $0x80] sm:$0xff] }
 0x30f   :  { %7372 = vst [vmem:[#allocation301_spill] sm:$0xff] %v5970_v54  ;;  %7373 = vst [vmem:[#allocation302_spill] sm:$0xff] %v5972_v52  ;;  %v5974_v56 = vld [vmem:[#allocation35 + $0x88] sm:$0xff]  ;;  %v5976_v59 = vld [vmem:[#allocation35 + $0x90] sm:$0xff] }
 0x310   :  { %7374 = vst [vmem:[#allocation303_spill] sm:$0xff] %v5974_v56  ;;  %7375 = vst [vmem:[#allocation304_spill] sm:$0xff] %v5976_v59  ;;  %v5978_v60 = vld [vmem:[#allocation35 + $0x98] sm:$0xff]  ;;  %v5980_v61 = vld [vmem:[#allocation35 + $0xa0] sm:$0xff]  ;;  %v817_v59 = vsub.s32 0, %v816_v57 }
 0x311   :  { %7376 = vst [vmem:[#allocation305_spill] sm:$0xff] %v5978_v60  ;;  %7377 = vst [vmem:[#allocation306_spill] sm:$0xff] %v5980_v61  ;;  %v5982_v58 = vld [vmem:[#allocation35 + $0xa8] sm:$0xff]  ;;  %v5984_v50 = vld [vmem:[#allocation35 + $0xb0] sm:$0xff] }
 0x312   :  { %7378 = vst [vmem:[#allocation307_spill] sm:$0xff] %v5982_v58  ;;  %7379 = vst [vmem:[#allocation308_spill] sm:$0xff] %v5984_v50  ;;  %v5986_v63 = vld [vmem:[#allocation35 + $0xb8] sm:$0xff]  ;;  %v5988_v62 = vld [vmem:[#allocation35 + $0xc0] sm:$0xff]  ;;  %v821_v50 = vsub.s32 1, %v816_v57 }
 0x313   :  { %7380 = vst [vmem:[#allocation309_spill] sm:$0xff] %v5986_v63  ;;  %7381 = vst [vmem:[#allocation310_spill] sm:$0xff] %v5988_v62  ;;  %v5990_v54 = vld [vmem:[#allocation35 + $0xc8] sm:$0xff]  ;;  %v5992_v52 = vld [vmem:[#allocation35 + $0xd0] sm:$0xff]  ;;  %v829_v63 = vsub.s32 3, %v816_v57 }
 0x314   :  { %7382 = vst [vmem:[#allocation311_spill] sm:$0xff] %v5990_v54  ;;  %7383 = vst [vmem:[#allocation312_spill] sm:$0xff] %v5992_v52  ;;  %v5994_v55 = vld [vmem:[#allocation35 + $0xd8] sm:$0xff]  ;;  %v5996_v56 = vld [vmem:[#allocation35 + $0xe0] sm:$0xff] }
 0x315   :  { %7384 = vst [vmem:[#allocation313_spill] sm:$0xff] %v5994_v55  ;;  %7385 = vst [vmem:[#allocation314_spill] sm:$0xff] %v5996_v56  ;;  %v5998_v60 = vld [vmem:[#allocation35 + $0xe8] sm:$0xff]  ;;  %v6000_v61 = vld [vmem:[#allocation35 + $0xf0] sm:$0xff] }
 0x316   :  { %7386 = vst [vmem:[#allocation315_spill] sm:$0xff] %v5998_v60  ;;  %7387 = vst [vmem:[#allocation316_spill] sm:$0xff] %v6000_v61  ;;  %v6002_v58 = vld [vmem:[#allocation35 + $0xf8] sm:$0xff]  ;;  %v6004_v51 = vld [vmem:[#allocation11] ss:$0 sm:$0xff] }
 0x317   :  { %7388 = vst [vmem:[#allocation317_spill] sm:$0xff] %v6002_v58  ;;  %v6006_v62 = vld [vmem:[#allocation14] ss:$0 sm:$0xff]  ;;  %v6008_v54 = vld [vmem:[#allocation17] ss:$0 sm:$0xff] }
 0x318   :  { %7389 = vst [vmem:[#allocation318_spill] sm:$0xff] %v6006_v62  ;;  %7390 = vst [vmem:[#allocation319_spill] sm:$0xff] %v6008_v54  ;;  %v6010_v52 = vld [vmem:[#allocation20] ss:$0 sm:$0xff]  ;;  %v6012_v55 = vld [vmem:[#allocation23] ss:$0 sm:$0xff] }
 0x319   :  { %7391 = vst [vmem:[#allocation320_spill] sm:$0xff] %v6010_v52  ;;  %7392 = vst [vmem:[#allocation321_spill] sm:$0xff] %v6012_v55  ;;  %v6014_v56 = vld [vmem:[#allocation26] ss:$0 sm:$0xff]  ;;  %v813_v60 = vld [vmem:[#allocation32] sm:$0xf] }
 0x31a   :  { %7393 = vst [vmem:[#allocation322_spill] sm:$0xff] %v6014_v56  ;;  %v835_v48 = vld [vmem:[#allocation37] sm:$0xf]  ;;  %v6016_v61 = vld [vmem:[#allocation38] ss:$0 sm:$0xff]  ;;  %v6018_v58 = vrot.slane %v813_v60, %v817_v59  ;;  %v6020_v49 = vrot.slane %v813_v60, %v821_v50  ;;  %v6022_v57 = vrot.slane %v813_v60, %v825_v53  ;;  %v6024_v46 = vrot.slane %v813_v60, %v829_v63 }
 0x31b   :  { %7394 = vst [vmem:[#allocation323_spill] sm:$0xff] %v6016_v61  ;;  %v6026_v62 = vld [vmem:[#allocation40] ss:$0 sm:$0xff]  ;;  %v6028_v54 = vld [vmem:[#allocation41] ss:$0 sm:$0xff]  ;;  %v6032_v55 = vrot.slane %v835_v48, %v817_v59  ;;  %v6034_v56 = vrot.slane %v835_v48, %v821_v50  ;;  %v6036_v47 = vrot.slane %v835_v48, %v825_v53  ;;  %v6038_v61 = vrot.slane %v835_v48, %v829_v63 }
 0x31c   :  { %7395 = vst [vmem:[#allocation324_spill] sm:$0xff] %v6018_v58  ;;  %7396 = vst [vmem:[#allocation325_spill] sm:$0xff] %v6020_v49  ;;  %v6030_v52 = vld [vmem:[#allocation43] ss:$0 sm:$0xff]  ;;  %v6040_v58 = vld [vmem:[#allocation44] ss:$0 sm:$0xff] }
 0x31d   :  { %7397 = vst [vmem:[#allocation326_spill] sm:$0xff] %v6022_v57  ;;  %7398 = vst [vmem:[#allocation327_spill] sm:$0xff] %v6024_v46  ;;  %v6042_v49 = vld [vmem:[#allocation46] ss:$0 sm:$0xff]  ;;  %v6044_v60 = vld [vmem:[#allocation47] ss:$0 sm:$0xff] }
 0x31e   :  { %7399 = vst [vmem:[#allocation328_spill] sm:$0xff] %v6026_v62  ;;  %7400 = vst [vmem:[#allocation329_spill] sm:$0xff] %v6028_v54  ;;  %v6046_v57 = vld [vmem:[#allocation49] ss:$0 sm:$0xff]  ;;  %v3474_v46 = vld [vmem:[#allocation7] ss:$0 sm:$0xff]  }
 0x31f   :  { %7401 = vst [vmem:[#allocation330_spill] sm:$0xff] %v6040_v58  ;;  %7402 = vst [vmem:[#allocation331_spill] sm:$0xff] %v6042_v49  ;;  %v3475_v54 = vld [vmem:[#allocation8] ss:$0 sm:$0xff]   ;;  %v6048_v62 = vmov 0.0   ;;  %v6050_v59 = vmov 0.0  }
 0x320   :  { %7403 = vst [vmem:[#allocation332_spill] sm:$0xff] %v6044_v60  ;;  %7404 = vst [vmem:[#allocation333_spill] sm:$0xff] %v6046_v57  ;;  %v6052_v50 = vmov 0.0   ;;  %v7405_v53 = vmov %v3475_v54  ;;  %v7406_v48 = vmov %v3475_v54  ;;  %v6060_v63 = vmov 0.0  }
 0x321   :  { %v6062_v49 = vmov 0.0   ;;  %v7407_v57 = vmov %v3474_v46 }
 0x322 LB: > { %v7408_v1 = vld [vmem:[#allocation83_spill] sm:$0xff]  ;;  %v7409_v0 = vld [vmem:[#allocation82_spill] sm:$0xff]  ;;  %7410 = vst [vmem:[#allocation334_spill] sm:$0xff] %v5030_v63  ;;  %v7411_v3 = vld [vmem:[#allocation85_spill] sm:$0xff]  ;;  %v6949_v58 = vmov 0.0   ;;  %vm5117_vm0 = vmmov 0   ;;  %v5010_v59 = vphi %v6050_v59, %v6451_v59   ;;  %v5006_v62 = vphi %v6048_v62, %v6455_v62   ;;  %s5046_s12 = sphi %s6068_s12, %s932_s12   ;;  %v5042_v46 = vphi %v3474_v46, %v7722_v46   ;;  %v5038_v57 = vphi %v7407_v57, %v7721_v57   ;;  %v5034_v49 = vphi %v6062_v49, %v3286_v49   ;;  %v5030_v63 = vphi %v6060_v63, %v3287_v63   ;;  %v5026_v54 = vphi %v3475_v54, %v7720_v54   ;;  %v5022_v48 = vphi %v7406_v48, %v6432_v48   ;;  %v5018_v53 = vphi %v7405_v53, %v7719_v53   ;;  %v5014_v50 = vphi %v6052_v50, %v6446_v50  }
 0x323   : > { %v7412_v2 = vld [vmem:[#allocation84_spill] sm:$0xff]  ;;  %1217 = vxpose.xlu0.b32.start [1/2] (short) (narrow) %v7409_v0, 24  ;;  %3775 = vmatprep.subr.bf16.mxu0 %v6949_v58  ;;  %v7413_v5 = vld [vmem:[#allocation87_spill] sm:$0xff]  ;;  %v7414_v4 = vld [vmem:[#allocation86_spill] sm:$0xff]  ;;  %vm1249_vm1 = vcmask 130048   ;;  %vm2342_vm2 = vcmask 195584  }
 0x324   : > { %v3476_v60 = vcombine.low %v7412_v2, %v7411_v3  ;;  %v3477_v63 = vcombine.low %v7414_v4, %v7413_v5  ;;  %3795 = vmatprep.subr.bf16.mxu1 %v6949_v58  ;;  %3791 = vmatprep.mubr.msk.bf16.mxu0 %vm5117_vm0, %v6949_v58  ;;  %v7415_v19 = vld [vmem:[#allocation101_spill] sm:$0xff]  ;;  %v7416_v18 = vld [vmem:[#allocation100_spill] sm:$0xff]  ;;  %v6111_v3 = vpack.c.bf16 %v5042_v46, %v5038_v57  ;;  %v7417_v21 = vld [vmem:[#allocation103_spill] sm:$0xff]  ;;  %s932_s12 = sadd.s32 1, %s5046_s12  }
 0x325   : > { %v3484_v2 = vcombine.low %v7416_v18, %v7415_v19  ;;  %3811 = vmatprep.mubr.msk.bf16.mxu1 %vm5117_vm0, %v6949_v58  ;;  %v7418_v20 = vld [vmem:[#allocation102_spill] sm:$0xff]  ;;  %v7419_v7 = vld [vmem:[#allocation89_spill] sm:$0xff]  ;;  %v7420_v6 = vld [vmem:[#allocation88_spill] sm:$0xff]  ;;  %p929_p10 = scmp.ge.s32.totalorder %s932_s12, 4  }
 0x326   : > { %3776 = vmatpush3.bf16.msra.mxu0 %v3476_v60  ;;  %v3485_v60 = vcombine.low %v7418_v20, %v7417_v21  ;;  %v3478_v4 = vcombine.low %v7420_v6, %v7419_v7  ;;  %v7421_v23 = vld [vmem:[#allocation105_spill] sm:$0xff]  ;;  %v7422_v22 = vld [vmem:[#allocation104_spill] sm:$0xff]  ;;  %v7423_v9 = vld [vmem:[#allocation91_spill] sm:$0xff]  ;;  %vm5121_vm3 = vmmov (%p929_p10), 0   ;;  %s5123_s27 = smov (%p929_p10), [#allocation50]  }
 0x327   : > { %3777 = vmatprep.subr.bf16.mxu0 %v6949_v58  ;;  %3796 = vmatpush3.bf16.msra.mxu1 %v3484_v2  ;;  %v3486_v5 = vcombine.low %v7422_v22, %v7421_v23  ;;  %v7424_v8 = vld [vmem:[#allocation90_spill] sm:$0xff]  ;;  %v7425_v11 = vld [vmem:[#allocation93_spill] sm:$0xff]  ;;  %v7426_v10 = vld [vmem:[#allocation92_spill] sm:$0xff]  ;;  %s3370_s0 = sshll.u32 (%p929_p10), %s5123_s27, 4  ;;  %s3371_s0 = int_to_ptr.vmem [resolvable:$true] %s3370_s0 }
 0x328   : > { %1218 = vxpose.xlu0.b32.end [2/2] (short) (narrow) %v7408_v1, 24  ;;  %3797 = vmatprep.subr.bf16.mxu1 %v6949_v58  ;;  %v3479_v2 = vcombine.low %v7424_v8, %v7423_v9  ;;  %v3480_v6 = vcombine.low %v7426_v10, %v7425_v11  ;;  %v7427_v13 = vld [vmem:[#allocation95_spill] sm:$0xff]  ;;  %v7428_v12 = vld [vmem:[#allocation94_spill] sm:$0xff]  ;;  %v7429_v15 = vld [vmem:[#allocation97_spill] sm:$0xff]  ;;  %s4904_s30 = scalar_lea.vmem (%p929_p10), %s3371_s0, 32  ;;  %p4909_p12 = scmp.lt.s32.totalorder (%p929_p10), %s3371_s0, %s3371_s0 }
 0x329   : > { %v7430_v14 = vld [vmem:[#allocation96_spill] sm:$0xff]  ;;  %v7431_v17 = vld [vmem:[#allocation99_spill] sm:$0xff]  ;;  %v7432_v16 = vld [vmem:[#allocation98_spill] sm:$0xff]  ;;  %p4905_p11 = scmp.ne.s32.totalorder (%p929_p10), %s3371_s0, %s4904_s30  ;;  %p4910_p13 = scmp.lt.s32.totalorder (%p929_p10), %s4904_s30, %s4904_s30 }
 0x32a   : > { %3778 = vmatpush3.bf16.msra.mxu0 %v3477_v63  ;;  %v3487_v63 = vcombine.low %v5536_v24, %v5538_v25  ;;  %v7434_v11 = vld [vmem:[#allocation106_spill] sm:$0xff] }
 0x32b   : > { %3779 = vmatprep.subr.bf16.mxu0 %v6949_v58  ;;  %3798 = vmatpush3.bf16.msra.mxu1 %v3485_v60  ;;  %v3481_v60 = vcombine.low %v7428_v12, %v7427_v13  ;;  %v7435_v12 = vld [vmem:[#allocation109_spill] sm:$0xff]  ;;  %p4911_p0 = por (%p929_p10), %p4910_p13, %p4909_p12 }
 0x32c   : > { %3799 = vmatprep.subr.bf16.mxu1 %v6949_v58 }
 0x32d   :  { %p4912_p1 = pnand (%p929_p10), %p4911_p0, %p4905_p11 }
 0x32e   : > { %3780 = vmatpush3.bf16.msra.mxu0 %v3478_v4  ;;  %v3488_v4 = vcombine.low %v5540_v26, %v5542_v27 }
 0x32f   : > { %3781 = vmatprep.subr.bf16.mxu0 %v6949_v58  ;;  %3800 = vmatpush3.bf16.msra.mxu1 %v3486_v5  ;;  %v3489_v5 = vcombine.low %v5544_v28, %v5546_v29 }
 0x330   : > { %3801 = vmatprep.subr.bf16.mxu1 %v6949_v58 }
 0x332   : > { %3782 = vmatpush3.bf16.msra.mxu0 %v3479_v2  ;;  %v3482_v2 = vcombine.low %v7430_v14, %v7429_v15 }
 0x333   : > { %3783 = vmatprep.subr.bf16.mxu0 %v6949_v58  ;;  %3802 = vmatpush3.bf16.msra.mxu1 %v3487_v63  ;;  %v6150_v63 = vpack.c.bf16 %v5038_v57, %v5042_v46  ;;  %v3492_v46 = vcombine.low %v5556_v34, %v5558_v35  ;;  %v3493_v57 = vcombine.low %v5560_v36, %v5562_v37 }
 0x334   : > { %3803 = vmatprep.subr.bf16.mxu1 %v6949_v58 }
 0x336   : > { %3784 = vmatpush3.bf16.msra.mxu0 %v3480_v6  ;;  %v3483_v6 = vcombine.low %v7432_v16, %v7431_v17 }
 0x337   : > { %3785 = vmatprep.subr.bf16.mxu0 %v6949_v58  ;;  %3804 = vmatpush3.bf16.msra.mxu1 %v3488_v4  ;;  %v3490_v4 = vcombine.low %v5548_v30, %v5550_v31 }
 0x338   : > { %3805 = vmatprep.subr.bf16.mxu1 %v6949_v58 }
 0x33a   : > { %3786 = vmatpush3.bf16.msra.mxu0 %v3481_v60  ;;  %v3491_v60 = vcombine.low %v5552_v32, %v5554_v33 }
 0x33b   : > { %3787 = vmatprep.subr.bf16.mxu0 %v6949_v58  ;;  %3806 = vmatpush3.bf16.msra.mxu1 %v3489_v5  ;;  %v3494_v5 = vcombine.low %v5564_v38, %v5566_v39 }
 0x33c   : > { %3807 = vmatprep.subr.bf16.mxu1 %v6949_v58 }
 0x33e   : > { %3788 = vmatpush3.bf16.msra.mxu0 %v3482_v2  ;;  %v3495_v2 = vcombine.low %v5568_v40, %v5570_v41 }
 0x33f   : > { %3789 = vmatprep.subr.bf16.mxu0 %v6949_v58  ;;  %3808 = vmatpush3.bf16.msra.mxu1 %v3490_v4  ;;  %v3497_v4 = vcombine.low %v5576_v44, %v5578_v45 }
 0x340   : > { %3809 = vmatprep.subr.bf16.mxu1 %v6949_v58 }
 0x342   : > { %3790 = vmatpush3.bf16.msra.mxu0 %v3483_v6  ;;  %v3496_v6 = vcombine.low %v5572_v42, %v5574_v43 }
 0x343   : > { %3815 = vmatprep.subr.bf16.mxu0 %v6949_v58  ;;  %3810 = vmatpush3.bf16.msra.mxu1 %v3491_v60 }
 0x345   : > { %3792 = vmatmul.mubr.bf16.vlgmr.msra.gmra.mrb[0].mxu0 %v6150_v63 }
 0x346   : > { %3831 = vmatprep.mubr.msk.bf16.mxu0 %vm5117_vm0, %v6949_v58  ;;  %3816 = vmatpush3.bf16.msra.mxu0 %v3492_v46 }
 0x347   : > { %3817 = vmatprep.subr.bf16.mxu0 %v6949_v58 }
 0x34a   : > { %3818 = vmatpush3.bf16.msra.mxu0 %v3493_v57 }
 0x34b   : > { %3819 = vmatprep.subr.bf16.mxu0 %v6949_v58 }
 0x34e   : > { %3820 = vmatpush3.bf16.msra.mxu0 %v3494_v5 }
 0x34f   : > { %3821 = vmatprep.subr.bf16.mxu0 %v6949_v58 }
 0x352   : > { %3822 = vmatpush3.bf16.msra.mxu0 %v3495_v2 }
 0x353   : > { %3823 = vmatprep.subr.bf16.mxu0 %v6949_v58 }
 0x356   : > { %3824 = vmatpush3.bf16.msra.mxu0 %v3496_v6  ;;  %v7433_v6 = vld [vmem:[#allocation107_spill] sm:$0xff] }
 0x357   : > { %3825 = vmatprep.subr.bf16.mxu0 %v6949_v58 }
 0x35a   : > { %3826 = vmatpush3.bf16.msra.mxu0 %v3497_v4  ;;  %v3498_v4 = vcombine.low %v7434_v11, %v7433_v6  ;;  %v5118_v11 = vmov 0.0|0.0   ;;  %v7438_v6 = vld [vmem:[#allocation289_spill] sm:$0xff] }
 0x35b   : > { %3827 = vmatprep.subr.bf16.mxu0 %v6949_v58  ;;  %3924 = vmatprep.subr.bf16.mxu1 %v5118_v11  ;;  %v7447_v11 = vld [vmem:[#allocation305_spill] sm:$0xff] }
 0x35e   : > { %3828 = vmatpush3.bf16.msra.mxu0 %v3498_v4  ;;  %v7439_v4 = vld [vmem:[#allocation287_spill] sm:$0xff] }
 0x35f   : > { %3829 = vmatprep.subr.bf16.mxu0 %v6949_v58 }
 0x418   : > { %v1026_v60 = vpop.f32.mrb[0].mxu0 }
 0x419   : > { %v1027_v46 = vadd.f32 %v6004_v51, %v1026_v60  ;;  %v3793_v57 = vpop.f32.mrb[1].mxu0  ;;  %v7436_v60 = vld [vmem:[#allocation108_spill] sm:$0xff] }
 0x41a   : > { %v1029_v5 = vpop.f32.mrb[2].mxu0  ;;  %v3499_v57 = vcombine.low %v7436_v60, %v7435_v12  ;;  %v3505_v12 = vcombine.low %v7439_v4, %v7438_v6  ;;  %v7440_v60 = vld [vmem:[#allocation293_spill] sm:$0xff] }
 0x41b   : > { %v1030_v2 = vadd.f32 %v6004_v51, %v1029_v5  ;;  %v3794_v7 = vpop.f32.mrb[3].mxu0  ;;  %v1033_v8 = vmax.f32 %v1027_v46, 0.0  ;;  %v7437_v5 = vld [vmem:[#allocation318_spill] sm:$0xff] }
 0x41c   : > { %3830 = vmatpush3.bf16.msra.mxu0 %v3499_v57  ;;  %v7441_v57 = vld [vmem:[#allocation291_spill] sm:$0xff] }
 0x41d   : > { %v1034_v9 = vmax.f32 %v1030_v2, 0.0  ;;  %v7442_v16 = vmov %v7441_v57 }
 0x41f   : > { %v1035_v10 = vpack.c.bf16 %v1034_v9, %v1033_v8 }
 0x421   : > { %3812 = vmatmul.mubr.bf16.vlgmr.msra.gmra.mrb[0].mxu1 %v1035_v10 }
 0x422   : > { %3839 = vmatprep.mubr.msk.f32.mxu1 %vm5117_vm0, %v6949_v58  ;;  %v3506_v58 = vcombine.high %v7439_v4, %v7438_v6 }
 0x424   : > { %1554 = vmatprep.subr.bf16.mxu0 %v3506_v58 }
 0x4f4   : > { %v1118_v13 = vpop.f32.mrb[0].mxu1 }
 0x4f5   : > { %v1119_v7 = vadd.f32 %v7437_v5, %v1118_v13  ;;  %v3813_v46 = vpop.f32.mrb[1].mxu1  ;;  %v3510_v13 = vcombine.high %v7441_v57, %v7440_v60 }
 0x4f6   : > { %v1121_v2 = vpop.f32.mrb[2].mxu1  ;;  %v3509_v46 = vcombine.low %v7442_v16, %v7440_v60  ;;  %v1233_v16 = vpop.trf.xlu0 }
 0x4f7   : > { %v1122_v8 = vadd.f32 %v7437_v5, %v1121_v2  ;;  %v3814_v9 = vpop.f32.mrb[3].mxu1  ;;  %v1125_v10 = vmax.f32 %v1119_v7, 0.0  ;;  %v7443_v7 = vld [vmem:[#allocation297_spill] sm:$0xff]  ;;  %v7451_v5 = vld [vmem:[#allocation307_spill] sm:$0xff] }
 0x4f8   : > { %v7446_v9 = vld [vmem:[#allocation299_spill] sm:$0xff] }
 0x4f9   : > { %v1126_v14 = vmax.f32 %v1122_v8, 0.0  ;;  %v7445_v8 = vld [vmem:[#allocation301_spill] sm:$0xff] }
 0x4fa   : > { %v3517_v58 = vcombine.low %v7446_v9, %v7445_v8 }
 0x4fb   : > { %v1127_v15 = vpack.c.bf16 %v1126_v14, %v1125_v10  ;;  %v7444_v14 = vld [vmem:[#allocation295_spill] sm:$0xff]  ;;  %v3518_v10 = vcombine.high %v7446_v9, %v7445_v8 }
 0x4fc   : > { %v3513_v2 = vcombine.low %v7444_v14, %v7443_v7 }
 0x4fd   : > { %3832 = vmatmul.mubr.bf16.vlgmr.msra.gmra.mrb[4].mxu0 %v1127_v15  ;;  %v3514_v15 = vcombine.high %v7444_v14, %v7443_v7  ;;  %v7453_v7 = vld [vmem:[#allocation311_spill] sm:$0xff]  ;;  %v6227_v14 = vpack.c.bf16 %v5022_v48, %v5026_v54 }
 0x4fe   : > { %1555 = vmatpush1.bf16.msra.mxu0 %v3505_v12  ;;  %v7448_v12 = vld [vmem:[#allocation303_spill] sm:$0xff] }
 0x4ff   : > { %1556 = vmatprep.subr.bf16.mxu0 %v3510_v13  ;;  %v3522_v57 = vcombine.high %v7448_v12, %v7447_v11  ;;  %v3521_v13 = vcombine.low %v7448_v12, %v7447_v11  ;;  %v7456_v11 = vld [vmem:[#allocation315_spill] sm:$0xff] }
 0x500   : > { %v7465_v54 = vld [vmem:[#allocation263_spill] sm:$0xff] }
 0x502   : > { %1557 = vmatpush1.bf16.msra.mxu0 %v3509_v46  ;;  %v7449_v46 = vld [vmem:[#allocation309_spill] sm:$0xff] }
 0x503   : > { %1558 = vmatprep.subr.bf16.mxu0 %v3514_v15  ;;  %v7450_v4 = vmov %v7449_v46  ;;  %v3526_v6 = vcombine.high %v7451_v5, %v7449_v46  ;;  %v7458_v46 = vld [vmem:[#allocation255_spill] sm:$0xff] }
 0x504   : > { %v3525_v15 = vcombine.low %v7451_v5, %v7450_v4  ;;  %v7459_v4 = vmov %v7458_v46 }
 0x506   : > { %1559 = vmatpush1.bf16.msra.mxu0 %v3513_v2  ;;  %v7452_v2 = vld [vmem:[#allocation313_spill] sm:$0xff] }
 0x507   : > { %1560 = vmatprep.subr.bf16.mxu0 %v3518_v10  ;;  %v3530_v8 = vcombine.high %v7453_v7, %v7452_v2  ;;  %v6962_v10 = vmov 0  }
 0x508   : > { %1586 = vmatprep.mubr.bf16.mxu0 %v6962_v10  ;;  %v7461_v10 = vld [vmem:[#allocation259_spill] sm:$0xff] }
 0x50a   : > { %1561 = vmatpush1.bf16.msra.mxu0 %v3517_v58  ;;  %v3529_v58 = vcombine.low %v7453_v7, %v7452_v2  ;;  %v7466_v7 = vmov %v7465_v54 }
 0x50b   : > { %1562 = vmatprep.subr.bf16.mxu0 %v3522_v57  ;;  %v7454_v57 = vld [vmem:[#allocation317_spill] sm:$0xff] }
 0x50c   : > { %v7455_v9 = vmov %v7454_v57  ;;  %v3534_v12 = vcombine.high %v7456_v11, %v7454_v57 }
 0x50e   : > { %1563 = vmatpush1.bf16.msra.mxu0 %v3521_v13  ;;  %v3533_v13 = vcombine.low %v7456_v11, %v7455_v9  ;;  %v7470_v9 = vld [vmem:[#allocation271_spill] sm:$0xff]  ;;  %v7478_v11 = vld [vmem:[#allocation288_spill] sm:$0xff] }
 0x50f   : > { %1564 = vmatprep.subr.bf16.mxu0 %v3526_v6  ;;  %v7457_v6 = vld [vmem:[#allocation257_spill] sm:$0xff] }
 0x510   : > { %v3538_v5 = vcombine.high %v7458_v46, %v7457_v6  ;;  %v7463_v46 = vld [vmem:[#allocation265_spill] sm:$0xff] }
 0x511   : > { %v7464_v2 = vmov %v7463_v46  ;;  %v3546_v48 = vcombine.high %v7465_v54, %v7463_v46  ;;  %v7471_v46 = vld [vmem:[#allocation277_spill] sm:$0xff]  ;;  %v7473_v54 = vld [vmem:[#allocation275_spill] sm:$0xff] }
 0x512   : > { %1565 = vmatpush1.bf16.msra.mxu0 %v3525_v15  ;;  %v3537_v15 = vcombine.low %v7459_v4, %v7457_v6  ;;  %v7468_v4 = vld [vmem:[#allocation267_spill] sm:$0xff] }
 0x513   : > { %1566 = vmatprep.subr.bf16.mxu0 %v3530_v8  ;;  %v7460_v8 = vld [vmem:[#allocation261_spill] sm:$0xff] }
 0x514   : > { %v3542_v57 = vcombine.high %v7461_v10, %v7460_v8 }
 0x516   : > { %1567 = vmatpush1.bf16.msra.mxu0 %v3529_v58  ;;  %v7462_v58 = vmov 0  }
 0x517   : > { %1568 = vmatprep.subr.bf16.mxu0 %v3534_v12  ;;  %v3541_v12 = vcombine.low %v7461_v10, %v7460_v8  ;;  %v7469_v8 = vld [vmem:[#allocation273_spill] sm:$0xff] }
 0x518   : > { %v3554_v10 = vcombine.high %v7470_v9, %v7469_v8 }
 0x51a   : > { %1569 = vmatpush1.bf16.msra.mxu0 %v3533_v13  ;;  %v3545_v13 = vcombine.low %v7466_v7, %v7464_v2  ;;  %v7472_v2 = vmov %v7471_v46  ;;  %v7474_v7 = vmov %v7473_v54 }
 0x51b   : > { %1816 = vmatprep.subr.bf16.mxu0 %v3538_v5  ;;  %v7467_v5 = vld [vmem:[#allocation269_spill] sm:$0xff] }
 0x51c   : > { %v3550_v6 = vcombine.high %v7468_v4, %v7467_v5 }
 0x51d   : > { %1587 = vmatmul.mubr.bf16.vlgmr.msra.gmra.mrb[8].mxu0 %v6227_v14 }
 0x51e   : > { %1817 = vmatpush1.bf16.msra.mxu0 %v3537_v15  ;;  %1596 = vmatprep.mubr.bf16.mxu0 %v7462_v58  ;;  %v3549_v15 = vcombine.low %v7468_v4, %v7467_v5  ;;  %v7477_v5 = vld [vmem:[#allocation319_spill] sm:$0xff] }
 0x51f   : > { %1818 = vmatprep.subr.bf16.mxu0 %v3542_v57  ;;  %v3553_v57 = vcombine.low %v7470_v9, %v7469_v8 }
 0x522   : > { %1819 = vmatpush1.bf16.msra.mxu0 %v3541_v12  ;;  %v6251_v12 = vpack.c.bf16 %v5018_v53, %v5018_v53 }
 0x523   : > { %1820 = vmatprep.subr.bf16.mxu0 %v3546_v48  ;;  %v3558_v48 = vcombine.high %v7473_v54, %v7471_v46 }
 0x525   : > { %1597 = vmatmul.mubr.bf16.gmra.mrb[12].mxu0 %v6251_v12 }
 0x526   : > { %1821 = vmatpush1.bf16.msra.mxu0 %v3545_v13  ;;  %1848 = vmatprep.mubr.bf16.mxu0 %v7462_v58  ;;  %v7475_v13 = vld [vmem:[#allocation281_spill] sm:$0xff] }
 0x527   : > { %1822 = vmatprep.subr.bf16.mxu0 %v3550_v6  ;;  %v3557_v6 = vcombine.low %v7474_v7, %v7472_v2  ;;  %v7479_v2 = vld [vmem:[#allocation286_spill] sm:$0xff] }
 0x52a   : > { %1823 = vmatpush1.bf16.msra.mxu0 %v3549_v15  ;;  %v7476_v15 = vld [vmem:[#allocation279_spill] sm:$0xff] }
 0x52b   : > { %1824 = vmatprep.subr.bf16.mxu0 %v3554_v10  ;;  %v3562_v4 = vcombine.high %v7476_v15, %v7475_v13  ;;  %v3561_v53 = vcombine.low %v7476_v15, %v7475_v13  ;;  %v7483_v15 = vmov 0.0  }
 0x52e   : > { %1825 = vmatpush1.bf16.msra.mxu0 %v3553_v57 }
 0x52f   : > { %1826 = vmatprep.subr.bf16.mxu0 %v3558_v48  ;;  %v3504_v48 = vcombine.high %v7479_v2, %v7478_v11 }
 0x532   : > { %1827 = vmatpush1.bf16.msra.mxu0 %v3557_v6  ;;  %v3503_v6 = vcombine.low %v7479_v2, %v7478_v11  ;;  %v7498_v11 = vld [vmem:[#allocation314_spill] sm:$0xff] }
 0x533   : > { %1828 = vmatprep.subr.bf16.mxu0 %v3562_v4  ;;  %v7480_v4 = vld [vmem:[#allocation292_spill] sm:$0xff] }
 0x536   : > { %1829 = vmatpush1.bf16.msra.mxu0 %v3561_v53  ;;  %v7481_v53 = vld [vmem:[#allocation290_spill] sm:$0xff] }
 0x537   : > { %v7482_v13 = vmov %v7481_v53 }
 0x5d0   : > { %v1210_v10 = vpop.f32.mrb[4].mxu0 }
 0x5d1   : > { %v3833_v46 = vpop.f32.mrb[5].mxu0  ;;  %v1211_v8 = vadd.f32 %v7477_v5, %v1210_v10  ;;  %v1234_v10 = vpop.trf.xlu0 }
 0x5d2   : > { %v1213_v54 = vpop.f32.mrb[6].mxu0  ;;  %v3508_v46 = vcombine.high %v7481_v53, %v7480_v4 }
 0x5d3   : > { %v1214_v57 = vadd.f32 %v7477_v5, %v1213_v54  ;;  %v3834_v9 = vpop.f32.mrb[7].mxu0 }
 0x5d4   : > { %v3507_v9 = vcombine.low %v7482_v13, %v7480_v4  ;;  %v7490_v4 = vld [vmem:[#allocation302_spill] sm:$0xff] }
 0x5d5   : > { %v3925_v7 = vpack.c.bf16 %v1214_v57, %v1211_v8  ;;  %v7485_v8 = vld [vmem:[#allocation294_spill] sm:$0xff]  ;;  %v1235_v57 = vpop.trf.xlu0 }
 0x5d6   : > { %v7504_v13 = vld [vmem:[#allocation258_spill] sm:$0xff] }
 0x5d7   : > { %3926 = vmatpush3.bf16.msra.mxu1 %v3925_v7  ;;  %v7484_v7 = vld [vmem:[#allocation296_spill] sm:$0xff] }
 0x5d8   : > { %1503 = vmatprep.subr.bf16.mxu1 %v3504_v48  ;;  %v3512_v54 = vcombine.high %v7485_v8, %v7484_v7  ;;  %v7486_v48 = vld [vmem:[#allocation300_spill] sm:$0xff] }
 0x5d9   : > { %v7487_v2 = vmov %v7486_v48 }
 0x5da   : > { %3840 = vmatmul.mubr.msk.f32.vlgmr.msra.gmra.mrb[4].mxu1 %vm1249_vm1, %v1233_v16  ;;  %v3511_v16 = vcombine.low %v7485_v8, %v7484_v7  ;;  %v7493_v7 = vld [vmem:[#allocation306_spill] sm:$0xff] }
 0x5db   : > { %3842 = vmatprep.mubr.msk.f32.mxu1 %vm5117_vm0, %v7483_v15  ;;  %1504 = vmatpush1.bf16.msra.mxu1 %v3503_v6  ;;  %v7488_v6 = vld [vmem:[#allocation298_spill] sm:$0xff] }
 0x5dc   : > { %1505 = vmatprep.subr.bf16.mxu1 %v3508_v46  ;;  %v3516_v53 = vcombine.high %v7488_v6, %v7486_v48  ;;  %v3515_v46 = vcombine.low %v7488_v6, %v7487_v2  ;;  %v7495_v2 = vld [vmem:[#allocation310_spill] sm:$0xff] }
 0x5de   : > { %3843 = vmatmul.mubr.msk.f32.gmra.mrb[6].mxu1 %vm1249_vm1, %v1234_v10  ;;  %v7489_v10 = vld [vmem:[#allocation304_spill] sm:$0xff] }
 0x5df   : > { %3845 = vmatprep.mubr.msk.f32.mxu1 %vm5117_vm0, %v7483_v15  ;;  %1506 = vmatpush1.bf16.msra.mxu1 %v3507_v9  ;;  %v3520_v15 = vcombine.high %v7490_v4, %v7489_v10  ;;  %v3519_v9 = vcombine.low %v7490_v4, %v7489_v10 }
 0x5e0   : > { %1507 = vmatprep.subr.bf16.mxu1 %v3512_v54  ;;  %v7491_v54 = vld [vmem:[#allocation308_spill] sm:$0xff] }
 0x5e1   : > { %v7492_v5 = vmov %v7491_v54  ;;  %v3524_v48 = vcombine.high %v7493_v7, %v7491_v54  ;;  %v7500_v54 = vld [vmem:[#allocation254_spill] sm:$0xff] }
 0x5e2   : > { %3846 = vmatmul.mubr.msk.f32.gmra.mrb[8].mxu1 %vm1249_vm1, %v1235_v57  ;;  %v3523_v57 = vcombine.low %v7493_v7, %v7492_v5  ;;  %v7501_v10 = vmov %v7500_v54 }
 0x5e3   : > { %1508 = vmatpush1.bf16.msra.mxu1 %v3511_v16  ;;  %1535 = vmatprep.mubr.bf16.mxu1 %v7462_v58  ;;  %v7494_v16 = vld [vmem:[#allocation312_spill] sm:$0xff] }
 0x5e4   : > { %1509 = vmatprep.subr.bf16.mxu1 %v3516_v53  ;;  %v3528_v6 = vcombine.high %v7495_v2, %v7494_v16  ;;  %v3527_v53 = vcombine.low %v7495_v2, %v7494_v16 }
 0x5e7   : > { %1510 = vmatpush1.bf16.msra.mxu1 %v3515_v46  ;;  %v7496_v46 = vld [vmem:[#allocation316_spill] sm:$0xff] }
 0x5e8   : > { %1511 = vmatprep.subr.bf16.mxu1 %v3520_v15  ;;  %v7497_v8 = vmov %v7496_v46  ;;  %v3532_v4 = vcombine.high %v7498_v11, %v7496_v46 }
 0x5e9   : > { %v3531_v15 = vcombine.low %v7498_v11, %v7497_v8 }
 0x5eb   : > { %1512 = vmatpush1.bf16.msra.mxu1 %v3519_v9  ;;  %v7499_v9 = vld [vmem:[#allocation256_spill] sm:$0xff] }
 0x5ec   : > { %1513 = vmatprep.subr.bf16.mxu1 %v3524_v48  ;;  %v3536_v5 = vcombine.high %v7500_v54, %v7499_v9  ;;  %v3535_v48 = vcombine.low %v7501_v10, %v7499_v9  ;;  %v7509_v54 = vld [vmem:[#allocation266_spill] sm:$0xff]  ;;  %v7523_v10 = vld [vmem:[#allocation283_spill] sm:$0xff] }
 0x5ed   : > { %v7510_v9 = vmov %v7509_v54 }
 0x5ef   : > { %1514 = vmatpush1.bf16.msra.mxu1 %v3523_v57  ;;  %v7502_v57 = vld [vmem:[#allocation260_spill] sm:$0xff] }
 0x5f0   : > { %1515 = vmatprep.subr.bf16.mxu1 %v3528_v6  ;;  %v7503_v7 = vmov %v7502_v57  ;;  %v3540_v2 = vcombine.high %v7504_v13, %v7502_v57 }
 0x5f1   : > { %v3539_v6 = vcombine.low %v7504_v13, %v7503_v7 }
 0x5f3   : > { %1516 = vmatpush1.bf16.msra.mxu1 %v3527_v53  ;;  %v7506_v53 = vld [vmem:[#allocation262_spill] sm:$0xff] }
 0x5f4   : > { %1517 = vmatprep.subr.bf16.mxu1 %v3532_v4  ;;  %v7505_v4 = vld [vmem:[#allocation264_spill] sm:$0xff]  ;;  %v7507_v8 = vmov %v7506_v53 }
 0x5f5   : > { %v3544_v46 = vcombine.high %v7506_v53, %v7505_v4 }
 0x5f7   : > { %1518 = vmatpush1.bf16.msra.mxu1 %v3531_v15  ;;  %v3543_v15 = vcombine.low %v7507_v8, %v7505_v4  ;;  %v7516_v8 = vld [vmem:[#allocation274_spill] sm:$0xff] }
 0x5f8   : > { %1765 = vmatprep.subr.bf16.mxu1 %v3536_v5  ;;  %v7508_v5 = vld [vmem:[#allocation268_spill] sm:$0xff] }
 0x5f9   : > { %v3548_v57 = vcombine.high %v7509_v54, %v7508_v5 }
 0x5fa   : > { %1536 = vmatmul.mubr.bf16.vlgmr.msra.gmra.mrb[12].mxu1 %v6227_v14  ;;  %v3547_v14 = vcombine.low %v7510_v9, %v7508_v5  ;;  %v7518_v5 = vld [vmem:[#allocation278_spill] sm:$0xff] }
 0x5fb   : > { %1766 = vmatpush1.bf16.msra.mxu1 %v3535_v48  ;;  %1545 = vmatprep.mubr.bf16.mxu1 %v7462_v58  ;;  %v7512_v48 = vld [vmem:[#allocation270_spill] sm:$0xff] }
 0x5fc   : > { %1767 = vmatprep.subr.bf16.mxu1 %v3540_v2  ;;  %v7511_v2 = vld [vmem:[#allocation272_spill] sm:$0xff]  ;;  %v7513_v7 = vmov %v7512_v48 }
 0x5fd   : > { %v3552_v53 = vcombine.high %v7512_v48, %v7511_v2  ;;  %v7520_v48 = vld [vmem:[#allocation282_spill] sm:$0xff] }
 0x5ff   : > { %1768 = vmatpush1.bf16.msra.mxu1 %v3539_v6  ;;  %v3551_v6 = vcombine.low %v7513_v7, %v7511_v2  ;;  %v7521_v2 = vmov %v7520_v48  ;;  %v7522_v7 = vld [vmem:[#allocation285_spill] sm:$0xff] }
 0x600   : > { %1769 = vmatprep.subr.bf16.mxu1 %v3544_v46  ;;  %v7514_v46 = vld [vmem:[#allocation276_spill] sm:$0xff] }
 0x601   : > { %v7515_v4 = vmov %v7514_v46  ;;  %v3556_v54 = vcombine.high %v7516_v8, %v7514_v46  ;;  %v3566_v46 = vcombine.high %v7523_v10, %v7522_v7 }
 0x602   : > { %1546 = vmatmul.mubr.bf16.gmra.mrb[16].mxu1 %v6251_v12  ;;  %v3555_v12 = vcombine.low %v7516_v8, %v7515_v4 }
 0x603   : > { %1770 = vmatpush1.bf16.msra.mxu1 %v3543_v15  ;;  %1797 = vmatprep.mubr.bf16.mxu1 %v7462_v58  ;;  %v7517_v15 = vld [vmem:[#allocation280_spill] sm:$0xff] }
 0x604   : > { %1771 = vmatprep.subr.bf16.mxu1 %v3548_v57  ;;  %v3560_v9 = vcombine.high %v7518_v5, %v7517_v15  ;;  %v3559_v57 = vcombine.low %v7518_v5, %v7517_v15  ;;  %1830 = vmatprep.subr.bf16.mxu0 %v3566_v46 }
 0x607   : > { %1772 = vmatpush1.bf16.msra.mxu1 %v3547_v14  ;;  %v7519_v14 = vld [vmem:[#allocation284_spill] sm:$0xff] }
 0x608   : > { %1773 = vmatprep.subr.bf16.mxu1 %v3552_v53  ;;  %v3564_v53 = vcombine.high %v7520_v48, %v7519_v14 }
 0x60b   : > { %1774 = vmatpush1.bf16.msra.mxu1 %v3551_v6  ;;  %v3563_v6 = vcombine.low %v7521_v2, %v7519_v14 }
 0x60c   : > { %1775 = vmatprep.subr.bf16.mxu1 %v3556_v54  ;;  %v3565_v54 = vcombine.low %v7523_v10, %v7522_v7 }
 0x60e   : > { %1831 = vmatpush1.bf16.msra.mxu0 %v3565_v54 }
 0x60f   : > { %1776 = vmatpush1.bf16.msra.mxu1 %v3555_v12  ;;  %v1598_v12 = vpop.f32.mrb[12].mxu0 }
 0x610   : > { %1777 = vmatprep.subr.bf16.mxu1 %v3560_v9  ;;  %v1600_v4 = vpop.f32.mrb[13].mxu0 }
 0x611   : > { %v1602_v9 = vpop.f32.mrb[14].mxu0 }
 0x613   : > { %1778 = vmatpush1.bf16.msra.mxu1 %v3559_v57  ;;  %v1603_v57 = vpop.f32.mrb[15].mxu0 }
 0x614   : > { %1779 = vmatprep.subr.bf16.mxu1 %v3564_v53 }
 0x617   : > { %1780 = vmatpush1.bf16.msra.mxu1 %v3563_v6 }
 0x6ad   : > { %v1325_v5 = vpop.f32.mrb[4].mxu1 }
 0x6ae   : > { %v3841_v8 = vpop.f32.mrb[5].mxu1 }
 0x6b1   : > { %v1330_v48 = vpop.f32.mrb[6].mxu1 }
 0x6b2   : > { %v1339_v11 = vpack.c.bf16 %v1330_v48, %v1325_v5  ;;  %v3844_v13 = vpop.f32.mrb[7].mxu1 }
 0x6b4   : > { %1798 = vmatmul.mubr.bf16.vlgmr.msra.gmra.mrb[12].mxu1 %v1339_v11  ;;  %1849 = vmatmul.mubr.bf16.vlgmr.msra.gmra.mrb[8].mxu0 %v1339_v11 }
 0x6b5   : > { %v1335_v15 = vpop.f32.mrb[8].mxu1  ;;  %1807 = vmatprep.mubr.bf16.mxu1 %v7462_v58  ;;  %1858 = vmatprep.mubr.bf16.mxu0 %v7462_v58 }
 0x6b6   : > { %v3847_v53 = vpop.f32.mrb[9].mxu1  ;;  %v1340_v46 = vpack.c.bf16 %v1335_v15, %v1335_v15 }
 0x6bc   : > { %1808 = vmatmul.mubr.bf16.gmra.mrb[20].mxu1 %v1340_v46  ;;  %1859 = vmatmul.mubr.bf16.gmra.mrb[16].mxu0 %v1340_v46 }
 0x6d5   : > { %v1547_v6 = vpop.f32.mrb[16].mxu1 }
 0x6d6   : > { %v1549_v54 = vpop.f32.mrb[17].mxu1 }
 0x6d7   : > { %v1551_v9 = vpop.f32.mrb[18].mxu1 }
 0x6d8   : > { %v1552_v57 = vpop.f32.mrb[19].mxu1 }
 0x787   : > { %v1799_v2 = vpop.f32.mrb[12].mxu1  ;;  %v1850_v8 = vpop.f32.mrb[8].mxu0 }
 0x788   : > { %v1867_v5 = vadd.f32 %v1799_v2, %v6032_v55  ;;  %v1801_v13 = vpop.f32.mrb[13].mxu1  ;;  %v1852_v48 = vpop.f32.mrb[9].mxu0 }
 0x789   : > { %v1868_v11 = vadd.f32 %v1801_v13, %v6034_v56  ;;  %v1803_v7 = vpop.f32.mrb[14].mxu1  ;;  %v1854_v10 = vpop.f32.mrb[10].mxu0  ;;  %v1870_v57 = vadd.f32 %v1852_v48, %v6038_v61  ;;  %v1869_v13 = vadd.f32 %v1850_v8, %v6036_v47 }
 0x78a   : > { %v3567_v14 = vmul.f32 -1.442695, %v1867_v5  ;;  %v1871_v53 = vadd.f32 %v1803_v7, %v6032_v55  ;;  %v1805_v15 = vpop.f32.mrb[15].mxu1  ;;  %v1856_v16 = vpop.f32.mrb[11].mxu0 }
 0x78b   : > { %v3570_v46 = vmul.f32 -1.442695, %v1868_v11  ;;  %v1872_v17 = vadd.f32 %v1805_v15, %v6034_v56  ;;  %v3573_v22 = vmul.f32 -1.442695, %v1870_v57 }
 0x78c   : > { %4122 = vpow2.f32 %v3567_v14  ;;  %v3568_v9 = vmul.f32 -1.442695, %v1871_v53 }
 0x78d   : > { %4124 = vpow2.f32 %v3570_v46  ;;  %v3571_v2 = vmul.f32 -1.442695, %v1872_v17  ;;  %v1874_v17 = vadd.f32 %v1856_v16, %v6038_v61 }
 0x78e   : > { %4126 = vpow2.f32 %v3568_v9 }
 0x78f   : > { %v1809_v18 = vpop.f32.mrb[20].mxu1  ;;  %v1860_v19 = vpop.f32.mrb[16].mxu0  ;;  %4128 = vpow2.f32 %v3571_v2 }
 0x790   : > { %v1810_v20 = vadd.f32 %v1809_v18, %v1547_v6  ;;  %v1861_v5 = vadd.f32 %v1860_v19, %v1598_v12  ;;  %v1811_v21 = vpop.f32.mrb[21].mxu1  ;;  %v1862_v7 = vpop.f32.mrb[17].mxu0  ;;  %4130 = vtanh.f32 %v1869_v13  ;;  %v1873_v18 = vadd.f32 %v1854_v10, %v6036_v47 }
 0x791   : > { %v1812_v11 = vadd.f32 %v1811_v21, %v1549_v54  ;;  %v1863_v23 = vadd.f32 %v1862_v7, %v1600_v4  ;;  %v1813_v15 = vpop.f32.mrb[22].mxu1  ;;  %v1864_v14 = vpop.f32.mrb[18].mxu0  ;;  %4132 = vpow2.f32 %v3573_v22  ;;  %v3574_v54 = vmul.f32 -1.442695, %v1874_v17 }
 0x792   : > { %v1875_v53 = vadd.f32 %v1810_v20, %v6032_v55  ;;  %v1814_v46 = vpop.f32.mrb[23].mxu1  ;;  %v1865_v48 = vpop.f32.mrb[19].mxu0  ;;  %v1877_v7 = vadd.f32 %v1861_v5, %v6036_v47 }
 0x793   : > { %v1876_v9 = vadd.f32 %v1812_v11, %v6034_v56  ;;  %v1878_v16 = vadd.f32 %v1863_v23, %v6038_v61 }
 0x794   : > { %v3569_v19 = vmul.f32 -1.442695, %v1875_v53 }
 0x795   : > { %v3572_v12 = vmul.f32 -1.442695, %v1876_v9  ;;  %v3575_v22 = vmul.f32 -1.442695, %v1878_v16 }
 0x796   : > { %v4123_v6 = vpop.eup %4122  ;;  %4134 = vpow2.f32 %v3569_v19 }
 0x797   : > { %v4125_v21 = vpop.eup %4124  ;;  %v1888_v4 = vadd.f32 1.0, %v4123_v6  ;;  %4136 = vpow2.f32 %v3572_v12 }
 0x798   : > { %v1906_v8 = vadd.f32 1.0, %v4125_v21  ;;  %4138 = vtanh.f32 %v1873_v18  ;;  %v4127_v20 = vpop.eup %4126 }
 0x799   : > { %4140 = vrcp.f32 %v1888_v4  ;;  %v1889_v57 = vadd.f32 1.0, %v4127_v20  ;;  %v4129_v2 = vpop.eup %4128 }
 0x79a   : > { %4142 = vrcp.f32 %v1906_v8  ;;  %v1907_v10 = vadd.f32 1.0, %v4129_v2  ;;  %v4131_v13 = vpop.eup %4130 }
 0x79b   : > { %4144 = vpow2.f32 %v3574_v54  ;;  %v4133_v11 = vpop.eup %4132 }
 0x79c   : > { %4146 = vrcp.f32 %v1889_v57  ;;  %v1927_v18 = vadd.f32 1.0, %v4133_v11 }
 0x79d   : > { %4148 = vrcp.f32 %v1907_v10 }
 0x79e   : > { %4150 = vpow2.f32 %v3575_v22 }
 0x79f   : > { %4152 = vtanh.f32 %v1877_v7 }
 0x7a0   : > { %v4135_v15 = vpop.eup %4134 }
 0x7a1   : > { %v4137_v14 = vpop.eup %4136  ;;  %v1890_v53 = vadd.f32 1.0, %v4135_v15 }
 0x7a2   : > { %v4139_v46 = vpop.eup %4138  ;;  %v1908_v48 = vadd.f32 1.0, %v4137_v14 }
 0x7a3   : > { %v4141_v23 = vpop.eup %4140  ;;  %4154 = vrcp.f32 %v1890_v53 }
 0x7a4   : > { %v4143_v17 = vpop.eup %4142  ;;  %v1939_v9 = vmul.f32 %v4141_v23, %v4131_v13  ;;  %4156 = vrcp.f32 %v1908_v48 }
 0x7a5   : > { %v4145_v19 = vpop.eup %4144  ;;  %v1936_v12 = vmul.f32 %v5014_v50, %v4143_v17  ;;  %4158 = vrcp.f32 %v1927_v18 }
 0x7a6   : > { %v4147_v6 = vpop.eup %4146  ;;  %v1928_v54 = vadd.f32 1.0, %v4145_v19  ;;  %v7524_v19 = vld [vmem:[#allocation111_spill] sm:$0xff] }
 0x7a7   : > { %v6360_v21 = vadd.f32 %v1939_v9, %v1936_v12  ;;  %v1940_v5 = vmul.f32 %v4147_v6, %v4139_v46  ;;  %v4149_v4 = vpop.eup %4148  ;;  %v7525_v12 = vld [vmem:[#allocation110_spill] sm:$0xff] }
 0x7a8   : > { %v1937_v8 = vmul.f32 %v5010_v59, %v4149_v4  ;;  %v4151_v20 = vpop.eup %4150  ;;  %v3576_v6 = vcombine.low %v7525_v12, %v7524_v19  ;;  %v7527_v4 = vld [vmem:[#allocation112_spill] sm:$0xff]  ;;  %v7538_v12 = vld [vmem:[#allocation125_spill] sm:$0xff] }
 0x7a9   : > { %4160 = vtanh.f32 %v6360_v21  ;;  %v4153_v57 = vpop.eup %4152  ;;  %v1929_v22 = vadd.f32 1.0, %v4151_v20  ;;  %v7528_v20 = vld [vmem:[#allocation115_spill] sm:$0xff] }
 0x7aa   : > { %v6364_v16 = vadd.f32 %v1940_v5, %v1937_v8  ;;  %4162 = vrcp.f32 %v1928_v54  ;;  %3848 = vmatprep.subr.bf16.mxu1 %v3576_v6  ;;  %v7526_v5 = vld [vmem:[#allocation113_spill] sm:$0xff]  ;;  %v2006_v8 = vmul.f32 %v6360_v21, %v6360_v21 }
 0x7ab   : > { %3849 = vmatpush3.bf16.msra.mxu1 %v3576_v6  ;;  %v3577_v54 = vcombine.low %v7527_v4, %v7526_v5  ;;  %v7539_v6 = vld [vmem:[#allocation124_spill] sm:$0xff]  ;;  %v7540_v4 = vld [vmem:[#allocation127_spill] sm:$0xff] }
 0x7ac   : > { %4164 = vtanh.f32 %v6364_v16  ;;  %v3583_v5 = vcombine.low %v7539_v6, %v7538_v12 }
 0x7ad   : > { %v4155_v2 = vpop.eup %4154  ;;  %4166 = vrcp.f32 %v1929_v22  ;;  %3850 = vmatprep.subr.bf16.mxu1 %v3577_v54  ;;  %v7531_v22 = vld [vmem:[#allocation116_spill] sm:$0xff] }
 0x7ae   : > { %v4157_v50 = vpop.eup %4156  ;;  %v1941_v10 = vmul.f32 %v4155_v2, %v4153_v57  ;;  %v7529_v57 = vld [vmem:[#allocation114_spill] sm:$0xff] }
 0x7af   : > { %v1938_v13 = vmul.f32 %v5006_v62, %v4157_v50  ;;  %v4159_v11 = vpop.eup %4158  ;;  %3851 = vmatpush3.bf16.msra.mxu1 %v3577_v54  ;;  %v3578_v2 = vcombine.low %v7529_v57, %v7528_v20  ;;  %v2007_v50 = vmul.f32 %v6364_v16, %v6364_v16  ;;  %v7541_v54 = vld [vmem:[#allocation126_spill] sm:$0xff]  ;;  %v7542_v20 = vld [vmem:[#allocation129_spill] sm:$0xff]  ;;  %v7543_v57 = vld [vmem:[#allocation128_spill] sm:$0xff] }
 0x7b1   : > { %v6368_v7 = vadd.f32 %v1941_v10, %v1938_v13  ;;  %3852 = vmatprep.subr.bf16.mxu1 %v3578_v2  ;;  %v7530_v10 = vld [vmem:[#allocation117_spill] sm:$0xff] }
 0x7b2   : > { %v3579_v13 = vcombine.low %v7531_v22, %v7530_v10  ;;  %v7545_v10 = vld [vmem:[#allocation130_spill] sm:$0xff] }
 0x7b3   : > { %v4161_v59 = vpop.eup %4160  ;;  %4168 = vtanh.f32 %v6368_v7  ;;  %3853 = vmatpush3.bf16.msra.mxu1 %v3578_v2  ;;  %v3585_v2 = vcombine.low %v7543_v57, %v7542_v20 }
 0x7b4   : > { %v6371_v15 = vmul.f32 %v4161_v59, %v4159_v11  ;;  %v4163_v14 = vpop.eup %4162  ;;  %v2008_v11 = vmul.f32 %v6368_v7, %v6368_v7  ;;  %3854 = vmatprep.subr.bf16.mxu1 %v3579_v13  ;;  %v7532_v59 = vld [vmem:[#allocation119_spill] sm:$0xff] }
 0x7b6   : > { %1951 = vadd.xlane.f32.xlu1 %v6371_v15  ;;  %v4165_v53 = vpop.eup %4164  ;;  %v1961_v62 = vmul.f32 %v6371_v15, %v6371_v15 }
 0x7b7   : > { %v6374_v46 = vmul.f32 %v4165_v53, %v4163_v14  ;;  %v4167_v48 = vpop.eup %4166  ;;  %3855 = vmatpush3.bf16.msra.mxu1 %v3579_v13  ;;  %v7533_v14 = vld [vmem:[#allocation118_spill] sm:$0xff]  ;;  %v7546_v13 = vld [vmem:[#allocation133_spill] sm:$0xff] }
 0x7b8   : > { %v3580_v53 = vcombine.low %v7533_v14, %v7532_v59  ;;  %v7548_v14 = vld [vmem:[#allocation135_spill] sm:$0xff] }
 0x7b9   : > { %v1962_v9 = vmul.f32 %v6374_v46, %v6374_v46 }
 0x7ba   : > { %1953 = vadd.xlane.f32.xlu1 %v6374_v46  ;;  %3856 = vmatprep.subr.bf16.mxu1 %v3580_v53 }
 0x7bb   : > { %3857 = vmatpush3.bf16.msra.mxu1 %v3580_v53  ;;  %v7549_v53 = vld [vmem:[#allocation134_spill] sm:$0xff] }
 0x7bd   : > { %v4169_v23 = vpop.eup %4168 }
 0x7be   : > { %1964 = vadd.xlane.f32.xlu1 %v1961_v62  ;;  %v6379_v17 = vmul.f32 %v4169_v23, %v4167_v48  ;;  %v7534_v48 = vld [vmem:[#allocation121_spill] sm:$0xff]  ;;  %v7535_v62 = vld [vmem:[#allocation120_spill] sm:$0xff] }
 0x7bf   : > { %v3581_v23 = vcombine.low %v7535_v62, %v7534_v48  ;;  %v3588_v48 = vcombine.low %v7549_v53, %v7548_v14  ;;  %v7550_v62 = vld [vmem:[#allocation137_spill] sm:$0xff] }
 0x7c0   : > { %1955 = vadd.xlane.f32.xlu0 %v6379_v17  ;;  %v1963_v18 = vmul.f32 %v6379_v17, %v6379_v17 }
 0x7c1   : > { %3858 = vmatprep.subr.bf16.mxu1 %v3581_v23 }
 0x7c2   : > { %1966 = vadd.xlane.f32.xlu1 %v1962_v9  ;;  %3859 = vmatpush3.bf16.msra.mxu1 %v3581_v23  ;;  %v7536_v9 = vld [vmem:[#allocation123_spill] sm:$0xff]  ;;  %v7551_v23 = vld [vmem:[#allocation136_spill] sm:$0xff] }
 0x7c6   : > { %1968 = vadd.xlane.f32.xlu1 %v1963_v18  ;;  %v7537_v18 = vld [vmem:[#allocation122_spill] sm:$0xff] }
 0x7c7   : > { %v3582_v19 = vcombine.low %v7537_v18, %v7536_v9  ;;  %v3589_v9 = vcombine.low %v7551_v23, %v7550_v62 }
 0x7c9   : > { %3860 = vmatprep.subr.bf16.mxu1 %v3582_v19 }
 0x7ca   : > { %1997 = vadd.xlane.f32.xlu1 %v6360_v21  ;;  %3861 = vmatpush3.bf16.msra.mxu1 %v3582_v19 }
 0x7cb   : > { %3862 = vmatprep.subr.bf16.mxu1 %v3583_v5 }
 0x7ce   : > { %1999 = vadd.xlane.f32.xlu1 %v6364_v16  ;;  %3863 = vmatpush3.bf16.msra.mxu1 %v3583_v5 }
 0x7d2   : > { %2001 = vadd.xlane.f32.xlu1 %v6368_v7 }
 0x7d6   : > { %2009 = vadd.xlane.f32.xlu1 %v2006_v8  ;;  %v3584_v8 = vcombine.low %v7541_v54, %v7540_v4 }
 0x7d8   : > { %3868 = vmatprep.subr.bf16.mxu0 %v3584_v8 }
 0x7d9   : > { %3869 = vmatpush3.bf16.msra.mxu0 %v3584_v8 }
 0x7da   : > { %2011 = vadd.xlane.f32.xlu1 %v2007_v50  ;;  %3870 = vmatprep.subr.bf16.mxu0 %v3585_v2  ;;  %v7544_v50 = vld [vmem:[#allocation131_spill] sm:$0xff] }
 0x7db   : > { %v3586_v22 = vcombine.low %v7545_v10, %v7544_v50 }
 0x7dd   : > { %3871 = vmatpush3.bf16.msra.mxu0 %v3585_v2 }
 0x7de   : > { %2013 = vadd.xlane.f32.xlu1 %v2008_v11  ;;  %3872 = vmatprep.subr.bf16.mxu0 %v3586_v22  ;;  %v7547_v11 = vld [vmem:[#allocation132_spill] sm:$0xff] }
 0x7df   : > { %v3587_v59 = vcombine.low %v7547_v11, %v7546_v13 }
 0x7e1   : > { %3873 = vmatpush3.bf16.msra.mxu0 %v3586_v22 }
 0x7e2   : > { %3874 = vmatprep.subr.bf16.mxu0 %v3587_v59 }
 0x7e5   : > { %3875 = vmatpush3.bf16.msra.mxu0 %v3587_v59 }
 0x7e6   : > { %3876 = vmatprep.subr.bf16.mxu0 %v3588_v48 }
 0x7e9   : > { %3877 = vmatpush3.bf16.msra.mxu0 %v3588_v48 }
 0x7ea   : > { %3878 = vmatprep.subr.bf16.mxu0 %v3589_v9 }
 0x7ed   : > { %3879 = vmatpush3.bf16.msra.mxu0 %v3589_v9 }
 0x843   : > { %v1952_v18 = vpop.xlane.xlu1 %1951 }
 0x844   : > { %v1958_v12 = vmul.f32 0.0078125, %v1952_v18 }
 0x846   : > { %v1973_v5 = vmul.f32 %v1958_v12, %v1958_v12  ;;  %v1979_v9 = vsub.f32 %v6371_v15, %v1958_v12  ;;  %v7553_v12 = vld [vmem:[#allocation328_spill] sm:$0xff] }
 0x847   : > { %v1954_v19 = vpop.xlane.xlu1 %1953 }
 0x848   : > { %v1959_v4 = vmul.f32 0.0078125, %v1954_v19 }
 0x84a   : > { %v1974_v2 = vmul.f32 %v1959_v4, %v1959_v4 }
 0x84b   : > { %v1965_v6 = vpop.xlane.xlu1 %1964 }
 0x84c   : > { %v1970_v54 = vmul.f32 0.0078125, %v1965_v6 }
 0x84d   : > { %v1956_v8 = vpop.xlane.xlu0 %1955 }
 0x84e   : > { %v1976_v20 = vsub.f32 %v1970_v54, %v1973_v5  ;;  %v1960_v10 = vmul.f32 0.0078125, %v1956_v8  ;;  %v1980_v5 = vsub.f32 %v6374_v46, %v1959_v4 }
 0x84f   : > { %v1967_v57 = vpop.xlane.xlu1 %1966 }
 0x850   : > { %v1982_v50 = vadd.f32 1e-05, %v1976_v20  ;;  %v1971_v22 = vmul.f32 0.0078125, %v1967_v57  ;;  %v1975_v59 = vmul.f32 %v1960_v10, %v1960_v10 }
 0x852   : > { %4170 = vrsqrt.f32 %v1982_v50  ;;  %v1977_v13 = vsub.f32 %v1971_v22, %v1974_v2  ;;  %v7552_v2 = vld [vmem:[#allocation323_spill] sm:$0xff]  ;;  %v1981_v22 = vsub.f32 %v6379_v17, %v1960_v10 }
 0x853   : > { %v1969_v11 = vpop.xlane.xlu1 %1968 }
 0x854   : > { %v1983_v14 = vadd.f32 1e-05, %v1977_v13  ;;  %v1972_v53 = vmul.f32 0.0078125, %v1969_v11 }
 0x856   : > { %4172 = vrsqrt.f32 %v1983_v14  ;;  %v1978_v48 = vsub.f32 %v1972_v53, %v1975_v59 }
 0x857   : > { %v1998_v62 = vpop.xlane.xlu1 %1997 }
 0x858   : > { %v1984_v23 = vadd.f32 1e-05, %v1978_v48  ;;  %v2003_v20 = vmul.f32 0.0078125, %v1998_v62 }
 0x85a   : > { %4174 = vrsqrt.f32 %v1984_v23  ;;  %v2018_v14 = vmul.f32 %v2003_v20, %v2003_v20 }
 0x85b   : > { %v2000_v18 = vpop.xlane.xlu1 %1999 }
 0x85c   : > { %v4171_v19 = vpop.eup %4170  ;;  %v2004_v53 = vmul.f32 0.0078125, %v2000_v18 }
 0x85d   : > { %v1988_v6 = vmul.f32 %v4171_v19, %v1979_v9 }
 0x85e   : > { %v2019_v10 = vmul.f32 %v2004_v53, %v2004_v53 }
 0x85f   : > { %v2002_v54 = vpop.xlane.xlu1 %2001  ;;  %v1991_v50 = vmul.f32 %v7552_v2, %v1988_v6 }
 0x860   : > { %v4173_v8 = vpop.eup %4172  ;;  %v2005_v19 = vmul.f32 0.0078125, %v2002_v54  ;;  %v2024_v54 = vsub.f32 %v6360_v21, %v2003_v20 }
 0x861   : > { %v1989_v57 = vmul.f32 %v4173_v8, %v1980_v5  ;;  %v6429_v48 = vadd.f32 %v7553_v12, %v1991_v50  }
 0x863   : > { %v2010_v13 = vpop.xlane.xlu1 %2009  ;;  %v1992_v11 = vmul.f32 %v7552_v2, %v1989_v57  ;;  %v7554_v23 = vmov %v6429_v48 }
 0x864   : > { %v4175_v59 = vpop.eup %4174  ;;  %v2015_v15 = vmul.f32 0.0078125, %v2010_v13 }
 0x865   : > { %v6432_v48 = vadd.f32 %v7553_v12, %v1992_v11   ;;  %v1990_v46 = vmul.f32 %v4175_v59, %v1981_v22  ;;  %v2020_v22 = vmul.f32 %v2005_v19, %v2005_v19 }
 0x866   : > { %v2021_v4 = vsub.f32 %v2015_v15, %v2018_v14 }
 0x867   : > { %v2012_v62 = vpop.xlane.xlu1 %2011  ;;  %v2042_v9 = vpack.c.bf16 %v6432_v48, %v7554_v23  ;;  %v1993_v17 = vmul.f32 %v7552_v2, %v1990_v46 }
 0x868   : > { %v2027_v6 = vadd.f32 1e-05, %v2021_v4  ;;  %v2016_v5 = vmul.f32 0.0078125, %v2012_v62  ;;  %v2025_v4 = vsub.f32 %v6364_v16, %v2004_v53  ;;  %v7555_v62 = vld [vmem:[#allocation329_spill] sm:$0xff]  ;;  %v7557_v16 = vld [vmem:[#allocation139_spill] sm:$0xff]  ;;  %v7558_v53 = vld [vmem:[#allocation138_spill] sm:$0xff] }
 0x869   : > { %3864 = vmatprep.mubr.bf16.mxu1 %v2042_v9  ;;  %v6438_v18 = vadd.f32 %v7553_v12, %v1993_v17   ;;  %v7556_v9 = vmov %v7555_v62  ;;  %v7615_v12 = vld [vmem:[#allocation175_spill] sm:$0xff] }
 0x86a   : > { %4176 = vrsqrt.f32 %v2027_v6  ;;  %v2022_v8 = vsub.f32 %v2016_v5, %v2019_v10  ;;  %v2026_v5 = vsub.f32 %v6368_v7, %v2005_v19  ;;  %v7561_v19 = vld [vmem:[#allocation143_spill] sm:$0xff] }
 0x86b   : > { %v2014_v57 = vpop.xlane.xlu1 %2013  ;;  %v2043_v50 = vpack.c.bf16 %v6438_v18, %v6438_v18 }
 0x86c   : > { %v2028_v13 = vadd.f32 1e-05, %v2022_v8  ;;  %v2017_v11 = vmul.f32 0.0078125, %v2014_v57 }
 0x86d   : > { %3865 = vmatmul.mubr.bf16.vlgmr.msra.gmra.mrb[24].mxu1 %v2043_v50 }
 0x86e   : > { %4178 = vrsqrt.f32 %v2028_v13  ;;  %v2023_v59 = vsub.f32 %v2017_v11, %v2020_v22  ;;  %v3590_v22 = vcombine.low %v7558_v53, %v7557_v16  ;;  %v7559_v13 = vld [vmem:[#allocation141_spill] sm:$0xff]  ;;  %v7560_v11 = vld [vmem:[#allocation140_spill] sm:$0xff] }
 0x86f   : > { %v3591_v7 = vcombine.low %v7560_v11, %v7559_v13  ;;  %v7571_v53 = vld [vmem:[#allocation153_spill] sm:$0xff] }
 0x870   : > { %v2029_v14 = vadd.f32 1e-05, %v2023_v59  ;;  %3880 = vmatprep.subr.bf16.mxu0 %v3590_v22 }
 0x871   : > { %3881 = vmatpush3.bf16.msra.mxu0 %v3590_v22  ;;  %v7572_v22 = vld [vmem:[#allocation152_spill] sm:$0xff] }
 0x872   : > { %4180 = vrsqrt.f32 %v2029_v14  ;;  %3882 = vmatprep.subr.bf16.mxu0 %v3591_v7  ;;  %v7562_v14 = vld [vmem:[#allocation142_spill] sm:$0xff]  ;;  %v3597_v13 = vcombine.low %v7572_v22, %v7571_v53  ;;  %v7577_v53 = vld [vmem:[#allocation156_spill] sm:$0xff] }
 0x874   : > { %v4177_v15 = vpop.eup %4176 }
 0x875   : > { %v2033_v46 = vmul.f32 %v4177_v15, %v2024_v54  ;;  %v3592_v54 = vcombine.low %v7562_v14, %v7561_v19  ;;  %v7563_v15 = vld [vmem:[#allocation145_spill] sm:$0xff]  ;;  %3883 = vmatpush3.bf16.msra.mxu0 %v3591_v7  ;;  %v7573_v7 = vld [vmem:[#allocation320_spill] sm:$0xff] }
 0x877   : > { %v2036_v17 = vmul.f32 %v7555_v62, %v2033_v46  ;;  %v7564_v46 = vld [vmem:[#allocation144_spill] sm:$0xff]  ;;  %3888 = vmatprep.subr.bf16.mxu1 %v3592_v54 }
 0x878   : > { %v4179_v10 = vpop.eup %4178  ;;  %3889 = vmatpush3.bf16.msra.mxu1 %v3592_v54 }
 0x879   : > { %v6446_v50 = vadd.f32 %v6030_v52, %v2036_v17   ;;  %v2034_v6 = vmul.f32 %v4179_v10, %v2025_v4  ;;  %v3593_v4 = vcombine.low %v7564_v46, %v7563_v15  ;;  %v7565_v17 = vld [vmem:[#allocation147_spill] sm:$0xff]  ;;  %v7566_v10 = vld [vmem:[#allocation146_spill] sm:$0xff] }
 0x87b   : > { %v2037_v8 = vmul.f32 %v7556_v9, %v2034_v6  ;;  %3890 = vmatprep.subr.bf16.mxu1 %v3593_v4  ;;  %v3594_v6 = vcombine.low %v7566_v10, %v7565_v17 }
 0x87c   : > { %v4181_v57 = vpop.eup %4180  ;;  %3891 = vmatpush3.bf16.msra.mxu1 %v3593_v4 }
 0x87d   : > { %v6451_v59 = vadd.f32 %v6030_v52, %v2037_v8   ;;  %v2035_v21 = vmul.f32 %v4181_v57, %v2026_v5  ;;  %3892 = vmatprep.subr.bf16.mxu1 %v3594_v6  ;;  %v7567_v5 = vld [vmem:[#allocation149_spill] sm:$0xff]  ;;  %v7568_v8 = vld [vmem:[#allocation148_spill] sm:$0xff] }
 0x87e   : > { %v3595_v57 = vcombine.low %v7568_v8, %v7567_v5 }
 0x87f   : > { %v2038_v20 = vmul.f32 %v7556_v9, %v2035_v21  ;;  %v7569_v21 = vld [vmem:[#allocation151_spill] sm:$0xff] }
 0x880   : > { %3893 = vmatpush3.bf16.msra.mxu1 %v3594_v6 }
 0x881   : > { %v6455_v62 = vadd.f32 %v6030_v52, %v2038_v20   ;;  %3894 = vmatprep.subr.bf16.mxu1 %v3595_v57  ;;  %v7570_v20 = vld [vmem:[#allocation150_spill] sm:$0xff] }
 0x882   : > { %v3596_v16 = vcombine.low %v7570_v20, %v7569_v21  ;;  %v7575_v21 = vld [vmem:[#allocation154_spill] sm:$0xff] }
 0x884   : > { %3895 = vmatpush3.bf16.msra.mxu1 %v3595_v57  ;;  %v7574_v57 = vld [vmem:[#allocation155_spill] sm:$0xff] }
 0x885   : > { %3896 = vmatprep.subr.bf16.mxu1 %v3596_v16  ;;  %v3598_v20 = vcombine.low %v7575_v21, %v7574_v57  ;;  %v7579_v57 = vld [vmem:[#allocation193_spill] sm:$0xff] }
 0x886   : > { %v7580_v21 = vmov %v7579_v57 }
 0x888   : > { %3897 = vmatpush3.bf16.msra.mxu1 %v3596_v16  ;;  %v7576_v16 = vld [vmem:[#allocation157_spill] sm:$0xff] }
 0x889   : > { %3898 = vmatprep.subr.bf16.mxu1 %v3597_v13  ;;  %v3599_v22 = vcombine.low %v7577_v53, %v7576_v16 }
 0x88c   : > { %3899 = vmatpush3.bf16.msra.mxu1 %v3597_v13 }
 0x88d   : > { %3900 = vmatprep.subr.bf16.mxu1 %v3598_v20 }
 0x890   : > { %3901 = vmatpush3.bf16.msra.mxu1 %v3598_v20  ;;  %v7581_v20 = vld [vmem:[#allocation191_spill] sm:$0xff] }
 0x891   : > { %3902 = vmatprep.subr.bf16.mxu1 %v3599_v22  ;;  %v3605_v16 = vcombine.high %v7581_v20, %v7579_v57  ;;  %v3604_v53 = vcombine.low %v7581_v20, %v7580_v21 }
 0x894   : > { %3903 = vmatpush3.bf16.msra.mxu1 %v3599_v22  ;;  %v7582_v22 = vld [vmem:[#allocation197_spill] sm:$0xff] }
 0x895   : > { %2629 = vmatprep.subr.bf16.mxu1 %v3605_v16  ;;  %v7590_v16 = vld [vmem:[#allocation209_spill] sm:$0xff] }
 0x940   : > { %v3866_v11 = vpop.f32.mrb[24].mxu1 }
 0x941   : > { %v2135_v19 = vadd.f32 %v3866_v11, %v7573_v7  ;;  %v2126_v14 = vpop.f32.mrb[25].mxu1  ;;  %v7578_v11 = vld [vmem:[#allocation321_spill] sm:$0xff] }
 0x942   : > { %v2127_v54 = vadd.f32 %v7573_v7, %v2126_v14  ;;  %v3867_v15 = vpop.f32.mrb[26].mxu1 }
 0x943   : > { %v2129_v46 = vpop.f32.mrb[27].mxu1  ;;  %v2142_v17 = vmax.f32 %v2135_v19, 0.0 }
 0x944   : > { %v2130_v4 = vadd.f32 %v7573_v7, %v2129_v46  ;;  %v2140_v10 = vmax.f32 %v2127_v54, 0.0 }
 0x945   : > { %v2144_v8 = vpack.c.bf16 %v2142_v17, %v2142_v17 }
 0x946   : > { %v2141_v6 = vmax.f32 %v2130_v4, 0.0 }
 0x948   : > { %v2143_v5 = vpack.c.bf16 %v2141_v6, %v2140_v10 }
 0x94a   : > { %3884 = vmatprep.mubr.bf16.mxu0 %v2143_v5 }
 0x94b   : > { %3885 = vmatmul.mubr.bf16.vlgmr.msra.gmra.mrb[20].mxu0 %v2144_v8 }
 0x94c   : > { %3914 = vmatprep.mubr.msk.f32.mxu0 %vm2342_vm2, %v7409_v0 }
 0xa1e   : > { %v3886_v13 = vpop.f32.mrb[20].mxu0 }
 0xa1f   : > { %v2236_v14 = vadd.f32 %v3886_v13, %v7578_v11  ;;  %v2227_v19 = vpop.f32.mrb[21].mxu0  ;;  %v7583_v13 = vld [vmem:[#allocation195_spill] sm:$0xff] }
 0xa20   : > { %v2228_v54 = vadd.f32 %v7578_v11, %v2227_v19  ;;  %v3887_v15 = vpop.f32.mrb[22].mxu0  ;;  %v3608_v19 = vcombine.low %v7583_v13, %v7582_v22 }
 0xa21   : > { %v2230_v46 = vpop.f32.mrb[23].mxu0  ;;  %v2243_v17 = vmax.f32 %v2236_v14, 0.0  ;;  %v3609_v14 = vcombine.high %v7583_v13, %v7582_v22 }
 0xa22   : > { %v2231_v4 = vadd.f32 %v7578_v11, %v2230_v46  ;;  %v2241_v10 = vmax.f32 %v2228_v54, 0.0  ;;  %v7584_v54 = vld [vmem:[#allocation201_spill] sm:$0xff]  ;;  %v7586_v46 = vld [vmem:[#allocation199_spill] sm:$0xff] }
 0xa23   : > { %v2245_v8 = vpack.c.bf16 %v2243_v17, %v2243_v17  ;;  %v7585_v15 = vmov %v7584_v54  ;;  %v3613_v17 = vcombine.high %v7586_v46, %v7584_v54  ;;  %v7593_v54 = vld [vmem:[#allocation213_spill] sm:$0xff] }
 0xa24   : > { %v2242_v6 = vmax.f32 %v2231_v4, 0.0  ;;  %v7587_v4 = vmov %v7586_v46  ;;  %v7595_v46 = vld [vmem:[#allocation211_spill] sm:$0xff] }
 0xa25   : > { %v7596_v2 = vmov %v7595_v46  ;;  %v3625_v7 = vcombine.high %v7595_v46, %v7593_v54 }
 0xa26   : > { %v2244_v5 = vpack.c.bf16 %v2242_v6, %v2241_v10  ;;  %v3612_v10 = vcombine.low %v7587_v4, %v7585_v15  ;;  %v7588_v6 = vld [vmem:[#allocation205_spill] sm:$0xff]  ;;  %v7598_v4 = vld [vmem:[#allocation215_spill] sm:$0xff]  ;;  %v7631_v15 = vld [vmem:[#allocation194_spill] sm:$0xff] }
 0xa28   : > { %3904 = vmatprep.mubr.bf16.mxu1 %v2244_v5  ;;  %v7589_v5 = vld [vmem:[#allocation203_spill] sm:$0xff] }
 0xa29   : > { %3905 = vmatmul.mubr.bf16.vlgmr.msra.gmra.mrb[28].mxu1 %v2245_v8  ;;  %v3617_v8 = vcombine.high %v7589_v5, %v7588_v6  ;;  %v3616_v57 = vcombine.low %v7589_v5, %v7588_v6 }
 0xa2a   : > { %2661 = vmatprep.mubr.bf16.mxu1 %v7462_v58  ;;  %2630 = vmatpush1.bf16.msra.mxu1 %v3604_v53  ;;  %v7591_v53 = vld [vmem:[#allocation207_spill] sm:$0xff] }
 0xa2b   : > { %2631 = vmatprep.subr.bf16.mxu1 %v3609_v14  ;;  %v7592_v14 = vmov %v7591_v53  ;;  %v3621_v0 = vcombine.high %v7591_v53, %v7590_v16  ;;  %v7600_v53 = vld [vmem:[#allocation219_spill] sm:$0xff] }
 0xa2c   : > { %v7601_v5 = vmov %v7600_v53 }
 0xa2e   : > { %2632 = vmatpush1.bf16.msra.mxu1 %v3608_v19  ;;  %v3620_v19 = vcombine.low %v7592_v14, %v7590_v16 }
 0xa2f   : > { %2633 = vmatprep.subr.bf16.mxu1 %v3613_v17  ;;  %v7594_v17 = vmov %v7593_v54  ;;  %v7603_v54 = vld [vmem:[#allocation159_spill] sm:$0xff] }
 0xa30   : > { %v7604_v11 = vmov %v7603_v54 }
 0xa32   : > { %2634 = vmatpush1.bf16.msra.mxu1 %v3612_v10  ;;  %v3624_v10 = vcombine.low %v7596_v2, %v7594_v17  ;;  %v7606_v2 = vld [vmem:[#allocation163_spill] sm:$0xff] }
 0xa33   : > { %2635 = vmatprep.subr.bf16.mxu1 %v3617_v8  ;;  %v7597_v8 = vld [vmem:[#allocation217_spill] sm:$0xff] }
 0xa34   : > { %v3629_v9 = vcombine.high %v7598_v4, %v7597_v8 }
 0xa36   : > { %2636 = vmatpush1.bf16.msra.mxu1 %v3616_v57  ;;  %v3628_v57 = vcombine.low %v7598_v4, %v7597_v8  ;;  %v7613_v8 = vld [vmem:[#allocation171_spill] sm:$0xff] }
 0xa37   : > { %2637 = vmatprep.subr.bf16.mxu1 %v3621_v0  ;;  %v7599_v0 = vld [vmem:[#allocation221_spill] sm:$0xff] }
 0xa38   : > { %v3633_v6 = vcombine.high %v7600_v53, %v7599_v0  ;;  %v7609_v53 = vld [vmem:[#allocation167_spill] sm:$0xff] }
 0xa3a   : > { %2638 = vmatpush1.bf16.msra.mxu1 %v3620_v19  ;;  %v3632_v19 = vcombine.low %v7601_v5, %v7599_v0  ;;  %v7610_v5 = vmov %v7609_v53 }
 0xa3b   : > { %2639 = vmatprep.subr.bf16.mxu1 %v3625_v7  ;;  %v7602_v7 = vld [vmem:[#allocation161_spill] sm:$0xff] }
 0xa3c   : > { %v3637_v46 = vcombine.high %v7603_v54, %v7602_v7 }
 0xa3e   : > { %2640 = vmatpush1.bf16.msra.mxu1 %v3624_v10  ;;  %v3636_v10 = vcombine.low %v7604_v11, %v7602_v7 }
 0xa3f   : > { %2641 = vmatprep.subr.bf16.mxu1 %v3629_v9  ;;  %v7605_v9 = vld [vmem:[#allocation165_spill] sm:$0xff] }
 0xa40   : > { %v3641_v4 = vcombine.high %v7606_v2, %v7605_v9 }
 0xa42   : > { %2642 = vmatpush1.bf16.msra.mxu1 %v3628_v57  ;;  %v7607_v57 = vld [vmem:[#allocation169_spill] sm:$0xff] }
 0xa43   : > { %2643 = vmatprep.subr.bf16.mxu1 %v3633_v6  ;;  %v3640_v6 = vcombine.low %v7606_v2, %v7605_v9  ;;  %v7608_v0 = vmov %v7607_v57  ;;  %v3645_v54 = vcombine.high %v7609_v53, %v7607_v57  ;;  %v7616_v57 = vld [vmem:[#allocation181_spill] sm:$0xff]  ;;  %v7618_v53 = vld [vmem:[#allocation179_spill] sm:$0xff] }
 0xa44   : > { %v7617_v2 = vmov %v7616_v57  ;;  %v7619_v9 = vmov %v7618_v53 }
 0xa46   : > { %2644 = vmatpush1.bf16.msra.mxu1 %v3632_v19  ;;  %v3644_v19 = vcombine.low %v7610_v5, %v7608_v0 }
 0xa47   : > { %2875 = vmatprep.subr.bf16.mxu1 %v3637_v46  ;;  %v7611_v46 = vld [vmem:[#allocation173_spill] sm:$0xff] }
 0xa48   : > { %v7612_v7 = vmov %v7611_v46  ;;  %v3649_v11 = vcombine.high %v7613_v8, %v7611_v46  ;;  %v7621_v46 = vld [vmem:[#allocation183_spill] sm:$0xff] }
 0xa49   : > { %2662 = vmatmul.mubr.bf16.vlgmr.msra.gmra.mrb[32].mxu1 %v6111_v3  ;;  %v7622_v0 = vmov %v7621_v46 }
 0xa4a   : > { %2876 = vmatpush1.bf16.msra.mxu1 %v3636_v10  ;;  %2907 = vmatprep.mubr.bf16.mxu1 %v7462_v58  ;;  %v3648_v10 = vcombine.low %v7613_v8, %v7612_v7  ;;  %v7624_v7 = vld [vmem:[#allocation187_spill] sm:$0xff] }
 0xa4b   : > { %2877 = vmatprep.subr.bf16.mxu1 %v3641_v4  ;;  %v7614_v4 = vld [vmem:[#allocation177_spill] sm:$0xff] }
 0xa4c   : > { %v3653_v13 = vcombine.high %v7615_v12, %v7614_v4 }
 0xa4e   : > { %2878 = vmatpush1.bf16.msra.mxu1 %v3640_v6  ;;  %v3652_v6 = vcombine.low %v7615_v12, %v7614_v4 }
 0xa4f   : > { %2879 = vmatprep.subr.bf16.mxu1 %v3645_v54  ;;  %v3657_v54 = vcombine.high %v7618_v53, %v7616_v57 }
 0xa52   : > { %2880 = vmatpush1.bf16.msra.mxu1 %v3644_v19  ;;  %v3656_v19 = vcombine.low %v7619_v9, %v7617_v2 }
 0xa53   : > { %2881 = vmatprep.subr.bf16.mxu1 %v3649_v11  ;;  %v7620_v11 = vld [vmem:[#allocation185_spill] sm:$0xff] }
 0xa54   : > { %v3661_v5 = vcombine.high %v7621_v46, %v7620_v11  ;;  %v7628_v46 = vld [vmem:[#allocation190_spill] sm:$0xff] }
 0xa56   : > { %2882 = vmatpush1.bf16.msra.mxu1 %v3648_v10  ;;  %v3660_v10 = vcombine.low %v7622_v0, %v7620_v11  ;;  %v7629_v0 = vmov %v7628_v46 }
 0xa57   : > { %2883 = vmatprep.subr.bf16.mxu1 %v3653_v13  ;;  %v7623_v13 = vld [vmem:[#allocation189_spill] sm:$0xff] }
 0xa58   : > { %v3665_v8 = vcombine.high %v7624_v7, %v7623_v13 }
 0xa5a   : > { %2884 = vmatpush1.bf16.msra.mxu1 %v3652_v6 }
 0xa5b   : > { %2885 = vmatprep.subr.bf16.mxu1 %v3657_v54  ;;  %v7625_v54 = vld [vmem:[#allocation322_spill] sm:$0xff] }
 0xa5c   : > { %v7626_v12 = vmov %v7625_v54 }
 0xa5e   : > { %2886 = vmatpush1.bf16.msra.mxu1 %v3656_v19 }
 0xa5f   : > { %2887 = vmatprep.subr.bf16.mxu1 %v3661_v5  ;;  %v7627_v5 = vld [vmem:[#allocation192_spill] sm:$0xff] }
 0xa60   : > { %v3603_v11 = vcombine.high %v7628_v46, %v7627_v5 }
 0xa62   : > { %2888 = vmatpush1.bf16.msra.mxu1 %v3660_v10  ;;  %v7630_v10 = vld [vmem:[#allocation196_spill] sm:$0xff] }
 0xa63   : > { %2889 = vmatprep.subr.bf16.mxu1 %v3665_v8  ;;  %v3602_v8 = vcombine.low %v7629_v0, %v7627_v5 }
 0xafc   : > { %v3906_v4 = vpop.f32.mrb[28].mxu1 }
 0xafd   : > { %v2328_v57 = vpop.f32.mrb[29].mxu1  ;;  %v2337_v19 = vadd.f32 %v3906_v4, %v7626_v12 }
 0xafe   : > { %v3907_v6 = vpop.f32.mrb[30].mxu1  ;;  %v2329_v14 = vadd.f32 %v7625_v54, %v2328_v57  ;;  %v7636_v54 = vld [vmem:[#allocation202_spill] sm:$0xff] }
 0xaff   : > { %v2331_v53 = vpop.f32.mrb[31].mxu1  ;;  %v3607_v6 = vcombine.high %v7631_v15, %v7630_v10  ;;  %v7637_v0 = vmov %v7636_v54 }
 0xb00   : > { %v2332_v2 = vadd.f32 %v7626_v12, %v2331_v53  ;;  %v7634_v53 = vld [vmem:[#allocation204_spill] sm:$0xff] }
 0xb01   : > { %v3615_v46 = vcombine.high %v7636_v54, %v7634_v53 }
 0xb02   : > { %v3927_v9 = vpack.c.bf16 %v2332_v2, %v2329_v14  ;;  %v3606_v2 = vcombine.low %v7631_v15, %v7630_v10  ;;  %v7632_v14 = vld [vmem:[#allocation200_spill] sm:$0xff]  ;;  %v7641_v10 = vld [vmem:[#allocation210_spill] sm:$0xff] }
 0xb04   : > { %3928 = vmatprep.subr.bf16.mxu0 %v3927_v9 }
 0xb05   : > { %3930 = vmatpush3.bf16.msra.mxu0 %v3927_v9  ;;  %v7633_v9 = vld [vmem:[#allocation198_spill] sm:$0xff] }
 0xb06   : > { %3912 = vmatprep.subr.mxu0 %v2337_v19  ;;  %v3611_v4 = vcombine.high %v7633_v9, %v7632_v14  ;;  %v3610_v57 = vcombine.low %v7633_v9, %v7632_v14 }
 0xb09   : > { %3913 = vmatpush3.msra.mxu0 %v2337_v19  ;;  %v7635_v19 = vmov %v7634_v53  ;;  %v7644_v53 = vld [vmem:[#allocation214_spill] sm:$0xff] }
 0xb0a   : > { %3915 = vmatmul.mubr.msk.f32.vlgmr.msra.gmra.mrb[24].mxu0 %vm2342_vm2, %v7408_v1  ;;  %2586 = vmatprep.subr.bf16.mxu0 %v3603_v11  ;;  %v3614_v11 = vcombine.low %v7637_v0, %v7635_v19  ;;  %v7639_v1 = vld [vmem:[#allocation206_spill] sm:$0xff]  ;;  %v7645_v14 = vmov %v7644_v53 }
 0xb0b   : > { %2587 = vmatpush1.bf16.msra.mxu0 %v3602_v8  ;;  %2618 = vmatprep.mubr.bf16.mxu0 %v7462_v58  ;;  %v7638_v8 = vld [vmem:[#allocation208_spill] sm:$0xff]  ;;  %v7647_v0 = vld [vmem:[#allocation218_spill] sm:$0xff] }
 0xb0c   : > { %2588 = vmatprep.subr.bf16.mxu0 %v3607_v6  ;;  %v3619_v5 = vcombine.high %v7639_v1, %v7638_v8  ;;  %v3618_v6 = vcombine.low %v7639_v1, %v7638_v8  ;;  %v7649_v8 = vld [vmem:[#allocation158_spill] sm:$0xff] }
 0xb0f   : > { %2589 = vmatpush1.bf16.msra.mxu0 %v3606_v2  ;;  %v7640_v2 = vld [vmem:[#allocation212_spill] sm:$0xff] }
 0xb10   : > { %2590 = vmatprep.subr.bf16.mxu0 %v3611_v4  ;;  %v3623_v9 = vcombine.high %v7641_v10, %v7640_v2  ;;  %v3622_v4 = vcombine.low %v7641_v10, %v7640_v2 }
 0xb13   : > { %2591 = vmatpush1.bf16.msra.mxu0 %v3610_v57  ;;  %v7642_v57 = vld [vmem:[#allocation216_spill] sm:$0xff] }
 0xb14   : > { %2592 = vmatprep.subr.bf16.mxu0 %v3615_v46  ;;  %v7643_v12 = vmov %v7642_v57  ;;  %v3627_v54 = vcombine.high %v7644_v53, %v7642_v57  ;;  %v7651_v57 = vld [vmem:[#allocation162_spill] sm:$0xff] }
 0xb15   : > { %v3626_v46 = vcombine.low %v7645_v14, %v7643_v12  ;;  %v7652_v10 = vmov %v7651_v57  ;;  %v7713_v14 = vld [vmem:[#allocation326_spill] sm:$0xff] }
 0xb17   : > { %2593 = vmatpush1.bf16.msra.mxu0 %v3614_v11  ;;  %v7646_v11 = vld [vmem:[#allocation220_spill] sm:$0xff] }
 0xb18   : > { %2594 = vmatprep.subr.bf16.mxu0 %v3619_v5  ;;  %v3631_v1 = vcombine.high %v7647_v0, %v7646_v11  ;;  %v3630_v5 = vcombine.low %v7647_v0, %v7646_v11 }
 0xb1b   : > { %2595 = vmatpush1.bf16.msra.mxu0 %v3618_v6  ;;  %v7648_v6 = vld [vmem:[#allocation160_spill] sm:$0xff] }
 0xb1c   : > { %2596 = vmatprep.subr.bf16.mxu0 %v3623_v9  ;;  %v3635_v2 = vcombine.high %v7649_v8, %v7648_v6  ;;  %v3634_v9 = vcombine.low %v7649_v8, %v7648_v6  ;;  %v7657_v6 = vld [vmem:[#allocation170_spill] sm:$0xff] }
 0xb1f   : > { %2597 = vmatpush1.bf16.msra.mxu0 %v3622_v4  ;;  %v7650_v4 = vld [vmem:[#allocation164_spill] sm:$0xff] }
 0xb20   : > { %2598 = vmatprep.subr.bf16.mxu0 %v3627_v54  ;;  %v3639_v53 = vcombine.high %v7651_v57, %v7650_v4  ;;  %v3638_v54 = vcombine.low %v7652_v10, %v7650_v4  ;;  %v7659_v4 = vld [vmem:[#allocation174_spill] sm:$0xff] }
 0xb23   : > { %2599 = vmatpush1.bf16.msra.mxu0 %v3626_v46  ;;  %v7654_v46 = vld [vmem:[#allocation166_spill] sm:$0xff] }
 0xb24   : > { %2600 = vmatprep.subr.bf16.mxu0 %v3631_v1  ;;  %v7653_v1 = vld [vmem:[#allocation168_spill] sm:$0xff]  ;;  %v7655_v0 = vmov %v7654_v46 }
 0xb25   : > { %v3643_v11 = vcombine.high %v7654_v46, %v7653_v1  ;;  %v7662_v46 = vld [vmem:[#allocation178_spill] sm:$0xff] }
 0xb26   : > { %v7663_v12 = vmov %v7662_v46 }
 0xb27   : > { %2601 = vmatpush1.bf16.msra.mxu0 %v3630_v5  ;;  %v3642_v5 = vcombine.low %v7655_v0, %v7653_v1  ;;  %v7665_v1 = vld [vmem:[#allocation182_spill] sm:$0xff] }
 0xb28   : > { %2832 = vmatprep.subr.bf16.mxu0 %v3635_v2  ;;  %v7656_v2 = vld [vmem:[#allocation172_spill] sm:$0xff] }
 0xb29   : > { %v3647_v57 = vcombine.high %v7657_v6, %v7656_v2 }
 0xb2a   : > { %2619 = vmatmul.mubr.bf16.vlgmr.msra.gmra.mrb[28].mxu0 %v6111_v3  ;;  %v3646_v3 = vcombine.low %v7657_v6, %v7656_v2  ;;  %v7667_v6 = vld [vmem:[#allocation186_spill] sm:$0xff] }
 0xb2b   : > { %2833 = vmatpush1.bf16.msra.mxu0 %v3634_v9  ;;  %2864 = vmatprep.mubr.bf16.mxu0 %v7462_v58  ;;  %v7658_v9 = vld [vmem:[#allocation176_spill] sm:$0xff] }
 0xb2c   : > { %2834 = vmatprep.subr.bf16.mxu0 %v3639_v53  ;;  %v3651_v8 = vcombine.high %v7659_v4, %v7658_v9  ;;  %v3650_v53 = vcombine.low %v7659_v4, %v7658_v9 }
 0xb2f   : > { %2835 = vmatpush1.bf16.msra.mxu0 %v3638_v54  ;;  %v7660_v54 = vld [vmem:[#allocation180_spill] sm:$0xff] }
 0xb30   : > { %2836 = vmatprep.subr.bf16.mxu0 %v3643_v11  ;;  %v7661_v10 = vmov %v7660_v54  ;;  %v3655_v0 = vcombine.high %v7662_v46, %v7660_v54  ;;  %v7669_v54 = vld [vmem:[#allocation222_spill] sm:$0xff] }
 0xb31   : > { %v3654_v11 = vcombine.low %v7663_v12, %v7661_v10  ;;  %v7670_v9 = vmov %v7669_v54  ;;  %v7672_v10 = vld [vmem:[#allocation223_spill] sm:$0xff] }
 0xb32   : > { %v7676_v12 = vld [vmem:[#allocation227_spill] sm:$0xff] }
 0xb33   : > { %2837 = vmatpush1.bf16.msra.mxu0 %v3642_v5  ;;  %v7664_v5 = vld [vmem:[#allocation184_spill] sm:$0xff] }
 0xb34   : > { %2838 = vmatprep.subr.bf16.mxu0 %v3647_v57  ;;  %v3659_v2 = vcombine.high %v7665_v1, %v7664_v5  ;;  %v3658_v57 = vcombine.low %v7665_v1, %v7664_v5 }
 0xb37   : > { %2839 = vmatpush1.bf16.msra.mxu0 %v3646_v3  ;;  %v7666_v3 = vld [vmem:[#allocation188_spill] sm:$0xff] }
 0xb38   : > { %2840 = vmatprep.subr.bf16.mxu0 %v3651_v8  ;;  %v3663_v4 = vcombine.high %v7667_v6, %v7666_v3  ;;  %v3662_v8 = vcombine.low %v7667_v6, %v7666_v3  ;;  %v7673_v6 = vld [vmem:[#allocation228_spill] sm:$0xff] }
 0xb3b   : > { %2841 = vmatpush1.bf16.msra.mxu0 %v3650_v53  ;;  %v3664_v53 = vcombine.low %v7624_v7, %v7623_v13  ;;  %v7675_v7 = vld [vmem:[#allocation229_spill] sm:$0xff] }
 0xb3c   : > { %2842 = vmatprep.subr.bf16.mxu0 %v3655_v0  ;;  %v7668_v0 = vld [vmem:[#allocation224_spill] sm:$0xff] }
 0xb3d   : > { %2890 = vmatpush1.bf16.msra.mxu1 %v3664_v53  ;;  %v3667_v46 = vcombine.high %v7669_v54, %v7668_v0  ;;  %v3673_v54 = vcombine.high %v7676_v12, %v7675_v7 }
 0xb3f   : > { %2843 = vmatpush1.bf16.msra.mxu0 %v3654_v11  ;;  %v7671_v11 = vld [vmem:[#allocation225_spill] sm:$0xff] }
 0xb40   : > { %2844 = vmatprep.subr.bf16.mxu0 %v3659_v2  ;;  %v3669_v1 = vcombine.high %v7672_v10, %v7671_v11 }
 0xb42   : > { %3121 = vmatprep.subr.bf16.mxu1 %v3669_v1 }
 0xb43   : > { %2845 = vmatpush1.bf16.msra.mxu0 %v3658_v57  ;;  %v3668_v57 = vcombine.low %v7672_v10, %v7671_v11  ;;  %v7680_v10 = vld [vmem:[#allocation231_spill] sm:$0xff] }
 0xb44   : > { %2846 = vmatprep.subr.bf16.mxu0 %v3663_v4  ;;  %v3666_v4 = vcombine.low %v7670_v9, %v7668_v0  ;;  %v7677_v0 = vld [vmem:[#allocation232_spill] sm:$0xff]  ;;  %v7679_v9 = vld [vmem:[#allocation233_spill] sm:$0xff] }
 0xb45   : > { %v3677_v11 = vcombine.high %v7680_v10, %v7679_v9 }
 0xb47   : > { %2847 = vmatpush1.bf16.msra.mxu0 %v3662_v8  ;;  %v7674_v8 = vld [vmem:[#allocation226_spill] sm:$0xff] }
 0xb48   : > { %3078 = vmatprep.subr.bf16.mxu0 %v3667_v46  ;;  %v3671_v53 = vcombine.high %v7674_v8, %v7673_v6  ;;  %v3670_v1 = vcombine.low %v7674_v8, %v7673_v6  ;;  %v3672_v46 = vcombine.low %v7676_v12, %v7675_v7  ;;  %v7685_v8 = vld [vmem:[#allocation237_spill] sm:$0xff]  ;;  %v7686_v12 = vld [vmem:[#allocation235_spill] sm:$0xff] }
 0xb49   : > { %v3681_v13 = vcombine.high %v7686_v12, %v7685_v8 }
 0xbdd   : > { %v3916_v2 = vpop.f32.mrb[24].mxu0 }
 0xbde   : > { %v2415_v5 = vpop.f32.mrb[25].mxu0 }
 0xbdf   : > { %v2424_v3 = vpack.c.bf16 %v3916_v2, %v2415_v5  ;;  %v7678_v5 = vld [vmem:[#allocation230_spill] sm:$0xff] }
 0xbe0   : > { %v3675_v2 = vcombine.high %v7678_v5, %v7677_v0 }
 0xbe1   : > { %2865 = vmatmul.mubr.bf16.vlgmr.msra.gmra.mrb[28].mxu0 %v2424_v3  ;;  %2908 = vmatmul.mubr.bf16.vlgmr.msra.gmra.mrb[32].mxu1 %v2424_v3  ;;  %v3674_v3 = vcombine.low %v7678_v5, %v7677_v0  ;;  %v7689_v5 = vld [vmem:[#allocation238_spill] sm:$0xff] }
 0xbe2   : > { %3079 = vmatpush1.bf16.msra.mxu0 %v3666_v4  ;;  %3122 = vmatpush1.bf16.msra.mxu1 %v3668_v57  ;;  %v3676_v4 = vcombine.low %v7680_v10, %v7679_v9  ;;  %v7681_v57 = vld [vmem:[#allocation236_spill] sm:$0xff]  ;;  %v7691_v9 = vld [vmem:[#allocation239_spill] sm:$0xff] }
 0xbe3   : > { %3080 = vmatprep.subr.bf16.mxu0 %v3671_v53  ;;  %3123 = vmatprep.subr.bf16.mxu1 %v3673_v54  ;;  %v7682_v6 = vmov %v7681_v57  ;;  %v7683_v53 = vld [vmem:[#allocation234_spill] sm:$0xff] }
 0xbe4   : > { %3110 = vmatprep.mubr.bf16.mxu0 %v7462_v58  ;;  %3153 = vmatprep.mubr.bf16.mxu1 %v7462_v58  ;;  %v7684_v7 = vmov %v7683_v53  ;;  %v3679_v54 = vcombine.high %v7683_v53, %v7681_v57  ;;  %v7692_v57 = vld [vmem:[#allocation244_spill] sm:$0xff]  ;;  %v7694_v53 = vld [vmem:[#allocation242_spill] sm:$0xff] }
 0xbe5   : > { %v3678_v58 = vcombine.low %v7684_v7, %v7682_v6  ;;  %v7693_v6 = vmov %v7692_v57  ;;  %v7695_v7 = vmov %v7694_v53 }
 0xbe6   : > { %3081 = vmatpush1.bf16.msra.mxu0 %v3670_v1  ;;  %3124 = vmatpush1.bf16.msra.mxu1 %v3672_v46  ;;  %v3680_v1 = vcombine.low %v7686_v12, %v7685_v8  ;;  %v7687_v46 = vld [vmem:[#allocation240_spill] sm:$0xff]  ;;  %v7697_v8 = vld [vmem:[#allocation243_spill] sm:$0xff] }
 0xbe7   : > { %3082 = vmatprep.subr.bf16.mxu0 %v3675_v2  ;;  %3125 = vmatprep.subr.bf16.mxu1 %v3677_v11  ;;  %v7688_v0 = vmov %v7687_v46  ;;  %v3683_v2 = vcombine.high %v7689_v5, %v7687_v46  ;;  %v7690_v11 = vld [vmem:[#allocation241_spill] sm:$0xff]  ;;  %v7698_v46 = vld [vmem:[#allocation248_spill] sm:$0xff] }
 0xbe8   : > { %v3685_v10 = vcombine.high %v7691_v9, %v7690_v11 }
 0xbea   : > { %3083 = vmatpush1.bf16.msra.mxu0 %v3674_v3  ;;  %3126 = vmatpush1.bf16.msra.mxu1 %v3676_v4  ;;  %v3682_v3 = vcombine.low %v7689_v5, %v7688_v0  ;;  %v3684_v4 = vcombine.low %v7691_v9, %v7690_v11  ;;  %v7699_v0 = vmov %v7698_v46  ;;  %v7700_v5 = vld [vmem:[#allocation246_spill] sm:$0xff]  ;;  %v7702_v9 = vld [vmem:[#allocation247_spill] sm:$0xff] }
 0xbeb   : > { %3084 = vmatprep.subr.bf16.mxu0 %v3679_v54  ;;  %3127 = vmatprep.subr.bf16.mxu1 %v3681_v13  ;;  %v3687_v54 = vcombine.high %v7694_v53, %v7692_v57  ;;  %v7696_v13 = vld [vmem:[#allocation245_spill] sm:$0xff]  ;;  %v7703_v57 = vld [vmem:[#allocation252_spill] sm:$0xff]  ;;  %v7705_v53 = vld [vmem:[#allocation250_spill] sm:$0xff] }
 0xbec   : > { %v3689_v12 = vcombine.high %v7697_v8, %v7696_v13 }
 0xbee   : > { %3085 = vmatpush1.bf16.msra.mxu0 %v3678_v58  ;;  %3128 = vmatpush1.bf16.msra.mxu1 %v3680_v1  ;;  %v3686_v58 = vcombine.low %v7695_v7, %v7693_v6  ;;  %v3688_v1 = vcombine.low %v7697_v8, %v7696_v13  ;;  %v7704_v6 = vmov %v7703_v57  ;;  %v7706_v7 = vmov %v7705_v53  ;;  %v7708_v8 = vld [vmem:[#allocation251_spill] sm:$0xff] }
 0xbef   : > { %3086 = vmatprep.subr.bf16.mxu0 %v3683_v2  ;;  %3129 = vmatprep.subr.bf16.mxu1 %v3685_v10  ;;  %v3691_v2 = vcombine.high %v7700_v5, %v7698_v46  ;;  %v7701_v10 = vld [vmem:[#allocation249_spill] sm:$0xff] }
 0xbf0   : > { %v3693_v11 = vcombine.high %v7702_v9, %v7701_v10 }
 0xbf2   : > { %3087 = vmatpush1.bf16.msra.mxu0 %v3682_v3  ;;  %3130 = vmatpush1.bf16.msra.mxu1 %v3684_v4  ;;  %v3690_v3 = vcombine.low %v7700_v5, %v7699_v0  ;;  %v3692_v4 = vcombine.low %v7702_v9, %v7701_v10 }
 0xbf3   : > { %3088 = vmatprep.subr.bf16.mxu0 %v3687_v54  ;;  %3131 = vmatprep.subr.bf16.mxu1 %v3689_v12  ;;  %v3695_v54 = vcombine.high %v7705_v53, %v7703_v57  ;;  %v7707_v12 = vld [vmem:[#allocation253_spill] sm:$0xff] }
 0xbf4   : > { %v3697_v13 = vcombine.high %v7708_v8, %v7707_v12  ;;  %v7710_v53 = vld [vmem:[#allocation325_spill] sm:$0xff] }
 0xbf5   : > { %v7711_v0 = vmov %v7710_v53 }
 0xbf6   : > { %3089 = vmatpush1.bf16.msra.mxu0 %v3686_v58  ;;  %3132 = vmatpush1.bf16.msra.mxu1 %v3688_v1  ;;  %v3694_v58 = vcombine.low %v7706_v7, %v7704_v6  ;;  %v3696_v1 = vcombine.low %v7708_v8, %v7707_v12  ;;  %v7712_v12 = vld [vmem:[#allocation327_spill] sm:$0xff] }
 0xbf7   : > { %3090 = vmatprep.subr.bf16.mxu0 %v3691_v2  ;;  %3133 = vmatprep.subr.bf16.mxu1 %v3693_v11  ;;  %v7709_v2 = vld [vmem:[#allocation324_spill] sm:$0xff] }
 0xbfa   : > { %3091 = vmatpush1.bf16.msra.mxu0 %v3690_v3  ;;  %3134 = vmatpush1.bf16.msra.mxu1 %v3692_v4 }
 0xbfb   : > { %3092 = vmatprep.subr.bf16.mxu0 %v3695_v54  ;;  %3135 = vmatprep.subr.bf16.mxu1 %v3697_v13 }
 0xbfe   : > { %3093 = vmatpush1.bf16.msra.mxu0 %v3694_v58  ;;  %3136 = vmatpush1.bf16.msra.mxu1 %v3696_v1 }
 0xc01   : > { %3111 = vmatmul.mubr.bf16.vlgmr.msra.gmra.mrb[28].mxu0 %v6150_v63  ;;  %3154 = vmatmul.mubr.bf16.vlgmr.msra.gmra.mrb[32].mxu1 %v6150_v63 }
 0xcd4   : > { %v3112_v11 = vpop.f32.mrb[28].mxu0  ;;  %v3155_v46 = vpop.f32.mrb[32].mxu1 }
 0xcd5   : > { %v3172_v57 = vadd.f32 %v3112_v11, %v7709_v2  ;;  %v3114_v3 = vpop.f32.mrb[29].mxu0  ;;  %v3157_v4 = vpop.f32.mrb[33].mxu1 }
 0xcd6   : > { %v3173_v5 = vadd.f32 %v3114_v3, %v7710_v53  ;;  %v3116_v6 = vpop.f32.mrb[30].mxu0  ;;  %v3159_v7 = vpop.f32.mrb[34].mxu1  ;;  %v3175_v11 = vadd.f32 %v3157_v4, %v7712_v12  ;;  %v3174_v3 = vadd.f32 %v3155_v46, %v7713_v14 }
 0xcd7   : > { %v3698_v9 = vmul.f32 -1.442695, %v3172_v57  ;;  %v3176_v54 = vadd.f32 %v3116_v6, %v7709_v2  ;;  %v3118_v13 = vpop.f32.mrb[31].mxu0  ;;  %v3161_v58 = vpop.f32.mrb[35].mxu1  ;;  %v3178_v6 = vadd.f32 %v3159_v7, %v7713_v14 }
 0xcd8   : > { %v3700_v1 = vmul.f32 -1.442695, %v3173_v5  ;;  %v3177_v8 = vadd.f32 %v3118_v13, %v7711_v0  ;;  %v3702_v53 = vmul.f32 -1.442695, %v3175_v11  ;;  %v3179_v57 = vadd.f32 %v3161_v58, %v7712_v12 }
 0xcd9   : > { %4182 = vpow2.f32 %v3698_v9  ;;  %v3699_v63 = vmul.f32 -1.442695, %v3176_v54 }
 0xcda   : > { %4184 = vpow2.f32 %v3700_v1  ;;  %v3701_v10 = vmul.f32 -1.442695, %v3177_v8  ;;  %v3703_v9 = vmul.f32 -1.442695, %v3179_v57 }
 0xcdb   : > { %4186 = vpow2.f32 %v3699_v63 }
 0xcdc   : > { %4188 = vpow2.f32 %v3701_v10 }
 0xcdd   : > { %4190 = vtanh.f32 %v3174_v3 }
 0xcde   : > { %4192 = vpow2.f32 %v3702_v53 }
 0xcdf   : > { %4194 = vtanh.f32 %v3178_v6 }
 0xce3   : > { %v4183_v2 = vpop.eup %4182 }
 0xce4   : > { %v4185_v5 = vpop.eup %4184  ;;  %v3186_v15 = vadd.f32 1.0, %v4183_v2 }
 0xce5   : > { %v3198_v54 = vadd.f32 1.0, %v4185_v5  ;;  %v4187_v8 = vpop.eup %4186 }
 0xce6   : > { %4196 = vrcp.f32 %v3186_v15  ;;  %v3187_v4 = vadd.f32 1.0, %v4187_v8  ;;  %v4189_v10 = vpop.eup %4188 }
 0xce7   : > { %4198 = vrcp.f32 %v3198_v54  ;;  %v3199_v46 = vadd.f32 1.0, %v4189_v10  ;;  %v4191_v13 = vpop.eup %4190  ;;  %v7714_v54 = vld [vmem:[#allocation334_spill] sm:$0xff] }
 0xce8   : > { %4200 = vpow2.f32 %v3703_v9  ;;  %v4193_v58 = vpop.eup %4192 }
 0xce9   : > { %4202 = vrcp.f32 %v3187_v4  ;;  %v4195_v7 = vpop.eup %4194  ;;  %v3212_v11 = vadd.f32 1.0, %v4193_v58 }
 0xcea   : > { %4204 = vrcp.f32 %v3199_v46 }
 0xceb   : > { %4206 = vrcp.f32 %v3212_v11 }
 0xcf0   : > { %v4197_v1 = vpop.eup %4196 }
 0xcf1   : > { %v4199_v63 = vpop.eup %4198  ;;  %v3220_v2 = vmul.f32 %v4197_v1, %v4191_v13 }
 0xcf2   : > { %v4201_v3 = vpop.eup %4200  ;;  %v3218_v53 = vmul.f32 %v5034_v49, %v4199_v63 }
 0xcf3   : > { %v4203_v57 = vpop.eup %4202  ;;  %v3213_v9 = vadd.f32 1.0, %v4201_v3 }
 0xcf4   : > { %v6701_v6 = vadd.f32 %v3220_v2, %v3218_v53  ;;  %v3221_v15 = vmul.f32 %v4203_v57, %v4195_v7  ;;  %v4205_v5 = vpop.eup %4204 }
 0xcf5   : > { %v3219_v8 = vmul.f32 %v7714_v54, %v4205_v5  ;;  %v4207_v49 = vpop.eup %4206 }
 0xcf6   : > { %3258 = vadd.xlane.f32.xlu1 %v6701_v6  ;;  %4208 = vtanh.f32 %v6701_v6  ;;  %v3264_v63 = vmul.f32 %v6701_v6, %v6701_v6 }
 0xcf7   : > { %v6706_v4 = vadd.f32 %v3221_v15, %v3219_v8  ;;  %4210 = vrcp.f32 %v3213_v9 }
 0xcf9   : > { %4212 = vtanh.f32 %v6706_v4  ;;  %v3265_v2 = vmul.f32 %v6706_v4, %v6706_v4 }
 0xcfa   : > { %3260 = vadd.xlane.f32.xlu1 %v6706_v4 }
 0xd00   : > { %v4209_v10 = vpop.eup %4208 }
 0xd01   : > { %v3226_v46 = vmul.f32 %v4209_v10, %v4207_v49  ;;  %v4211_v13 = vpop.eup %4210 }
 0xd03   : > { %3228 = vadd.xlane.f32.xlu1 %v3226_v46  ;;  %v3234_v58 = vmul.f32 %v3226_v46, %v3226_v46  ;;  %v4213_v7 = vpop.eup %4212 }
 0xd04   : > { %v3227_v1 = vmul.f32 %v4213_v7, %v4211_v13 }
 0xd05   : > { %3236 = vadd.xlane.f32.xlu0 %v3234_v58 }
 0xd06   : > { %v3235_v11 = vmul.f32 %v3227_v1, %v3227_v1 }
 0xd07   : > { %3230 = vadd.xlane.f32.xlu1 %v3227_v1 }
 0xd09   : > { %3266 = vadd.xlane.f32.xlu0 %v3264_v63 }
 0xd0b   : > { %3238 = vadd.xlane.f32.xlu1 %v3235_v11 }
 0xd0f   : > { %3268 = vadd.xlane.f32.xlu1 %v3265_v2 }
 0xd83   : > { %v3259_v3 = vpop.xlane.xlu1 %3258 }
 0xd84   : > { %v3262_v9 = vmul.f32 0.0078125, %v3259_v3 }
 0xd86   : > { %v3272_v7 = vmul.f32 %v3262_v9, %v3262_v9 }
 0xd87   : > { %v3261_v53 = vpop.xlane.xlu1 %3260 }
 0xd88   : > { %v3263_v11 = vmul.f32 0.0078125, %v3261_v53  ;;  %v3276_v53 = vsub.f32 %v6701_v6, %v3262_v9 }
 0xd8a   : > { %v3273_v20 = vmul.f32 %v3263_v11, %v3263_v11 }
 0xd90   : > { %v3229_v57 = vpop.xlane.xlu1 %3228 }
 0xd91   : > { %v3232_v15 = vmul.f32 0.0078125, %v3229_v57 }
 0xd92   : > { %v3237_v5 = vpop.xlane.xlu0 %3236 }
 0xd93   : > { %v3242_v54 = vmul.f32 %v3232_v15, %v3232_v15  ;;  %v3240_v8 = vmul.f32 0.0078125, %v3237_v5 }
 0xd94   : > { %v3231_v49 = vpop.xlane.xlu1 %3230 }
 0xd95   : > { %v3244_v10 = vsub.f32 %v3240_v8, %v3242_v54  ;;  %v3233_v13 = vmul.f32 0.0078125, %v3231_v49  ;;  %v3246_v49 = vsub.f32 %v3226_v46, %v3232_v15 }
 0xd96   : > { %v3267_v58 = vpop.xlane.xlu0 %3266 }
 0xd97   : > { %v3248_v63 = vadd.f32 1e-05, %v3244_v10  ;;  %v3270_v0 = vmul.f32 0.0078125, %v3267_v58  ;;  %v3243_v14 = vmul.f32 %v3233_v13, %v3233_v13  ;;  %v7715_v58 = vld [vmem:[#allocation330_spill] sm:$0xff] }
 0xd98   : > { %v3239_v12 = vpop.xlane.xlu1 %3238 }
 0xd99   : > { %4214 = vrsqrt.f32 %v3248_v63  ;;  %v3274_v2 = vsub.f32 %v3270_v0, %v3272_v7  ;;  %v3241_v16 = vmul.f32 0.0078125, %v3239_v12  ;;  %v7716_v12 = vld [vmem:[#allocation331_spill] sm:$0xff] }
 0xd9b   : > { %v3278_v17 = vadd.f32 1e-05, %v3274_v2  ;;  %v3245_v19 = vsub.f32 %v3241_v16, %v3243_v14  ;;  %v3247_v16 = vsub.f32 %v3227_v1, %v3233_v13  ;;  %v5120_v1 = vmov (%p929_p10), 0.0|0.0   ;;  %v3288_v13 = vld [vmem:[#allocation5] sm:$0x3] (%p929_p10) }
 0xd9c   : > { %v3269_v57 = vpop.xlane.xlu1 %3268  ;;  %3931 = vmatprep.subr.bf16.mxu0 (%p929_p10), %v5120_v1 }
 0xd9d   : > { %4216 = vrsqrt.f32 %v3278_v17  ;;  %v3249_v3 = vadd.f32 1e-05, %v3245_v19  ;;  %v3271_v5 = vmul.f32 0.0078125, %v3269_v57  ;;  %v7717_v17 = vld [vmem:[#allocation332_spill] sm:$0xff] }
 0xd9f   : > { %4218 = vrsqrt.f32 %v3249_v3  ;;  %v3275_v54 = vsub.f32 %v3271_v5, %v3273_v20  ;;  %v3277_v20 = vsub.f32 %v6706_v4, %v3263_v11  ;;  %v7718_v3 = vld [vmem:[#allocation333_spill] sm:$0xff] }
 0xda1   : > { %v3279_v8 = vadd.f32 1e-05, %v3275_v54  ;;  %v7720_v54 = vmov %v7554_v23 }
 0xda3   : > { %v4215_v21 = vpop.eup %4214  ;;  %4220 = vrsqrt.f32 %v3279_v8 }
 0xda4   : > { %v3252_v10 = vmul.f32 %v4215_v21, %v3246_v49 }
 0xda6   : > { %v3254_v63 = vmul.f32 %v7715_v58, %v3252_v10 }
 0xda7   : > { %v4217_v0 = vpop.eup %4216 }
 0xda8   : > { %v3256_v7 = vadd.f32 %v7716_v12, %v3254_v63   ;;  %v3282_v14 = vmul.f32 %v4217_v0, %v3276_v53  ;;  %v7719_v53 = vmov %v6438_v18  ;;  %v5122_v18 = vmov (%p929_p10), 0.0  }
 0xda9   : > { %v4219_v2 = vpop.eup %4218  ;;  %3921 = vmatprep.mubr.msk.f32.mxu0 (%p929_p10), %vm5121_vm3, %v5122_v18 }
 0xdaa   : > { %v3284_v19 = vmul.f32 %v7717_v17, %v3282_v14  ;;  %v3253_v57 = vmul.f32 %v4219_v2, %v3247_v16 }
 0xdac   : > { %v3286_v49 = vadd.f32 %v7718_v3, %v3284_v19   ;;  %v3255_v46 = vmul.f32 %v7715_v58, %v3253_v57  ;;  %931 = sbr.rel (!%p929_p10) target bundleno = 802 (0x322), region = 306 }
 0xdad   : > { %v4221_v21 = vpop.eup %4220 }
 0xdae   : > { %v3257_v6 = vadd.f32 %v7716_v12, %v3255_v46   ;;  %v3283_v15 = vmul.f32 %v4221_v21, %v3277_v20  ;;  %v7722_v46 = vmov %v3256_v7 }
 0xdb0   : > { %v3285_v9 = vmul.f32 %v7717_v17, %v3283_v15  ;;  %v7721_v57 = vmov %v3257_v6  ;;  %v3932_v4 = vpack.c.bf16 (%p929_p10), %v3257_v6, %v3256_v7 }
 0xdb2   : > { %v3287_v63 = vadd.f32 %v7718_v3, %v3285_v9   ;;  %3933 = vmatpush3.bf16.msra.mxu0 (%p929_p10), %v3932_v4 }
 0xdb5   :  { %3922 = vmatmul.mubr.msk.f32.vlgmr.msra.gmra.mrb[0].mxu0 %vm1249_vm1, %v3288_v13 }
 0xe88   :  { %v3359_v23 = vpop.f32.mrb[0].mxu0 }
 0xe89   :  { %3363 = vst [vmem:[#allocation50] sm:$0x3] %v3359_v23  ;;  %v3923_v11 = vpop.f32.mrb[1].mxu0 }
 0xe8a   :  { %4915 = shalt.err (!%p4912_p1)
}
 0xe8b   :  { %s4916_s22 = scalar_lea.hbm %s5287_s5, 32 }
 0xe8c   :  { %p4917_p2 = scmp.ne.s32.totalorder %s5287_s5, %s4916_s22  ;;  %p4920_p3 = scmp.lt.u32.totalorder %s4916_s22, %s5287_s5 }
 0xe8e   :  { %p4922_p4 = pnand %p4920_p3, %p4917_p2 }
 0xe90   :  { %4925 = shalt.err (!%p4922_p4)
}
 0xe91   :  { %3373 = dma.vmem_to_hbm [thread:$0]  %s3371_s0, 32, %s5287_s5, [#allocation4]  }
 0xe92   :  { %5002 = dma.done.wait [#allocation4], 32  }
 0xe93   :  { %5003 = vsyncadd [#allocation4], 4294967264 }
 0xe94   :  { %3377 = vsyncpa [#allocation3], 1 }
 0xe95   :  { %3378 = vsyncpa [#allocation6], 1 }
 0xe96   :  { %3379 = vsyncpa [#allocation9], 1 }
 0xe97   :  { %3380 = vsyncpa [#allocation12], 1 }
 0xe98   :  { %3381 = vsyncpa [#allocation15], 1 }
 0xe99   :  { %3382 = vsyncpa [#allocation18], 1 }
 0xe9a   :  { %3383 = vsyncpa [#allocation21], 1 }
 0xe9b   :  { %3384 = vsyncpa [#allocation24], 1 }
 0xe9c   :  { %3385 = vsyncpa [#allocation27], 1 }
 0xe9d   :  { %3386 = vsyncpa [#allocation30], 1 }
 0xe9e   :  { %3387 = vsyncpa [#allocation33], 1 }
 0xe9f   :  { %3388 = vsyncpa [#allocation36], 1 }
 0xea0   :  { %3389 = vsyncpa [#allocation39], 1 }
 0xea1   :  { %3390 = vsyncpa [#allocation42], 1 }
 0xea2   :  { %3391 = vsyncpa [#allocation45], 1 }
 0xea3   :  { %3392 = vsyncpa [#allocation48], 1 }
 0xea4   :  { %3393 = vsyncpa [#allocation4], 1 }

</bundles_post_ra>
